<compile_context>
chip_gen: v7x
topology: tpu7x:2x2x1
jax: 0.10.0
libtpu: 0.0.40
codegen_flags: <defaults>
</compile_context>

<pallas_src>
import functools
import math

import jax
import jax.numpy as jnp
import numpy as np
from jax.experimental import pallas as pl
from jax.experimental.pallas import tpu as pltpu

_INV_SQRT2 = 1.0 / math.sqrt(2.0)
_VMEM_LIMIT = 48 * 1024 * 1024   # above 16/32 MiB default scoped limits, safe on v7x (64 MiB phys)


def _round_up(a, b):
    return (a + b - 1) // b * b


def _gelu_exact(x):
    # nn.GELU() default (erf form). Keep exact for parity with the PyTorch module.
    return 0.5 * x * (1.0 + jax.lax.erf(x * _INV_SQRT2))


def _layernorm_rows(x, g, b, eps):
    mu = jnp.mean(x, axis=-1, keepdims=True)
    d = x - mu
    var = jnp.mean(d * d, axis=-1, keepdims=True)
    return d * jax.lax.rsqrt(var + eps) * g + b


# ------------------------------ fused Pallas kernel ---------------------------
def _convblock_kernel(x_ref, convw_ref, convb_ref, ln1g_ref, ln1b_ref,
                      fc1w_ref, fc1b_ref, fc2w_ref, fc2b_ref, ln2g_ref, ln2b_ref,
                      o_ref, pad_a, pad_b, cols,
                      *, H, W, C, ks, num_conv, eps, hd_chunk):
    """Whole ConvBlock for one image: convs -> +x -> LN1 -> MLP -> +z -> LN2."""
    p = ks // 2
    Wp = W + 2 * p
    HWp = H * Wp
    HW = H * W
    Hd = fc1w_ref.shape[1]

    xv = x_ref[0]                                    # [H, W, C] f32

    # ---- in-kernel halo padding: zero the flat padded-row scratch, fill interior ----
    pad_a[...] = jnp.zeros_like(pad_a)
    pad_b[...] = jnp.zeros_like(pad_b)
    for h in range(H):
        pad_a[pl.ds((h + p) * Wp + p, W), :] = xv[h]

    # validity mask on the padded-width row grid (last 2p columns of each row are halo)
    ridx = jax.lax.broadcasted_iota(jnp.int32, (HWp, 1), 0)
    keep = (ridx % Wp) < W

    src, dst = pad_a, pad_b
    conv_valid = None
    for i in range(num_conv):
        # VMEM-local im2col: each tap is a CONTIGUOUS row slice at flat offset kh*Wp+kw.
        for kh in range(ks):
            for kw in range(ks):
                t = kh * ks + kw
                cols[:, pl.ds(t * C, C)] = (
                    src[pl.ds(kh * Wp + kw, HWp), :].astype(jnp.bfloat16))
        # one MXU matmul per conv, K = ks*ks*C, f32 accumulation, + bias
        acc = jnp.dot(cols[...], convw_ref[i],
                      preferred_element_type=jnp.float32) + convb_ref[i]    # [HWp, C] f32
        if i < num_conv - 1:
            # zero the W-halo columns and place the result as the next conv's
            # zero-padded input (uniform flat shift by p*Wp + p keeps halos at zero).
            dst[pl.ds(p * Wp + p, HWp), :] = jnp.where(keep, acc, 0.0)
            src, dst = dst, src
        else:
            # strip the W-halo columns once at the end -> valid [H*W, C] tokens
            conv_valid = jnp.concatenate(
                [acc[h * Wp:h * Wp + W, :] for h in range(H)], axis=0)

    # ---- residual add + LayerNorm1 (f32) ----
    z = _layernorm_rows(xv.reshape(HW, C) + conv_valid,
                        ln1g_ref[...], ln1b_ref[...], eps)

    # ---- Mlp: fc1 + exact GELU + fc2 (hidden-dim chunked) + residual + LayerNorm2 ----
    zb = z.astype(jnp.bfloat16)
    r = z
    for c0 in range(0, Hd, hd_chunk):
        hpart = jnp.dot(zb, fc1w_ref[:, pl.ds(c0, hd_chunk)],
                        preferred_element_type=jnp.float32) + fc1b_ref[:, pl.ds(c0, hd_chunk)]
        hpart = _gelu_exact(hpart)
        r = r + jnp.dot(hpart.astype(jnp.bfloat16), fc2w_ref[pl.ds(c0, hd_chunk), :],
                        preferred_element_type=jnp.float32)
    r = r + fc2b_ref[...]
    o_ref[0] = _layernorm_rows(r, ln2g_ref[...], ln2b_ref[...], eps)


# ------------------------------ pallas_call wrapper ---------------------------
def _convblock_call(x_nhwc, conv_w, conv_b, ln1_g, ln1_b,
                    fc1_w, fc1_b, fc2_w, fc2_b, ln2_g, ln2_b,
                    *, ks, num_conv, eps):
    B, H, W, C = x_nhwc.shape
    Hd = fc1_w.shape[1]
    p = ks // 2
    Hp, Wp = H + 2 * p, W + 2 * p
    HWp = H * Wp
    pad_rows = _round_up(Hp * Wp + (ks - 1), 8)          # room for the last shifted tap read
    hd_chunk = 256 if (Hd > 256 and Hd % 256 == 0) else Hd

    kernel = functools.partial(_convblock_kernel, H=H, W=W, C=C, ks=ks,
                               num_conv=num_conv, eps=eps, hd_chunk=hd_chunk)
    return pl.pallas_call(
        kernel,
        out_shape=jax.ShapeDtypeStruct((B, H * W, C), jnp.float32),
        grid=(B,),
        in_specs=[
            pl.BlockSpec((1, H, W, C), lambda b: (b, 0, 0, 0)),             # x NHWC f32
            pl.BlockSpec((num_conv, ks * ks * C, C), lambda b: (0, 0, 0)),  # conv taps (bf16)
            pl.BlockSpec((num_conv, 1, C), lambda b: (0, 0, 0)),            # conv biases
            pl.BlockSpec((1, C), lambda b: (0, 0)),                         # LN1 gamma
            pl.BlockSpec((1, C), lambda b: (0, 0)),                         # LN1 beta
            pl.BlockSpec((C, Hd), lambda b: (0, 0)),                        # fc1 weight (bf16)
            pl.BlockSpec((1, Hd), lambda b: (0, 0)),                        # fc1 bias
            pl.BlockSpec((Hd, C), lambda b: (0, 0)),                        # fc2 weight (bf16)
            pl.BlockSpec((1, C), lambda b: (0, 0)),                         # fc2 bias
            pl.BlockSpec((1, C), lambda b: (0, 0)),                         # LN2 gamma
            pl.BlockSpec((1, C), lambda b: (0, 0)),                         # LN2 beta
        ],
        out_specs=pl.BlockSpec((1, H * W, C), lambda b: (b, 0, 0)),
        scratch_shapes=[
            pltpu.VMEM((pad_rows, C), jnp.float32),          # padded input of conv i
            pltpu.VMEM((pad_rows, C), jnp.float32),          # padded input of conv i+1
            pltpu.VMEM((HWp, ks * ks * C), jnp.bfloat16),    # VMEM-local im2col tile
        ],
        compiler_params=pltpu.CompilerParams(
            dimension_semantics=("parallel",),
            vmem_limit_bytes=_VMEM_LIMIT),
    )(x_nhwc, conv_w, conv_b, ln1_g, ln1_b, fc1_w, fc1_b, fc2_w, fc2_b, ln2_g, ln2_b)


# ------------------------------ parameter helpers ------------------------------
def _grouped_weight_to_dense_taps(w_oihw, groups):
    """[Cout, Cin/g, ks, ks] grouped conv weight -> block-diagonal dense [ks*ks*Cin, Cout]."""
    Cout, Cg, ks, ks2 = w_oihw.shape
    assert ks == ks2
    Cin = Cg * groups
    Cog = Cout // groups
    w_t = jnp.transpose(w_oihw, (2, 3, 1, 0)).reshape(ks * ks, Cg, Cout)   # [tap, j, co]
    dense = jnp.zeros((ks * ks, Cin, Cout), jnp.float32)
    for g in range(groups):
        dense = dense.at[:, g * Cg:(g + 1) * Cg, g * Cog:(g + 1) * Cog].set(
            w_t[:, :, g * Cog:(g + 1) * Cog])
    return dense.reshape(ks * ks * Cin, Cout)


class ConvBlockPallas:
    """JAX/Pallas re-implementation of SVTRv2 ConvBlock (inference: drop=drop_path=0)."""

    def __init__(self, key, dim, num_heads, mlp_ratio=4.0, eps=1e-6,
                 num_conv=2, kernel_size=3):
        assert dim % num_heads == 0
        self.dim = dim
        self.num_heads = num_heads
        self.eps = eps
        self.num_conv = num_conv
        self.kernel_size = kernel_size
        hidden = int(dim * mlp_ratio)
        self.hidden = hidden

        keys = jax.random.split(key, 2 * num_conv + 8)
        cg = dim // num_heads
        fan = cg * kernel_size * kernel_size

        # grouped conv weights (PyTorch layout [Cout, Cin/g, ks, ks]) + biases
        self.conv_params = []
        for i in range(num_conv):
            w = (jax.random.normal(keys[2 * i], (dim, cg, kernel_size, kernel_size),
                                   jnp.float32) * math.sqrt(2.0 / fan))
            b = 0.02 * jax.random.normal(keys[2 * i + 1], (dim,), jnp.float32)
            self.conv_params.append((w, b))
        k = 2 * num_conv
        # Mlp: fc1 [dim, hidden], fc2 [hidden, dim] (stored [in, out])
        self.w_fc1 = 0.02 * jax.random.normal(keys[k + 0], (dim, hidden), jnp.float32)
        self.b_fc1 = 0.02 * jax.random.normal(keys[k + 1], (hidden,), jnp.float32)
        self.w_fc2 = 0.02 * jax.random.normal(keys[k + 2], (hidden, dim), jnp.float32)
        self.b_fc2 = 0.02 * jax.random.normal(keys[k + 3], (dim,), jnp.float32)
        # LayerNorm params (perturbed from init so the test is non-trivial)
        self.ln1_g = 1.0 + 0.05 * jax.random.normal(keys[k + 4], (dim,), jnp.float32)
        self.ln1_b = 0.05 * jax.random.normal(keys[k + 5], (dim,), jnp.float32)
        self.ln2_g = 1.0 + 0.05 * jax.random.normal(keys[k + 6], (dim,), jnp.float32)
        self.ln2_b = 0.05 * jax.random.normal(keys[k + 7], (dim,), jnp.float32)

        # pre-fold grouping into block-diagonal dense per-tap weights; bf16 MXU operands
        self.conv_w_bf16 = jnp.stack(
            [_grouped_weight_to_dense_taps(w, num_heads) for (w, _) in self.conv_params]
        ).astype(jnp.bfloat16)                                    # [num_conv, ks*ks*C, C]
        self.conv_b = jnp.stack([b for (_, b) in self.conv_params]).reshape(num_conv, 1, dim)
        self.w_fc1_bf16 = self.w_fc1.astype(jnp.bfloat16)
        self.w_fc2_bf16 = self.w_fc2.astype(jnp.bfloat16)

    def __call__(self, x_nchw):
        B, C, H, W = x_nchw.shape
        x_nhwc = jnp.transpose(x_nchw, (0, 2, 3, 1)).astype(jnp.float32)   # NCHW -> NHWC
        tokens = _convblock_call(
            x_nhwc, self.conv_w_bf16, self.conv_b,
            self.ln1_g.reshape(1, C), self.ln1_b.reshape(1, C),
            self.w_fc1_bf16, self.b_fc1.reshape(1, self.hidden),
            self.w_fc2_bf16, self.b_fc2.reshape(1, C),
            self.ln2_g.reshape(1, C), self.ln2_b.reshape(1, C),
            ks=self.kernel_size, num_conv=self.num_conv, eps=self.eps)      # [B, HW, C] f32
        y = tokens.reshape(B, H, W, C)
        return jnp.transpose(y, (0, 3, 1, 2))                               # back to NCHW


# ------------------------------ pure-JAX reference ----------------------------
def _ref_layernorm(x, g, b, eps):
    mu = jnp.mean(x, axis=-1, keepdims=True)
    d = x - mu
    var = jnp.mean(d * d, axis=-1, keepdims=True)
    return d * jax.lax.rsqrt(var + eps) * g + b


def _ref_forward(mod, x_nchw):
    """Pure-JAX reference mirroring the kernel's bf16-operand / f32-accum precision."""
    B, C, H, W = x_nchw.shape
    p = mod.kernel_size // 2
    x_nhwc = jnp.transpose(x_nchw, (0, 2, 3, 1)).astype(jnp.float32)
    t = x_nhwc
    for (w, b) in mod.conv_params:
        w_hwio = jnp.transpose(w, (2, 3, 1, 0))                 # [ks, ks, Cin/g, Cout]
        t = jax.lax.conv_general_dilated(
            t.astype(jnp.bfloat16), w_hwio.astype(jnp.bfloat16),
            window_strides=(1, 1), padding=((p, p), (p, p)),
            dimension_numbers=("NHWC", "HWIO", "NHWC"),
            feature_group_count=mod.num_heads,
            preferred_element_type=jnp.float32) + b
    z = _ref_layernorm((x_nhwc + t).reshape(B, H * W, C), mod.ln1_g, mod.ln1_b, mod.eps)
    h = jnp.dot(z.astype(jnp.bfloat16), mod.w_fc1.astype(jnp.bfloat16),
                preferred_element_type=jnp.float32) + mod.b_fc1
    h = _gelu_exact(h)
    m = jnp.dot(h.astype(jnp.bfloat16), mod.w_fc2.astype(jnp.bfloat16),
                preferred_element_type=jnp.float32) + mod.b_fc2
    out = _ref_layernorm(z + m, mod.ln2_g, mod.ln2_b, mod.eps)
    return jnp.transpose(out.reshape(B, H, W, C), (0, 3, 1, 2))


if __name__ == "__main__":
    key = jax.random.PRNGKey(0)
    k_param, k_x = jax.random.split(key)

    # small but lane-dense config: dim multiple of 128 keeps loads/stores unmasked
    B, dim, H, W = 2, 128, 8, 8
    num_heads = 4

    mod = ConvBlockPallas(k_param, dim=dim, num_heads=num_heads, mlp_ratio=4.0,
                          eps=1e-6, num_conv=2, kernel_size=3)
    x = jax.random.normal(k_x, (B, dim, H, W), jnp.float32)

    fwd = jax.jit(lambda inp: mod(inp))
    out = jax.block_until_ready(fwd(x))
    assert out.shape == (B, dim, H, W), out.shape

    ref = jax.block_until_ready(_ref_forward(mod, x))
    np.testing.assert_allclose(np.asarray(out), np.asarray(ref), rtol=2e-2, atol=2e-2)

    print("KERNEL_OK")
</pallas_src>

<mosaic_0001>
module attributes {stable_mosaic.version = 11 : i64} {
  func.func @_convblock_kernel(%arg0: i32, %arg1: memref<1x8x8x128xf32, #tpu.memory_space<vmem>>, %arg2: memref<2x1152x128xbf16, #tpu.memory_space<vmem>>, %arg3: memref<2x1x128xf32, #tpu.memory_space<vmem>>, %arg4: memref<1x128xf32, #tpu.memory_space<vmem>>, %arg5: memref<1x128xf32, #tpu.memory_space<vmem>>, %arg6: memref<128x512xbf16, #tpu.memory_space<vmem>>, %arg7: memref<1x512xf32, #tpu.memory_space<vmem>>, %arg8: memref<512x128xbf16, #tpu.memory_space<vmem>>, %arg9: memref<1x128xf32, #tpu.memory_space<vmem>>, %arg10: memref<1x128xf32, #tpu.memory_space<vmem>>, %arg11: memref<1x128xf32, #tpu.memory_space<vmem>>, %arg12: memref<1x64x128xf32, #tpu.memory_space<vmem>>, %arg13: memref<104x128xf32, #tpu.memory_space<vmem>>, %arg14: memref<104x128xf32, #tpu.memory_space<vmem>>, %arg15: memref<80x1152xbf16, #tpu.memory_space<vmem>>) attributes {dimension_semantics = [#tpu.dimension_semantics<parallel>], iteration_bounds = array<i64: 2>, scalar_prefetch = 0 : i64, scratch_operands = 3 : i64, tpu.core_type = #tpu.core_type<tc>, window_params = [{transform_indices = @transform_0, window_bounds = array<i64: 1, 8, 8, 128>}, {pipeline_mode = #tpu.pipeline_mode<synchronous>, transform_indices = @transform_1, window_bounds = array<i64: 2, 1152, 128>}, {pipeline_mode = #tpu.pipeline_mode<synchronous>, transform_indices = @transform_2, window_bounds = array<i64: 2, 1, 128>}, {pipeline_mode = #tpu.pipeline_mode<synchronous>, transform_indices = @transform_3, window_bounds = array<i64: 1, 128>}, {pipeline_mode = #tpu.pipeline_mode<synchronous>, transform_indices = @transform_4, window_bounds = array<i64: 1, 128>}, {pipeline_mode = #tpu.pipeline_mode<synchronous>, transform_indices = @transform_5, window_bounds = array<i64: 128, 512>}, {pipeline_mode = #tpu.pipeline_mode<synchronous>, transform_indices = @transform_6, window_bounds = array<i64: 1, 512>}, {pipeline_mode = #tpu.pipeline_mode<synchronous>, transform_indices = @transform_7, window_bounds = array<i64: 512, 128>}, {pipeline_mode = #tpu.pipeline_mode<synchronous>, transform_indices = @transform_8, window_bounds = array<i64: 1, 128>}, {pipeline_mode = #tpu.pipeline_mode<synchronous>, transform_indices = @transform_9, window_bounds = array<i64: 1, 128>}, {pipeline_mode = #tpu.pipeline_mode<synchronous>, transform_indices = @transform_10, window_bounds = array<i64: 1, 128>}, {transform_indices = @transform_11, window_bounds = array<i64: 1, 64, 128>}]} {
    %c0 = arith.constant 0 : index
    %c0_0 = arith.constant 0 : index
    %c0_1 = arith.constant 0 : index
    %c0_2 = arith.constant 0 : index
    %0 = vector.load %arg1[%c0, %c0_0, %c0_1, %c0_2] : memref<1x8x8x128xf32, #tpu.memory_space<vmem>>, vector<1x8x8x128xf32>
    %1 = vector.shape_cast %0 : vector<1x8x8x128xf32> to vector<8x8x128xf32>
    %cst = arith.constant 0.000000e+00 : f32
    %2 = vector.broadcast %cst : f32 to vector<104x128xf32>
    %c0_3 = arith.constant 0 : index
    %c0_4 = arith.constant 0 : index
    %3 = vector.load %arg13[%c0_3, %c0_4] : memref<104x128xf32, #tpu.memory_space<vmem>>, vector<104x128xf32>
    tpu.vector_store %arg13[%c0_3, %c0_4], %2 {strides = array<i32>} : memref<104x128xf32, #tpu.memory_space<vmem>>, vector<104x128xf32>,
    %cst_5 = arith.constant 0.000000e+00 : f32
    %4 = vector.broadcast %cst_5 : f32 to vector<104x128xf32>
    %c0_6 = arith.constant 0 : index
    %c0_7 = arith.constant 0 : index
    %5 = vector.load %arg14[%c0_6, %c0_7] : memref<104x128xf32, #tpu.memory_space<vmem>>, vector<104x128xf32>
    tpu.vector_store %arg14[%c0_6, %c0_7], %4 {strides = array<i32>} : memref<104x128xf32, #tpu.memory_space<vmem>>, vector<104x128xf32>,
    %6 = vector.extract_strided_slice %1 {offsets = [0, 0, 0], sizes = [1, 8, 128], strides = [1, 1, 1]} : vector<8x8x128xf32> to vector<1x8x128xf32>
    %7 = vector.shape_cast %6 : vector<1x8x128xf32> to vector<8x128xf32>
    %c11 = arith.constant 11 : index
    %c0_8 = arith.constant 0 : index
    %8 = vector.load %arg13[%c11, %c0_8] : memref<104x128xf32, #tpu.memory_space<vmem>>, vector<8x128xf32>
    tpu.vector_store %arg13[%c11, %c0_8], %7 {strides = array<i32>} : memref<104x128xf32, #tpu.memory_space<vmem>>, vector<8x128xf32>,
    %9 = vector.extract_strided_slice %1 {offsets = [1, 0, 0], sizes = [1, 8, 128], strides = [1, 1, 1]} : vector<8x8x128xf32> to vector<1x8x128xf32>
    %10 = vector.shape_cast %9 : vector<1x8x128xf32> to vector<8x128xf32>
    %c21 = arith.constant 21 : index
    %c0_9 = arith.constant 0 : index
    %11 = vector.load %arg13[%c21, %c0_9] : memref<104x128xf32, #tpu.memory_space<vmem>>, vector<8x128xf32>
    tpu.vector_store %arg13[%c21, %c0_9], %10 {strides = array<i32>} : memref<104x128xf32, #tpu.memory_space<vmem>>, vector<8x128xf32>,
    %12 = vector.extract_strided_slice %1 {offsets = [2, 0, 0], sizes = [1, 8, 128], strides = [1, 1, 1]} : vector<8x8x128xf32> to vector<1x8x128xf32>
    %13 = vector.shape_cast %12 : vector<1x8x128xf32> to vector<8x128xf32>
    %c31 = arith.constant 31 : index
    %c0_10 = arith.constant 0 : index
    %14 = vector.load %arg13[%c31, %c0_10] : memref<104x128xf32, #tpu.memory_space<vmem>>, vector<8x128xf32>
    tpu.vector_store %arg13[%c31, %c0_10], %13 {strides = array<i32>} : memref<104x128xf32, #tpu.memory_space<vmem>>, vector<8x128xf32>,
    %15 = vector.extract_strided_slice %1 {offsets = [3, 0, 0], sizes = [1, 8, 128], strides = [1, 1, 1]} : vector<8x8x128xf32> to vector<1x8x128xf32>
    %16 = vector.shape_cast %15 : vector<1x8x128xf32> to vector<8x128xf32>
    %c41 = arith.constant 41 : index
    %c0_11 = arith.constant 0 : index
    %17 = vector.load %arg13[%c41, %c0_11] : memref<104x128xf32, #tpu.memory_space<vmem>>, vector<8x128xf32>
    tpu.vector_store %arg13[%c41, %c0_11], %16 {strides = array<i32>} : memref<104x128xf32, #tpu.memory_space<vmem>>, vector<8x128xf32>,
    %18 = vector.extract_strided_slice %1 {offsets = [4, 0, 0], sizes = [1, 8, 128], strides = [1, 1, 1]} : vector<8x8x128xf32> to vector<1x8x128xf32>
    %19 = vector.shape_cast %18 : vector<1x8x128xf32> to vector<8x128xf32>
    %c51 = arith.constant 51 : index
    %c0_12 = arith.constant 0 : index
    %20 = vector.load %arg13[%c51, %c0_12] : memref<104x128xf32, #tpu.memory_space<vmem>>, vector<8x128xf32>
    tpu.vector_store %arg13[%c51, %c0_12], %19 {strides = array<i32>} : memref<104x128xf32, #tpu.memory_space<vmem>>, vector<8x128xf32>,
    %21 = vector.extract_strided_slice %1 {offsets = [5, 0, 0], sizes = [1, 8, 128], strides = [1, 1, 1]} : vector<8x8x128xf32> to vector<1x8x128xf32>
    %22 = vector.shape_cast %21 : vector<1x8x128xf32> to vector<8x128xf32>
    %c61 = arith.constant 61 : index
    %c0_13 = arith.constant 0 : index
    %23 = vector.load %arg13[%c61, %c0_13] : memref<104x128xf32, #tpu.memory_space<vmem>>, vector<8x128xf32>
    tpu.vector_store %arg13[%c61, %c0_13], %22 {strides = array<i32>} : memref<104x128xf32, #tpu.memory_space<vmem>>, vector<8x128xf32>,
    %24 = vector.extract_strided_slice %1 {offsets = [6, 0, 0], sizes = [1, 8, 128], strides = [1, 1, 1]} : vector<8x8x128xf32> to vector<1x8x128xf32>
    %25 = vector.shape_cast %24 : vector<1x8x128xf32> to vector<8x128xf32>
    %c71 = arith.constant 71 : index
    %c0_14 = arith.constant 0 : index
    %26 = vector.load %arg13[%c71, %c0_14] : memref<104x128xf32, #tpu.memory_space<vmem>>, vector<8x128xf32>
    tpu.vector_store %arg13[%c71, %c0_14], %25 {strides = array<i32>} : memref<104x128xf32, #tpu.memory_space<vmem>>, vector<8x128xf32>,
    %27 = vector.extract_strided_slice %1 {offsets = [7, 0, 0], sizes = [1, 8, 128], strides = [1, 1, 1]} : vector<8x8x128xf32> to vector<1x8x128xf32>
    %28 = vector.shape_cast %27 : vector<1x8x128xf32> to vector<8x128xf32>
    %c81 = arith.constant 81 : index
    %c0_15 = arith.constant 0 : index
    %29 = vector.load %arg13[%c81, %c0_15] : memref<104x128xf32, #tpu.memory_space<vmem>>, vector<8x128xf32>
    tpu.vector_store %arg13[%c81, %c0_15], %28 {strides = array<i32>} : memref<104x128xf32, #tpu.memory_space<vmem>>, vector<8x128xf32>,
    %30 = tpu.iota {dimensions = array<i32: 0>} : vector<80x1xi32>
    %c10_i32 = arith.constant 10 : i32
    %c0_i32 = arith.constant 0 : i32
    %31 = arith.cmpi eq, %c10_i32, %c0_i32 : i32
    %c1_i32 = arith.constant 1 : i32
    %32 = arith.select %31, %c1_i32, %c10_i32 : i32
    %33 = vector.broadcast %32 : i32 to vector<80x1xi32>
    %34 = arith.remsi %30, %33 : vector<80x1xi32>
    %c0_i32_16 = arith.constant 0 : i32
    %35 = vector.broadcast %c0_i32_16 : i32 to vector<80x1xi32>
    %36 = arith.cmpi ne, %34, %35 : vector<80x1xi32>
    %c0_i32_17 = arith.constant 0 : i32
    %37 = vector.broadcast %c0_i32_17 : i32 to vector<80x1xi32>
    %38 = arith.cmpi slt, %34, %37 : vector<80x1xi32>
    %c0_i32_18 = arith.constant 0 : i32
    %39 = arith.cmpi slt, %32, %c0_i32_18 : i32
    %40 = vector.broadcast %39 : i1 to vector<80x1xi1>
    %41 = vector.broadcast %40 : vector<80x1xi1> to vector<80x1xi1>
    %42 = arith.xori %38, %41 : vector<80x1xi1>
    %43 = arith.andi %42, %36 : vector<80x1xi1>
    %44 = vector.broadcast %32 : i32 to vector<80x1xi32>
    %45 = arith.addi %34, %44 : vector<80x1xi32>
    %46 = arith.select %43, %45, %34 : vector<80x1xi1>, vector<80x1xi32>
    %c8_i32 = arith.constant 8 : i32
    %47 = vector.broadcast %c8_i32 : i32 to vector<80x1xi32>
    %48 = arith.cmpi slt, %46, %47 : vector<80x1xi32>
    %c0_19 = arith.constant 0 : index
    %c0_20 = arith.constant 0 : index
    %49 = vector.load %arg13[%c0_19, %c0_20] : memref<104x128xf32, #tpu.memory_space<vmem>>, vector<80x128xf32>
    %50 = arith.truncf %49 : vector<80x128xf32> to vector<80x128xbf16>
    %c0_21 = arith.constant 0 : index
    %c0_22 = arith.constant 0 : index
    %51 = vector.load %arg15[%c0_21, %c0_22] : memref<80x1152xbf16, #tpu.memory_space<vmem>>, vector<80x128xbf16>
    tpu.vector_store %arg15[%c0_21, %c0_22], %50 {strides = array<i32>} : memref<80x1152xbf16, #tpu.memory_space<vmem>>, vector<80x128xbf16>,
    %c1 = arith.constant 1 : index
    %c0_23 = arith.constant 0 : index
    %52 = vector.load %arg13[%c1, %c0_23] : memref<104x128xf32, #tpu.memory_space<vmem>>, vector<80x128xf32>
    %53 = arith.truncf %52 : vector<80x128xf32> to vector<80x128xbf16>
    %c0_24 = arith.constant 0 : index
    %c128 = arith.constant 128 : index
    %54 = vector.load %arg15[%c0_24, %c128] : memref<80x1152xbf16, #tpu.memory_space<vmem>>, vector<80x128xbf16>
    tpu.vector_store %arg15[%c0_24, %c128], %53 {strides = array<i32>} : memref<80x1152xbf16, #tpu.memory_space<vmem>>, vector<80x128xbf16>,
    %c2 = arith.constant 2 : index
    %c0_25 = arith.constant 0 : index
    %55 = vector.load %arg13[%c2, %c0_25] : memref<104x128xf32, #tpu.memory_space<vmem>>, vector<80x128xf32>
    %56 = arith.truncf %55 : vector<80x128xf32> to vector<80x128xbf16>
    %c0_26 = arith.constant 0 : index
    %c256 = arith.constant 256 : index
    %57 = vector.load %arg15[%c0_26, %c256] : memref<80x1152xbf16, #tpu.memory_space<vmem>>, vector<80x128xbf16>
    tpu.vector_store %arg15[%c0_26, %c256], %56 {strides = array<i32>} : memref<80x1152xbf16, #tpu.memory_space<vmem>>, vector<80x128xbf16>,
    %c10 = arith.constant 10 : index
    %c0_27 = arith.constant 0 : index
    %58 = vector.load %arg13[%c10, %c0_27] : memref<104x128xf32, #tpu.memory_space<vmem>>, vector<80x128xf32>
    %59 = arith.truncf %58 : vector<80x128xf32> to vector<80x128xbf16>
    %c0_28 = arith.constant 0 : index
    %c384 = arith.constant 384 : index
    %60 = vector.load %arg15[%c0_28, %c384] : memref<80x1152xbf16, #tpu.memory_space<vmem>>, vector<80x128xbf16>
    tpu.vector_store %arg15[%c0_28, %c384], %59 {strides = array<i32>} : memref<80x1152xbf16, #tpu.memory_space<vmem>>, vector<80x128xbf16>,
    %c11_29 = arith.constant 11 : index
    %c0_30 = arith.constant 0 : index
    %61 = vector.load %arg13[%c11_29, %c0_30] : memref<104x128xf32, #tpu.memory_space<vmem>>, vector<80x128xf32>
    %62 = arith.truncf %61 : vector<80x128xf32> to vector<80x128xbf16>
    %c0_31 = arith.constant 0 : index
    %c512 = arith.constant 512 : index
    %63 = vector.load %arg15[%c0_31, %c512] : memref<80x1152xbf16, #tpu.memory_space<vmem>>, vector<80x128xbf16>
    tpu.vector_store %arg15[%c0_31, %c512], %62 {strides = array<i32>} : memref<80x1152xbf16, #tpu.memory_space<vmem>>, vector<80x128xbf16>,
    %c12 = arith.constant 12 : index
    %c0_32 = arith.constant 0 : index
    %64 = vector.load %arg13[%c12, %c0_32] : memref<104x128xf32, #tpu.memory_space<vmem>>, vector<80x128xf32>
    %65 = arith.truncf %64 : vector<80x128xf32> to vector<80x128xbf16>
    %c0_33 = arith.constant 0 : index
    %c640 = arith.constant 640 : index
    %66 = vector.load %arg15[%c0_33, %c640] : memref<80x1152xbf16, #tpu.memory_space<vmem>>, vector<80x128xbf16>
    tpu.vector_store %arg15[%c0_33, %c640], %65 {strides = array<i32>} : memref<80x1152xbf16, #tpu.memory_space<vmem>>, vector<80x128xbf16>,
    %c20 = arith.constant 20 : index
    %c0_34 = arith.constant 0 : index
    %67 = vector.load %arg13[%c20, %c0_34] : memref<104x128xf32, #tpu.memory_space<vmem>>, vector<80x128xf32>
    %68 = arith.truncf %67 : vector<80x128xf32> to vector<80x128xbf16>
    %c0_35 = arith.constant 0 : index
    %c768 = arith.constant 768 : index
    %69 = vector.load %arg15[%c0_35, %c768] : memref<80x1152xbf16, #tpu.memory_space<vmem>>, vector<80x128xbf16>
    tpu.vector_store %arg15[%c0_35, %c768], %68 {strides = array<i32>} : memref<80x1152xbf16, #tpu.memory_space<vmem>>, vector<80x128xbf16>,
    %c21_36 = arith.constant 21 : index
    %c0_37 = arith.constant 0 : index
    %70 = vector.load %arg13[%c21_36, %c0_37] : memref<104x128xf32, #tpu.memory_space<vmem>>, vector<80x128xf32>
    %71 = arith.truncf %70 : vector<80x128xf32> to vector<80x128xbf16>
    %c0_38 = arith.constant 0 : index
    %c896 = arith.constant 896 : index
    %72 = vector.load %arg15[%c0_38, %c896] : memref<80x1152xbf16, #tpu.memory_space<vmem>>, vector<80x128xbf16>
    tpu.vector_store %arg15[%c0_38, %c896], %71 {strides = array<i32>} : memref<80x1152xbf16, #tpu.memory_space<vmem>>, vector<80x128xbf16>,
    %c22 = arith.constant 22 : index
    %c0_39 = arith.constant 0 : index
    %73 = vector.load %arg13[%c22, %c0_39] : memref<104x128xf32, #tpu.memory_space<vmem>>, vector<80x128xf32>
    %74 = arith.truncf %73 : vector<80x128xf32> to vector<80x128xbf16>
    %c0_40 = arith.constant 0 : index
    %c1024 = arith.constant 1024 : index
    %75 = vector.load %arg15[%c0_40, %c1024] : memref<80x1152xbf16, #tpu.memory_space<vmem>>, vector<80x128xbf16>
    tpu.vector_store %arg15[%c0_40, %c1024], %74 {strides = array<i32>} : memref<80x1152xbf16, #tpu.memory_space<vmem>>, vector<80x128xbf16>,
    %c0_41 = arith.constant 0 : index
    %c0_42 = arith.constant 0 : index
    %76 = vector.load %arg15[%c0_41, %c0_42] : memref<80x1152xbf16, #tpu.memory_space<vmem>>, vector<80x1152xbf16>
    %c0_43 = arith.constant 0 : index
    %c0_44 = arith.constant 0 : index
    %c0_45 = arith.constant 0 : index
    %77 = vector.load %arg2[%c0_43, %c0_44, %c0_45] : memref<2x1152x128xbf16, #tpu.memory_space<vmem>>, vector<1x1152x128xbf16>
    %78 = vector.shape_cast %77 : vector<1x1152x128xbf16> to vector<1152x128xbf16>
    %cst_46 = arith.constant dense<0.000000e+00> : vector<80x128xf32>
    %79 = tpu.matmul %76, %78, %cst_46 {dimension_numbers = #tpu.dot_dimension_numbers<[1], [0], [0], [1], [0, 0, 1, 1], [], []>} : vector<80x1152xbf16>, vector<1152x128xbf16>, vector<80x128xf32> -> vector<80x128xf32>
    %c0_47 = arith.constant 0 : index
    %c0_48 = arith.constant 0 : index
    %c0_49 = arith.constant 0 : index
    %80 = vector.load %arg3[%c0_47, %c0_48, %c0_49] : memref<2x1x128xf32, #tpu.memory_space<vmem>>, vector<1x1x128xf32>
    %81 = vector.shape_cast %80 : vector<1x1x128xf32> to vector<1x128xf32>
    %82 = vector.broadcast %81 : vector<1x128xf32> to vector<80x128xf32>
    %83 = arith.addf %79, %82 : vector<80x128xf32>
    %cst_50 = arith.constant 0.000000e+00 : f32
    %84 = vector.shape_cast %48 : vector<80x1xi1> to vector<80x1xi1>
    %85 = vector.broadcast %84 : vector<80x1xi1> to vector<80x128xi1>
    %86 = vector.broadcast %cst_50 : f32 to vector<80x128xf32>
    %87 = arith.select %85, %83, %86 : vector<80x128xi1>, vector<80x128xf32>
    %c11_51 = arith.constant 11 : index
    %c0_52 = arith.constant 0 : index
    %88 = vector.load %arg14[%c11_51, %c0_52] : memref<104x128xf32, #tpu.memory_space<vmem>>, vector<80x128xf32>
    tpu.vector_store %arg14[%c11_51, %c0_52], %87 {strides = array<i32>} : memref<104x128xf32, #tpu.memory_space<vmem>>, vector<80x128xf32>,
    %c0_53 = arith.constant 0 : index
    %c0_54 = arith.constant 0 : index
    %89 = vector.load %arg14[%c0_53, %c0_54] : memref<104x128xf32, #tpu.memory_space<vmem>>, vector<80x128xf32>
    %90 = arith.truncf %89 : vector<80x128xf32> to vector<80x128xbf16>
    %c0_55 = arith.constant 0 : index
    %c0_56 = arith.constant 0 : index
    %91 = vector.load %arg15[%c0_55, %c0_56] : memref<80x1152xbf16, #tpu.memory_space<vmem>>, vector<80x128xbf16>
    tpu.vector_store %arg15[%c0_55, %c0_56], %90 {strides = array<i32>} : memref<80x1152xbf16, #tpu.memory_space<vmem>>, vector<80x128xbf16>,
    %c1_57 = arith.constant 1 : index
    %c0_58 = arith.constant 0 : index
    %92 = vector.load %arg14[%c1_57, %c0_58] : memref<104x128xf32, #tpu.memory_space<vmem>>, vector<80x128xf32>
    %93 = arith.truncf %92 : vector<80x128xf32> to vector<80x128xbf16>
    %c0_59 = arith.constant 0 : index
    %c128_60 = arith.constant 128 : index
    %94 = vector.load %arg15[%c0_59, %c128_60] : memref<80x1152xbf16, #tpu.memory_space<vmem>>, vector<80x128xbf16>
    tpu.vector_store %arg15[%c0_59, %c128_60], %93 {strides = array<i32>} : memref<80x1152xbf16, #tpu.memory_space<vmem>>, vector<80x128xbf16>,
    %c2_61 = arith.constant 2 : index
    %c0_62 = arith.constant 0 : index
    %95 = vector.load %arg14[%c2_61, %c0_62] : memref<104x128xf32, #tpu.memory_space<vmem>>, vector<80x128xf32>
    %96 = arith.truncf %95 : vector<80x128xf32> to vector<80x128xbf16>
    %c0_63 = arith.constant 0 : index
    %c256_64 = arith.constant 256 : index
    %97 = vector.load %arg15[%c0_63, %c256_64] : memref<80x1152xbf16, #tpu.memory_space<vmem>>, vector<80x128xbf16>
    tpu.vector_store %arg15[%c0_63, %c256_64], %96 {strides = array<i32>} : memref<80x1152xbf16, #tpu.memory_space<vmem>>, vector<80x128xbf16>,
    %c10_65 = arith.constant 10 : index
    %c0_66 = arith.constant 0 : index
    %98 = vector.load %arg14[%c10_65, %c0_66] : memref<104x128xf32, #tpu.memory_space<vmem>>, vector<80x128xf32>
    %99 = arith.truncf %98 : vector<80x128xf32> to vector<80x128xbf16>
    %c0_67 = arith.constant 0 : index
    %c384_68 = arith.constant 384 : index
    %100 = vector.load %arg15[%c0_67, %c384_68] : memref<80x1152xbf16, #tpu.memory_space<vmem>>, vector<80x128xbf16>
    tpu.vector_store %arg15[%c0_67, %c384_68], %99 {strides = array<i32>} : memref<80x1152xbf16, #tpu.memory_space<vmem>>, vector<80x128xbf16>,
    %c11_69 = arith.constant 11 : index
    %c0_70 = arith.constant 0 : index
    %101 = vector.load %arg14[%c11_69, %c0_70] : memref<104x128xf32, #tpu.memory_space<vmem>>, vector<80x128xf32>
    %102 = arith.truncf %101 : vector<80x128xf32> to vector<80x128xbf16>
    %c0_71 = arith.constant 0 : index
    %c512_72 = arith.constant 512 : index
    %103 = vector.load %arg15[%c0_71, %c512_72] : memref<80x1152xbf16, #tpu.memory_space<vmem>>, vector<80x128xbf16>
    tpu.vector_store %arg15[%c0_71, %c512_72], %102 {strides = array<i32>} : memref<80x1152xbf16, #tpu.memory_space<vmem>>, vector<80x128xbf16>,
    %c12_73 = arith.constant 12 : index
    %c0_74 = arith.constant 0 : index
    %104 = vector.load %arg14[%c12_73, %c0_74] : memref<104x128xf32, #tpu.memory_space<vmem>>, vector<80x128xf32>
    %105 = arith.truncf %104 : vector<80x128xf32> to vector<80x128xbf16>
    %c0_75 = arith.constant 0 : index
    %c640_76 = arith.constant 640 : index
    %106 = vector.load %arg15[%c0_75, %c640_76] : memref<80x1152xbf16, #tpu.memory_space<vmem>>, vector<80x128xbf16>
    tpu.vector_store %arg15[%c0_75, %c640_76], %105 {strides = array<i32>} : memref<80x1152xbf16, #tpu.memory_space<vmem>>, vector<80x128xbf16>,
    %c20_77 = arith.constant 20 : index
    %c0_78 = arith.constant 0 : index
    %107 = vector.load %arg14[%c20_77, %c0_78] : memref<104x128xf32, #tpu.memory_space<vmem>>, vector<80x128xf32>
    %108 = arith.truncf %107 : vector<80x128xf32> to vector<80x128xbf16>
    %c0_79 = arith.constant 0 : index
    %c768_80 = arith.constant 768 : index
    %109 = vector.load %arg15[%c0_79, %c768_80] : memref<80x1152xbf16, #tpu.memory_space<vmem>>, vector<80x128xbf16>
    tpu.vector_store %arg15[%c0_79, %c768_80], %108 {strides = array<i32>} : memref<80x1152xbf16, #tpu.memory_space<vmem>>, vector<80x128xbf16>,
    %c21_81 = arith.constant 21 : index
    %c0_82 = arith.constant 0 : index
    %110 = vector.load %arg14[%c21_81, %c0_82] : memref<104x128xf32, #tpu.memory_space<vmem>>, vector<80x128xf32>
    %111 = arith.truncf %110 : vector<80x128xf32> to vector<80x128xbf16>
    %c0_83 = arith.constant 0 : index
    %c896_84 = arith.constant 896 : index
    %112 = vector.load %arg15[%c0_83, %c896_84] : memref<80x1152xbf16, #tpu.memory_space<vmem>>, vector<80x128xbf16>
    tpu.vector_store %arg15[%c0_83, %c896_84], %111 {strides = array<i32>} : memref<80x1152xbf16, #tpu.memory_space<vmem>>, vector<80x128xbf16>,
    %c22_85 = arith.constant 22 : index
    %c0_86 = arith.constant 0 : index
    %113 = vector.load %arg14[%c22_85, %c0_86] : memref<104x128xf32, #tpu.memory_space<vmem>>, vector<80x128xf32>
    %114 = arith.truncf %113 : vector<80x128xf32> to vector<80x128xbf16>
    %c0_87 = arith.constant 0 : index
    %c1024_88 = arith.constant 1024 : index
    %115 = vector.load %arg15[%c0_87, %c1024_88] : memref<80x1152xbf16, #tpu.memory_space<vmem>>, vector<80x128xbf16>
    tpu.vector_store %arg15[%c0_87, %c1024_88], %114 {strides = array<i32>} : memref<80x1152xbf16, #tpu.memory_space<vmem>>, vector<80x128xbf16>,
    %c0_89 = arith.constant 0 : index
    %c0_90 = arith.constant 0 : index
    %116 = vector.load %arg15[%c0_89, %c0_90] : memref<80x1152xbf16, #tpu.memory_space<vmem>>, vector<80x1152xbf16>
    %c1_91 = arith.constant 1 : index
    %c0_92 = arith.constant 0 : index
    %c0_93 = arith.constant 0 : index
    %117 = vector.load %arg2[%c1_91, %c0_92, %c0_93] : memref<2x1152x128xbf16, #tpu.memory_space<vmem>>, vector<1x1152x128xbf16>
    %118 = vector.shape_cast %117 : vector<1x1152x128xbf16> to vector<1152x128xbf16>
    %cst_94 = arith.constant dense<0.000000e+00> : vector<80x128xf32>
    %119 = tpu.matmul %116, %118, %cst_94 {dimension_numbers = #tpu.dot_dimension_numbers<[1], [0], [0], [1], [0, 0, 1, 1], [], []>} : vector<80x1152xbf16>, vector<1152x128xbf16>, vector<80x128xf32> -> vector<80x128xf32>
    %c1_95 = arith.constant 1 : index
    %c0_96 = arith.constant 0 : index
    %c0_97 = arith.constant 0 : index
    %120 = vector.load %arg3[%c1_95, %c0_96, %c0_97] : memref<2x1x128xf32, #tpu.memory_space<vmem>>, vector<1x1x128xf32>
    %121 = vector.shape_cast %120 : vector<1x1x128xf32> to vector<1x128xf32>
    %122 = vector.broadcast %121 : vector<1x128xf32> to vector<80x128xf32>
    %123 = arith.addf %119, %122 : vector<80x128xf32>
    %124 = vector.extract_strided_slice %123 {offsets = [0, 0], sizes = [8, 128], strides = [1, 1]} : vector<80x128xf32> to vector<8x128xf32>
    %125 = vector.extract_strided_slice %123 {offsets = [10, 0], sizes = [8, 128], strides = [1, 1]} : vector<80x128xf32> to vector<8x128xf32>
    %126 = vector.extract_strided_slice %123 {offsets = [20, 0], sizes = [8, 128], strides = [1, 1]} : vector<80x128xf32> to vector<8x128xf32>
    %127 = vector.extract_strided_slice %123 {offsets = [30, 0], sizes = [8, 128], strides = [1, 1]} : vector<80x128xf32> to vector<8x128xf32>
    %128 = vector.extract_strided_slice %123 {offsets = [40, 0], sizes = [8, 128], strides = [1, 1]} : vector<80x128xf32> to vector<8x128xf32>
    %129 = vector.extract_strided_slice %123 {offsets = [50, 0], sizes = [8, 128], strides = [1, 1]} : vector<80x128xf32> to vector<8x128xf32>
    %130 = vector.extract_strided_slice %123 {offsets = [60, 0], sizes = [8, 128], strides = [1, 1]} : vector<80x128xf32> to vector<8x128xf32>
    %131 = vector.extract_strided_slice %123 {offsets = [70, 0], sizes = [8, 128], strides = [1, 1]} : vector<80x128xf32> to vector<8x128xf32>
    %132 = tpu.concatenate %124, %125, %126, %127, %128, %129, %130, %131 in 0 : vector<8x128xf32>, vector<8x128xf32>, vector<8x128xf32>, vector<8x128xf32>, vector<8x128xf32>, vector<8x128xf32>, vector<8x128xf32>, vector<8x128xf32> -> vector<64x128xf32>
    %133 = vector.shape_cast %1 : vector<8x8x128xf32> to vector<64x128xf32>
    %134 = arith.addf %133, %132 : vector<64x128xf32>
    %c0_98 = arith.constant 0 : index
    %c0_99 = arith.constant 0 : index
    %135 = vector.load %arg4[%c0_98, %c0_99] : memref<1x128xf32, #tpu.memory_space<vmem>>, vector<1x128xf32>
    %c0_100 = arith.constant 0 : index
    %c0_101 = arith.constant 0 : index
    %136 = vector.load %arg5[%c0_100, %c0_101] : memref<1x128xf32, #tpu.memory_space<vmem>>, vector<1x128xf32>
    %cst_102 = arith.constant dense<0.000000e+00> : vector<64xf32>
    %137 = vector.multi_reduction <add>, %134, %cst_102 [1] : vector<64x128xf32> to vector<64xf32>
    %138 = vector.shape_cast %137 : vector<64xf32> to vector<64x1xf32>
    %cst_103 = arith.constant 1.280000e+02 : f32
    %139 = vector.broadcast %cst_103 : f32 to vector<64x1xf32>
    %140 = arith.divf %138, %139 : vector<64x1xf32>
    %141 = vector.broadcast %140 : vector<64x1xf32> to vector<64x128xf32>
    %142 = arith.subf %134, %141 : vector<64x128xf32>
    %143 = arith.mulf %142, %142 : vector<64x128xf32>
    %cst_104 = arith.constant dense<0.000000e+00> : vector<64xf32>
    %144 = vector.multi_reduction <add>, %143, %cst_104 [1] : vector<64x128xf32> to vector<64xf32>
    %145 = vector.shape_cast %144 : vector<64xf32> to vector<64x1xf32>
    %cst_105 = arith.constant 1.280000e+02 : f32
    %146 = vector.broadcast %cst_105 : f32 to vector<64x1xf32>
    %147 = arith.divf %145, %146 : vector<64x1xf32>
    %cst_106 = arith.constant 9.99999997E-7 : f32
    %148 = vector.broadcast %cst_106 : f32 to vector<64x1xf32>
    %149 = arith.addf %147, %148 : vector<64x1xf32>
    %150 = math.rsqrt %149 : vector<64x1xf32>
    %151 = vector.broadcast %150 : vector<64x1xf32> to vector<64x128xf32>
    %152 = arith.mulf %142, %151 : vector<64x128xf32>
    %153 = vector.broadcast %135 : vector<1x128xf32> to vector<64x128xf32>
    %154 = arith.mulf %152, %153 : vector<64x128xf32>
    %155 = vector.broadcast %136 : vector<1x128xf32> to vector<64x128xf32>
    %156 = arith.addf %154, %155 : vector<64x128xf32>
    %157 = arith.truncf %156 : vector<64x128xf32> to vector<64x128xbf16>
    %c0_107 = arith.constant 0 : index
    %c0_108 = arith.constant 0 : index
    %158 = vector.load %arg6[%c0_107, %c0_108] : memref<128x512xbf16, #tpu.memory_space<vmem>>, vector<128x256xbf16>
    %cst_109 = arith.constant dense<0.000000e+00> : vector<64x256xf32>
    %159 = tpu.matmul %157, %158, %cst_109 {dimension_numbers = #tpu.dot_dimension_numbers<[1], [0], [0], [1], [0, 0, 1, 1], [], []>} : vector<64x128xbf16>, vector<128x256xbf16>, vector<64x256xf32> -> vector<64x256xf32>
    %c0_110 = arith.constant 0 : index
    %c0_111 = arith.constant 0 : index
    %160 = vector.load %arg7[%c0_110, %c0_111] : memref<1x512xf32, #tpu.memory_space<vmem>>, vector<1x256xf32>
    %161 = vector.broadcast %160 : vector<1x256xf32> to vector<64x256xf32>
    %162 = arith.addf %159, %161 : vector<64x256xf32>
    %cst_112 = arith.constant 5.000000e-01 : f32
    %163 = vector.broadcast %cst_112 : f32 to vector<64x256xf32>
    %164 = arith.mulf %163, %162 : vector<64x256xf32>
    %cst_113 = arith.constant 0.707106769 : f32
    %165 = vector.broadcast %cst_113 : f32 to vector<64x256xf32>
    %166 = arith.mulf %162, %165 : vector<64x256xf32>
    %167 = math.erf %166 : vector<64x256xf32>
    %cst_114 = arith.constant 1.000000e+00 : f32
    %168 = vector.broadcast %cst_114 : f32 to vector<64x256xf32>
    %169 = arith.addf %168, %167 : vector<64x256xf32>
    %170 = arith.mulf %164, %169 : vector<64x256xf32>
    %171 = arith.truncf %170 : vector<64x256xf32> to vector<64x256xbf16>
    %c0_115 = arith.constant 0 : index
    %c0_116 = arith.constant 0 : index
    %172 = vector.load %arg8[%c0_115, %c0_116] : memref<512x128xbf16, #tpu.memory_space<vmem>>, vector<256x128xbf16>
    %cst_117 = arith.constant dense<0.000000e+00> : vector<64x128xf32>
    %173 = tpu.matmul %171, %172, %cst_117 {dimension_numbers = #tpu.dot_dimension_numbers<[1], [0], [0], [1], [0, 0, 1, 1], [], []>} : vector<64x256xbf16>, vector<256x128xbf16>, vector<64x128xf32> -> vector<64x128xf32>
    %174 = arith.addf %156, %173 : vector<64x128xf32>
    %c0_118 = arith.constant 0 : index
    %c256_119 = arith.constant 256 : index
    %175 = vector.load %arg6[%c0_118, %c256_119] : memref<128x512xbf16, #tpu.memory_space<vmem>>, vector<128x256xbf16>
    %cst_120 = arith.constant dense<0.000000e+00> : vector<64x256xf32>
    %176 = tpu.matmul %157, %175, %cst_120 {dimension_numbers = #tpu.dot_dimension_numbers<[1], [0], [0], [1], [0, 0, 1, 1], [], []>} : vector<64x128xbf16>, vector<128x256xbf16>, vector<64x256xf32> -> vector<64x256xf32>
    %c0_121 = arith.constant 0 : index
    %c256_122 = arith.constant 256 : index
    %177 = vector.load %arg7[%c0_121, %c256_122] : memref<1x512xf32, #tpu.memory_space<vmem>>, vector<1x256xf32>
    %178 = vector.broadcast %177 : vector<1x256xf32> to vector<64x256xf32>
    %179 = arith.addf %176, %178 : vector<64x256xf32>
    %cst_123 = arith.constant 5.000000e-01 : f32
    %180 = vector.broadcast %cst_123 : f32 to vector<64x256xf32>
    %181 = arith.mulf %180, %179 : vector<64x256xf32>
    %cst_124 = arith.constant 0.707106769 : f32
    %182 = vector.broadcast %cst_124 : f32 to vector<64x256xf32>
    %183 = arith.mulf %179, %182 : vector<64x256xf32>
    %184 = math.erf %183 : vector<64x256xf32>
    %cst_125 = arith.constant 1.000000e+00 : f32
    %185 = vector.broadcast %cst_125 : f32 to vector<64x256xf32>
    %186 = arith.addf %185, %184 : vector<64x256xf32>
    %187 = arith.mulf %181, %186 : vector<64x256xf32>
    %188 = arith.truncf %187 : vector<64x256xf32> to vector<64x256xbf16>
    %c256_126 = arith.constant 256 : index
    %c0_127 = arith.constant 0 : index
    %189 = vector.load %arg8[%c256_126, %c0_127] : memref<512x128xbf16, #tpu.memory_space<vmem>>, vector<256x128xbf16>
    %cst_128 = arith.constant dense<0.000000e+00> : vector<64x128xf32>
    %190 = tpu.matmul %188, %189, %cst_128 {dimension_numbers = #tpu.dot_dimension_numbers<[1], [0], [0], [1], [0, 0, 1, 1], [], []>} : vector<64x256xbf16>, vector<256x128xbf16>, vector<64x128xf32> -> vector<64x128xf32>
    %191 = arith.addf %174, %190 : vector<64x128xf32>
    %c0_129 = arith.constant 0 : index
    %c0_130 = arith.constant 0 : index
    %192 = vector.load %arg9[%c0_129, %c0_130] : memref<1x128xf32, #tpu.memory_space<vmem>>, vector<1x128xf32>
    %193 = vector.broadcast %192 : vector<1x128xf32> to vector<64x128xf32>
    %194 = arith.addf %191, %193 : vector<64x128xf32>
    %c0_131 = arith.constant 0 : index
    %c0_132 = arith.constant 0 : index
    %195 = vector.load %arg10[%c0_131, %c0_132] : memref<1x128xf32, #tpu.memory_space<vmem>>, vector<1x128xf32>
    %c0_133 = arith.constant 0 : index
    %c0_134 = arith.constant 0 : index
    %196 = vector.load %arg11[%c0_133, %c0_134] : memref<1x128xf32, #tpu.memory_space<vmem>>, vector<1x128xf32>
    %cst_135 = arith.constant dense<0.000000e+00> : vector<64xf32>
    %197 = vector.multi_reduction <add>, %194, %cst_135 [1] : vector<64x128xf32> to vector<64xf32>
    %198 = vector.shape_cast %197 : vector<64xf32> to vector<64x1xf32>
    %cst_136 = arith.constant 1.280000e+02 : f32
    %199 = vector.broadcast %cst_136 : f32 to vector<64x1xf32>
    %200 = arith.divf %198, %199 : vector<64x1xf32>
    %201 = vector.broadcast %200 : vector<64x1xf32> to vector<64x128xf32>
    %202 = arith.subf %194, %201 : vector<64x128xf32>
    %203 = arith.mulf %202, %202 : vector<64x128xf32>
    %cst_137 = arith.constant dense<0.000000e+00> : vector<64xf32>
    %204 = vector.multi_reduction <add>, %203, %cst_137 [1] : vector<64x128xf32> to vector<64xf32>
    %205 = vector.shape_cast %204 : vector<64xf32> to vector<64x1xf32>
    %cst_138 = arith.constant 1.280000e+02 : f32
    %206 = vector.broadcast %cst_138 : f32 to vector<64x1xf32>
    %207 = arith.divf %205, %206 : vector<64x1xf32>
    %cst_139 = arith.constant 9.99999997E-7 : f32
    %208 = vector.broadcast %cst_139 : f32 to vector<64x1xf32>
    %209 = arith.addf %207, %208 : vector<64x1xf32>
    %210 = math.rsqrt %209 : vector<64x1xf32>
    %211 = vector.broadcast %210 : vector<64x1xf32> to vector<64x128xf32>
    %212 = arith.mulf %202, %211 : vector<64x128xf32>
    %213 = vector.broadcast %195 : vector<1x128xf32> to vector<64x128xf32>
    %214 = arith.mulf %212, %213 : vector<64x128xf32>
    %215 = vector.broadcast %196 : vector<1x128xf32> to vector<64x128xf32>
    %216 = arith.addf %214, %215 : vector<64x128xf32>
    %c0_140 = arith.constant 0 : index
    %c0_141 = arith.constant 0 : index
    %c0_142 = arith.constant 0 : index
    %217 = vector.load %arg12[%c0_140, %c0_141, %c0_142] : memref<1x64x128xf32, #tpu.memory_space<vmem>>, vector<1x64x128xf32>
    %218 = vector.shape_cast %217 : vector<1x64x128xf32> to vector<64x128xf32>
    %219 = vector.shape_cast %216 : vector<64x128xf32> to vector<1x64x128xf32>
    tpu.vector_store %arg12[%c0_140, %c0_141, %c0_142], %219 {strides = array<i32>} : memref<1x64x128xf32, #tpu.memory_space<vmem>>, vector<1x64x128xf32>,
    return
  }
  func.func @transform_0(%arg0: i32) -> (i32, i32, i32, i32) {
    %c0_i32 = arith.constant 0 : i32
    %c0_i32_0 = arith.constant 0 : i32
    %c0_i32_1 = arith.constant 0 : i32
    %c0_i32_2 = arith.constant 0 : i32
    return %arg0, %c0_i32, %c0_i32_0, %c0_i32_1 : i32, i32, i32, i32
  }
  func.func @transform_1(%arg0: i32) -> (i32, i32, i32) {
    %c0_i32 = arith.constant 0 : i32
    %c0_i32_0 = arith.constant 0 : i32
    %c0_i32_1 = arith.constant 0 : i32
    %c0_i32_2 = arith.constant 0 : i32
    return %c0_i32, %c0_i32_0, %c0_i32_1 : i32, i32, i32
  }
  func.func @transform_2(%arg0: i32) -> (i32, i32, i32) {
    %c0_i32 = arith.constant 0 : i32
    %c0_i32_0 = arith.constant 0 : i32
    %c0_i32_1 = arith.constant 0 : i32
    %c0_i32_2 = arith.constant 0 : i32
    return %c0_i32, %c0_i32_0, %c0_i32_1 : i32, i32, i32
  }
  func.func @transform_3(%arg0: i32) -> (i32, i32) {
    %c0_i32 = arith.constant 0 : i32
    %c0_i32_0 = arith.constant 0 : i32
    %c0_i32_1 = arith.constant 0 : i32
    return %c0_i32, %c0_i32_0 : i32, i32
  }
  func.func @transform_4(%arg0: i32) -> (i32, i32) {
    %c0_i32 = arith.constant 0 : i32
    %c0_i32_0 = arith.constant 0 : i32
    %c0_i32_1 = arith.constant 0 : i32
    return %c0_i32, %c0_i32_0 : i32, i32
  }
  func.func @transform_5(%arg0: i32) -> (i32, i32) {
    %c0_i32 = arith.constant 0 : i32
    %c0_i32_0 = arith.constant 0 : i32
    %c0_i32_1 = arith.constant 0 : i32
    return %c0_i32, %c0_i32_0 : i32, i32
  }
  func.func @transform_6(%arg0: i32) -> (i32, i32) {
    %c0_i32 = arith.constant 0 : i32
    %c0_i32_0 = arith.constant 0 : i32
    %c0_i32_1 = arith.constant 0 : i32
    return %c0_i32, %c0_i32_0 : i32, i32
  }
  func.func @transform_7(%arg0: i32) -> (i32, i32) {
    %c0_i32 = arith.constant 0 : i32
    %c0_i32_0 = arith.constant 0 : i32
    %c0_i32_1 = arith.constant 0 : i32
    return %c0_i32, %c0_i32_0 : i32, i32
  }
  func.func @transform_8(%arg0: i32) -> (i32, i32) {
    %c0_i32 = arith.constant 0 : i32
    %c0_i32_0 = arith.constant 0 : i32
    %c0_i32_1 = arith.constant 0 : i32
    return %c0_i32, %c0_i32_0 : i32, i32
  }
  func.func @transform_9(%arg0: i32) -> (i32, i32) {
    %c0_i32 = arith.constant 0 : i32
    %c0_i32_0 = arith.constant 0 : i32
    %c0_i32_1 = arith.constant 0 : i32
    return %c0_i32, %c0_i32_0 : i32, i32
  }
  func.func @transform_10(%arg0: i32) -> (i32, i32) {
    %c0_i32 = arith.constant 0 : i32
    %c0_i32_0 = arith.constant 0 : i32
    %c0_i32_1 = arith.constant 0 : i32
    return %c0_i32, %c0_i32_0 : i32, i32
  }
  func.func @transform_11(%arg0: i32) -> (i32, i32, i32) {
    %c0_i32 = arith.constant 0 : i32
    %c0_i32_0 = arith.constant 0 : i32
    %c0_i32_1 = arith.constant 0 : i32
    return %arg0, %c0_i32, %c0_i32_0 : i32, i32, i32
  }
}

</mosaic_0001>

<bundles_post_ra>
// kernel: _lambda_.1
= control target key start
LH: loop header
LB: loop body
LE: loop exit
PB: predicated region body
PF: predicated region fallthrough
CT: control target
= control target key end

     0   :  { %16 = vsyncpa [#allocation6], 0  ;;  %s6938_s0 = inlined_call_operand.vmem [shape: f32[2,8,8,128], index: 0, kind: input, shape index: {}]   ;;  %s6939_s1 = inlined_call_operand.hbm [shape: bf16[2,1152,128], index: 1, kind: input, shape index: {}]   ;;  %s6940_s2 = inlined_call_operand.vmem [shape: f32[2,1,128], index: 2, kind: input, shape index: {}]   ;;  %s6941_s3 = inlined_call_operand.vmem [shape: f32[1,128], index: 3, kind: input, shape index: {}]   ;;  %s6942_s4 = inlined_call_operand.vmem [shape: f32[1,128], index: 4, kind: input, shape index: {}]   ;;  %s6943_s5 = inlined_call_operand.vmem [shape: bf16[128,512], index: 5, kind: input, shape index: {}]   ;;  %s6944_s6 = inlined_call_operand.vmem [shape: f32[1,512], index: 6, kind: input, shape index: {}]   ;;  %s6945_s7 = inlined_call_operand.vmem [shape: bf16[512,128], index: 7, kind: input, shape index: {}]   ;;  %s6946_s8 = inlined_call_operand.vmem [shape: f32[1,128], index: 8, kind: input, shape index: {}]   ;;  %s6947_s9 = inlined_call_operand.vmem [shape: f32[1,128], index: 9, kind: input, shape index: {}]   ;;  %s6948_s10 = inlined_call_operand.vmem [shape: f32[1,128], index: 10, kind: input, shape index: {}]   ;;  %s6949_s11 = inlined_call_operand.hbm [shape: f32[2,64,128], index: 11, kind: output, shape index: {}]  }
   0x1   :  { %17 = vsyncpa [#allocation7], 0 }
   0x2   :  { %19 = vsyncpa [#allocation7 + $0x1], 0  ;;  %s5712_s17 = smov 0   ;;  %s5714_s18 = smov 0  }
   0x3   :  { %s5716_s19 = smov 0   ;;  %s5718_s20 = smov 0  }
   0x4 LB: > { %s5733_s21 = sadd.s32 4294967295, %s5641_s20   ;;  %s4347_s22 = sadd.s32 4294967294, %s5641_s20   ;;  %s5641_s20 = sphi %s5718_s20, %s7007_s20   ;;  %s5637_s19 = sphi %s5716_s19, %s7006_s19   ;;  %s5633_s18 = sphi %s5714_s18, %s7005_s18   ;;  %s5629_s17 = sphi %s5712_s17, %s7004_s17  }
   0x5   : > { %s5737_s23 = sadd.s32 1, %s5641_s20   ;;  %s268_s24 = sadd.s32 1, %s5637_s19 }
   0x6   : > { %s265_s25 = ssub.s32 %s5641_s20, %s5737_s23  ;;  %p278_p0 = scmp.ne.s32.totalorder %s5637_s19, %s5633_s18 }
   0x7   : > { %p266_p1 = scmp.eq.s32.totalorder %s265_s25, 0  ;;  %p279_p2 = scmp.eq.s32.totalorder %s5733_s21, 1 }
   0x8   : > { %p284_p3 = scmp.ne.s32.totalorder %s5633_s18, %s5629_s17  ;;  %p285_p4 = scmp.eq.s32.totalorder %s4347_s22, 1 }
   0x9   : > { %s5748_s26 = scalar_select %p266_p1, %s5637_s19, %s268_s24  }
   0xa   : > { %p5750_p5 = por %p279_p2, %p278_p0  ;;  %p5754_p6 = por %p285_p4, %p284_p3 }
   0xb   : > { %6953 = sst [smem:[#allocation11_spill]] %s5748_s26  ;;  %p4348_p7 = scmp.ge.s32.totalorder %s5641_s20, 1 }
   0xc   : > { %s6954_s27 = scalar_select %p5750_p5, 1, 0 }
   0xd   : > { %s6955_s28 = scalar_select %p5754_p6, 1, 0 }
   0xe   : > { %p292_p8 = scmp.lt.s32.totalorder %s5641_s20, 3  ;;  %p6950_p9 = scmp.eq.s32.totalorder %s5733_s21, 0 }
   0xf   : > { %s5643_s30 = smov [#allocation5]   ;;  %s5547_s16 = scalar_lea.hbm %s6939_s1, 18432 }
  0x10   : > { %p5761_p10 = pnand %p4348_p7, %p292_p8  ;;  %s304_s12 = sshll.u32 %s5643_s30, 4  ;;  %s305_s12 = int_to_ptr.vmem [resolvable:$true] %s304_s12 }
  0x11   : > { %p5548_p13 = scmp.ne.s32.totalorder %s6939_s1, %s5547_s16  ;;  %p5554_p3 = scmp.lt.u32.totalorder %s5547_s16, %s6939_s1 }
  0x12   : > { %s6956_s29 = scalar_select %p5761_p10, 1, 0 }
  0x13   : > { %p5151_p11 = pneg %p5761_p10 }
  0x15   : > { %p5769_p12 = pnand %p6950_p9, %p5151_p11 }
  0x17   : > { %p5549_p0 = pneg %p5769_p12 }
  0x19   : > { %p5550_p1 = pnand %p5549_p0, %p5548_p13 }
  0x1b   : > { %p5551_p2 = pneg %p5550_p1 }
  0x1d   : > { %p5556_p4 = pnand %p5554_p3, %p5551_p2 }
  0x1f   : > { %5559 = shalt.err (!%p5556_p4)
}
  0x20   : > { %s5560_s26 = scalar_lea.vmem %s305_s12, 18432  ;;  %p5568_p9 = scmp.lt.s32.totalorder %s305_s12, %s305_s12 }
  0x21   : > { %p5561_p7 = scmp.ne.s32.totalorder %s305_s12, %s5560_s26  ;;  %p5569_p6 = scmp.lt.s32.totalorder %s5560_s26, %s5560_s26 }
  0x23   : > { %p5563_p8 = pnand %p5561_p7, %p5549_p0  ;;  %p5570_p5 = por %p5569_p6, %p5568_p9 }
  0x25   : > { %p5564_p11 = pneg %p5563_p8 }
  0x27   : > { %p5571_p10 = pnand %p5570_p5, %p5564_p11 }
  0x29   : > { %5574 = shalt.err (!%p5571_p10)
}
  0x2a   : > { %s5644_s14 = smov 64   ;;  %s5645_s15 = smov 4  }
  0x2b   : > { %5154 = dma.hbm_to_vmem [thread:$0]  (!%p5769_p12), %s6939_s1, 18432, %s305_s12, [#allocation6], %s5644_s14, %s5644_s14, %s5645_s15  }
  0x2c   : > { %p6958_p13 = scmp.ne.s32.totalorder %s6956_s29, 0 }
  0x2d   : > { %p6959_p1 = scmp.eq.s32.totalorder (!%p6958_p13), %s5733_s21, 0 }
  0x2e   : > { %355 = sbr.rel (%p6958_p13) target bundleno = 1855 (0x73f), region = 64 }
  0x35   : > { %5620 = dma.done.wait (%p6959_p1), [#allocation6], 18432   ;;  %p6960_p0 = pmov %p6959_p1 }
  0x36   : > { %v5646_v0 = vmov 0.0   ;;  %v5202_v1 = vld [vmem:[#allocation5 + $0x40] sm:$0xff]   ;;  %v5206_v5 = vld [vmem:[#allocation5 + $0x48] sm:$0xff]   ;;  %v5210_v9 = vld [vmem:[#allocation5 + $0x50] sm:$0xff]   ;;  %p395_p5 = scmp.lt.s32.totalorder %s5733_s21, 1  ;;  %vm5647_vm0 = vmmov 0  }
  0x37   : > { %5622 = vsyncadd (%p6960_p0), [#allocation6], 4294948864  ;;  %409 = vst [vmem:[#allocation2] sm:$0xff] %v5646_v0  ;;  %v5203_v2 = vld [vmem:[#allocation5] sm:$0xff]   ;;  %4579 = vmatprep.subr.bf16.mxu0 %v5202_v1  ;;  %v5207_v6 = vld [vmem:[#allocation5 + $0x8] sm:$0xff]   ;;  %p7001_p9 = scmp.ne.s32.totalorder %s6954_s27, 0 }
  0x38   : > { %410 = vst [vmem:[#allocation2 + $0x8] sm:$0xff] %v5646_v0  ;;  %411 = vst [vmem:[#allocation2 + $0x10] sm:$0xff] %v5646_v0  ;;  %v5204_v3 = vld [vmem:[#allocation5 + $0xc0] sm:$0xff]   ;;  %4580 = vmatpush3.bf16.msra.mxu0 %v5203_v2  ;;  %v5208_v7 = vld [vmem:[#allocation5 + $0xc8] sm:$0xff]   ;;  %s396_s26 = scalar_select %p395_p5, %s5733_s21, 1 }
  0x39   : > { %412 = vst [vmem:[#allocation2 + $0x18] sm:$0xff] %v5646_v0  ;;  %413 = vst [vmem:[#allocation2 + $0x20] sm:$0xff] %v5646_v0  ;;  %v5205_v4 = vld [vmem:[#allocation5 + $0x80] sm:$0xff]   ;;  %4625 = vmatprep.subr.bf16.mxu1 %v5204_v3  ;;  %4581 = vmatprep.subr.bf16.mxu0 %v5206_v5  ;;  %v5209_v8 = vld [vmem:[#allocation5 + $0x88] sm:$0xff]  }
  0x3a   : > { %414 = vst [vmem:[#allocation2 + $0x28] sm:$0xff] %v5646_v0  ;;  %415 = vst [vmem:[#allocation2 + $0x30] sm:$0xff] %v5646_v0  ;;  %4626 = vmatpush3.bf16.msra.mxu1 %v5205_v4  ;;  %v5211_v10 = vld [vmem:[#allocation5 + $0x10] sm:$0xff]   ;;  %v5214_v13 = vld [vmem:[#allocation5 + $0x58] sm:$0xff]   ;;  %s4577_s29 = sshll.u32 %s396_s26, 6  ;;  %s4578_s26 = sshll.u32 %s5733_s21, 10 }
  0x3b   : > { %416 = vst [vmem:[#allocation2 + $0x38] sm:$0xff] %v5646_v0  ;;  %417 = vst [vmem:[#allocation2 + $0x40] sm:$0xff] %v5646_v0  ;;  %4627 = vmatprep.subr.bf16.mxu1 %v5208_v7  ;;  %v5212_v11 = vld [vmem:[#allocation5 + $0xd0] sm:$0xff]   ;;  %v5215_v14 = vld [vmem:[#allocation5 + $0x18] sm:$0xff]   ;;  %s5826_s16 = scalar_lea.vmem %s6938_s0, %s4577_s29  ;;  %s6889_s25 = scalar_lea.hbm %s6949_s11, %s4578_s26 }
  0x3c   : > { %418 = vst [vmem:[#allocation2 + $0x48] sm:$0xff] %v5646_v0  ;;  %419 = vst [vmem:[#allocation2 + $0x50] sm:$0xff] %v5646_v0  ;;  %4582 = vmatpush3.bf16.msra.mxu0 %v5207_v6  ;;  %v5213_v12 = vld [vmem:[#allocation5 + $0x90] sm:$0xff]   ;;  %v5216_v15 = vld [vmem:[#allocation5 + $0xd8] sm:$0xff]  }
  0x3d   : > { %420 = vst [vmem:[#allocation2 + $0x58] sm:$0xff] %v5646_v0  ;;  %421 = vst [vmem:[#allocation2 + $0x60] sm:$0xff] %v5646_v0  ;;  %4583 = vmatprep.subr.bf16.mxu0 %v5210_v9  ;;  %v5217_v16 = vld [vmem:[#allocation5 + $0x98] sm:$0xff]   ;;  %v5218_v17 = vld [vmem:[#allocation5 + $0x60] sm:$0xff]  }
  0x3e   : > { %422 = vst [vmem:[#allocation3] sm:$0xff] %v5646_v0  ;;  %423 = vst [vmem:[#allocation3 + $0x8] sm:$0xff] %v5646_v0  ;;  %4628 = vmatpush3.bf16.msra.mxu1 %v5209_v8  ;;  %v5219_v18 = vld [vmem:[#allocation5 + $0x20] sm:$0xff]   ;;  %v5222_v21 = vld [vmem:[#allocation5 + $0x68] sm:$0xff]  }
  0x3f   : > { %424 = vst [vmem:[#allocation3 + $0x10] sm:$0xff] %v5646_v0  ;;  %425 = vst [vmem:[#allocation3 + $0x18] sm:$0xff] %v5646_v0  ;;  %4629 = vmatprep.subr.bf16.mxu1 %v5212_v11  ;;  %v5220_v19 = vld [vmem:[#allocation5 + $0xe0] sm:$0xff]   ;;  %v5223_v22 = vld [vmem:[#allocation5 + $0x28] sm:$0xff]  }
  0x40   : > { %426 = vst [vmem:[#allocation3 + $0x20] sm:$0xff] %v5646_v0  ;;  %427 = vst [vmem:[#allocation3 + $0x28] sm:$0xff] %v5646_v0  ;;  %4584 = vmatpush3.bf16.msra.mxu0 %v5211_v10  ;;  %v5221_v20 = vld [vmem:[#allocation5 + $0xa0] sm:$0xff]   ;;  %v5224_v23 = vld [vmem:[#allocation5 + $0xe8] sm:$0xff]  }
  0x41   : > { %428 = vst [vmem:[#allocation3 + $0x30] sm:$0xff] %v5646_v0  ;;  %429 = vst [vmem:[#allocation3 + $0x38] sm:$0xff] %v5646_v0  ;;  %4585 = vmatprep.subr.bf16.mxu0 %v5214_v13  ;;  %v5225_v24 = vld [vmem:[#allocation5 + $0xa8] sm:$0xff]   ;;  %v5226_v25 = vld [vmem:[#allocation5 + $0x70] sm:$0xff]  }
  0x42   : > { %430 = vst [vmem:[#allocation3 + $0x40] sm:$0xff] %v5646_v0  ;;  %431 = vst [vmem:[#allocation3 + $0x48] sm:$0xff] %v5646_v0  ;;  %4630 = vmatpush3.bf16.msra.mxu1 %v5213_v12  ;;  %v5227_v26 = vld [vmem:[#allocation5 + $0x30] sm:$0xff]   ;;  %v5230_v29 = vld [vmem:[#allocation5 + $0x78] sm:$0xff]  }
  0x43   : > { %432 = vst [vmem:[#allocation3 + $0x50] sm:$0xff] %v5646_v0  ;;  %433 = vst [vmem:[#allocation3 + $0x58] sm:$0xff] %v5646_v0  ;;  %4631 = vmatprep.subr.bf16.mxu1 %v5216_v15  ;;  %v5228_v27 = vld [vmem:[#allocation5 + $0xf0] sm:$0xff]   ;;  %v5231_v30 = vld [vmem:[#allocation5 + $0x38] sm:$0xff]  }
  0x44   : > { %434 = vst [vmem:[#allocation3 + $0x60] sm:$0xff] %v5646_v0  ;;  %4586 = vmatpush3.bf16.msra.mxu0 %v5215_v14  ;;  %v5229_v28 = vld [vmem:[#allocation5 + $0xb0] sm:$0xff]   ;;  %v5232_v31 = vld [vmem:[#allocation5 + $0xf8] sm:$0xff]   ;;  %v5234_v34 = vld [vmem:[#allocation5 + $0x140] sm:$0xff]  }
  0x45   : > { %4587 = vmatprep.subr.bf16.mxu0 %v5218_v17  ;;  %v5829_v32 = vld [vmem:[%s5826_s16] sm:$0xff]  ;;  %v5233_v33 = vld [vmem:[#allocation5 + $0xb8] sm:$0xff]   ;;  %v403_v37 = vld [vmem:[%s5826_s16 + $0x10] sm:$0xff] }
  0x46   : > { %4632 = vmatpush3.bf16.msra.mxu1 %v5217_v16  ;;  %435 = vst [vmem:[#allocation2 + $0xb] sm:$0xff] %v5829_v32  ;;  %v5833_v35 = vld [vmem:[%s5826_s16 + $0x8] sm:$0xff]  ;;  %v404_v38 = vld [vmem:[%s5826_s16 + $0x18] sm:$0xff]  ;;  %v5235_v39 = vld [vmem:[#allocation5 + $0x100] sm:$0xff]  }
  0x47   : > { %4633 = vmatprep.subr.bf16.mxu1 %v5220_v19  ;;  %436 = vst [vmem:[#allocation2 + $0x15] sm:$0xff] %v5833_v35  ;;  %v644_v36 = vld [vmem:[#allocation2 + $0x1] sm:$0xff]  ;;  %437 = vst [vmem:[#allocation2 + $0x1f] sm:$0xff] %v403_v37  ;;  %v5239_v46 = vld [vmem:[#allocation5 + $0x1c0] sm:$0xff]  }
  0x48   : > { %4588 = vmatpush3.bf16.msra.mxu0 %v5219_v18  ;;  %v664_v40 = vld [vmem:[#allocation2 + $0x2] sm:$0xff]  ;;  %438 = vst [vmem:[#allocation2 + $0x29] sm:$0xff] %v404_v38  ;;  %v5236_v49 = vld [vmem:[#allocation5 + $0x148] sm:$0xff]   ;;  %v5241_v55 = vld [vmem:[#allocation5 + $0x180] sm:$0xff]  }
  0x49   : > { %4589 = vmatprep.subr.bf16.mxu0 %v5222_v21  ;;  %v5237_v52 = vld [vmem:[#allocation5 + $0x108] sm:$0xff]   ;;  %v5238_v54 = vld [vmem:[#allocation5 + $0x150] sm:$0xff]   ;;  %v5243_v6 = vld [vmem:[#allocation5 + $0x158] sm:$0xff]  }
  0x4a   : > { %4634 = vmatpush3.bf16.msra.mxu1 %v5221_v20  ;;  %v5242_v56 = vld [vmem:[#allocation5 + $0x1c8] sm:$0xff]   ;;  %v5240_v2 = vld [vmem:[#allocation5 + $0x110] sm:$0xff]   ;;  %v5245_v9 = vld [vmem:[#allocation5 + $0x118] sm:$0xff]  }
  0x4b   : > { %4635 = vmatprep.subr.bf16.mxu1 %v5224_v23  ;;  %v5244_v4 = vld [vmem:[#allocation5 + $0x188] sm:$0xff]   ;;  %v5840_v10 = vld [vmem:[%s5826_s16 + $0x20] sm:$0xff]  ;;  %v5248_v14 = vld [vmem:[#allocation5 + $0x160] sm:$0xff]  }
  0x4c   : > { %4590 = vmatpush3.bf16.msra.mxu0 %v5223_v22  ;;  %439 = vst [vmem:[#allocation2 + $0x33] sm:$0xff] %v5840_v10  ;;  %v5246_v11 = vld [vmem:[#allocation5 + $0x1d0] sm:$0xff]   ;;  %v5249_v15 = vld [vmem:[#allocation5 + $0x120] sm:$0xff]   ;;  %v5250_v17 = vld [vmem:[#allocation5 + $0x1d8] sm:$0xff]  }
  0x4d   : > { %4591 = vmatprep.subr.bf16.mxu0 %v5226_v25  ;;  %v645_v41 = vld [vmem:[#allocation2 + $0x9] sm:$0xff]  ;;  %v5247_v12 = vld [vmem:[#allocation5 + $0x190] sm:$0xff]  }
  0x4e   : > { %4636 = vmatpush3.bf16.msra.mxu1 %v5225_v24  ;;  %v625_v42 = vld [vmem:[#allocation2 + $0x8] sm:$0xff]  ;;  %v654_v44 = vpack.c.bf16 %v645_v41, %v644_v36  ;;  %v685_v47 = vld [vmem:[#allocation2 + $0x12] sm:$0xff]  ;;  %v686_v59 = vld [vmem:[#allocation2 + $0x1a] sm:$0xff] }
  0x4f   : > { %4637 = vmatprep.subr.bf16.mxu1 %v5228_v27  ;;  %v684_v43 = vld [vmem:[#allocation2 + $0xa] sm:$0xff]  ;;  %v634_v45 = vpack.c.bf16 %v625_v42, %v5646_v0  ;;  %v647_v57 = vld [vmem:[#allocation2 + $0x19] sm:$0xff]  ;;  %v687_v61 = vld [vmem:[#allocation2 + $0x22] sm:$0xff]  ;;  %v675_v5 = vpack.c.bf16 %v686_v59, %v685_v47 }
  0x50   : > { %4592 = vmatpush3.bf16.msra.mxu0 %v5227_v26  ;;  %v674_v48 = vpack.c.bf16 %v684_v43, %v664_v40  ;;  %v646_v50 = vld [vmem:[#allocation2 + $0x11] sm:$0xff]  ;;  %1464 = vmatprep.mubr.bf16.mxu0 %v654_v44  ;;  %v694_v51 = vpack.c.bf16 %v685_v47, %v684_v43  ;;  %v648_v62 = vld [vmem:[#allocation2 + $0x21] sm:$0xff]  ;;  %v695_v1 = vpack.c.bf16 %v687_v61, %v686_v59 }
  0x51   : > { %4593 = vmatprep.subr.bf16.mxu0 %v5230_v29  ;;  %v626_v53 = vld [vmem:[#allocation2 + $0x10] sm:$0xff]  ;;  %v627_v58 = vld [vmem:[#allocation2 + $0x18] sm:$0xff]  ;;  %v655_v60 = vpack.c.bf16 %v647_v57, %v646_v50  ;;  %v656_v3 = vpack.c.bf16 %v404_v38, %v648_v62  ;;  %v628_v7 = vld [vmem:[#allocation2 + $0x20] sm:$0xff] }
  0x52   : > { %4638 = vmatpush3.bf16.msra.mxu1 %v5229_v28  ;;  %1537 = vmatprep.mubr.bf16.mxu1 %v694_v51  ;;  %v635_v63 = vpack.c.bf16 %v627_v58, %v626_v53  ;;  %v629_v8 = vld [vmem:[#allocation2 + $0x28] sm:$0xff]  ;;  %v407_v20 = vld [vmem:[%s5826_s16 + $0x30] sm:$0xff]  ;;  %v5252_v24 = vld [vmem:[#allocation5 + $0x168] sm:$0xff]  }
  0x53   : > { %4639 = vmatprep.subr.bf16.mxu1 %v5232_v31  ;;  %v688_v13 = vld [vmem:[#allocation2 + $0x2a] sm:$0xff]  ;;  %v636_v16 = vpack.c.bf16 %v629_v8, %v628_v7  ;;  %v689_v21 = vld [vmem:[#allocation2 + $0x32] sm:$0xff]  ;;  %441 = vst [vmem:[#allocation2 + $0x47] sm:$0xff] %v407_v20  ;;  %v5260_v50 = vld [vmem:[#allocation5 + $0x1f0] sm:$0xff]  }
  0x54   : > { %4594 = vmatpush3.bf16.msra.mxu0 %v5231_v30  ;;  %v5844_v18 = vld [vmem:[%s5826_s16 + $0x28] sm:$0xff]  ;;  %v676_v22 = vpack.c.bf16 %v688_v13, %v687_v61  ;;  %v696_v23 = vpack.c.bf16 %v689_v21, %v688_v13  ;;  %v650_v25 = vld [vmem:[#allocation2 + $0x31] sm:$0xff]  ;;  %v5256_v30 = vld [vmem:[#allocation5 + $0x170] sm:$0xff]  }
  0x55   : > { %4671 = vmatprep.subr.bf16.mxu0 %v5234_v34  ;;  %440 = vst [vmem:[#allocation2 + $0x3d] sm:$0xff] %v5844_v18  ;;  %v5251_v19 = vld [vmem:[#allocation5 + $0x198] sm:$0xff]   ;;  %v630_v26 = vld [vmem:[#allocation2 + $0x30] sm:$0xff]  ;;  %v5253_v27 = vld [vmem:[#allocation5 + $0x128] sm:$0xff]  }
  0x56   : > { %4640 = vmatpush3.bf16.msra.mxu1 %v5233_v33  ;;  %v5254_v28 = vld [vmem:[#allocation5 + $0x1e0] sm:$0xff]   ;;  %v5261_v51 = vld [vmem:[#allocation5 + $0x178] sm:$0xff]   ;;  %v5262_v53 = vld [vmem:[#allocation5 + $0x1b0] sm:$0xff]  }
  0x57   : > { %4717 = vmatprep.subr.bf16.mxu1 %v5239_v46  ;;  %1465 = vmatmul.mubr.bf16.vlgmr.msra.gmra.mrb[0].mxu0 %v634_v45  ;;  %v5255_v29 = vld [vmem:[#allocation5 + $0x1a0] sm:$0xff]   ;;  %v5258_v45 = vld [vmem:[#allocation5 + $0x130] sm:$0xff]   ;;  %v5259_v46 = vld [vmem:[#allocation5 + $0x1a8] sm:$0xff]  }
  0x58   : > { %4672 = vmatpush3.bf16.msra.mxu0 %v5235_v39  ;;  %1472 = vmatprep.mubr.bf16.mxu0 %v655_v60  ;;  %v5257_v39 = vld [vmem:[#allocation5 + $0x1e8] sm:$0xff]   ;;  %v5265_v59 = vld [vmem:[#allocation5 + $0x1b8] sm:$0xff]   ;;  %v5266_v7 = vld [vmem:[#allocation5 + $0x200] sm:$0xff]  }
  0x59   : > { %1538 = vmatmul.mubr.bf16.vlgmr.msra.gmra.mrb[0].mxu1 %v674_v48  ;;  %4673 = vmatprep.subr.bf16.mxu0 %v5236_v49  ;;  %v408_v49 = vld [vmem:[%s5826_s16 + $0x38] sm:$0xff]  ;;  %s392_s16 = sand.u32 1, %s5633_s18  }
  0x5a   : > { %4718 = vmatpush3.bf16.msra.mxu1 %v5241_v55  ;;  %1545 = vmatprep.mubr.bf16.mxu1 %v695_v1  ;;  %v653_v43 = vld [vmem:[#allocation2 + $0x49] sm:$0xff]  ;;  %442 = vst [vmem:[#allocation2 + $0x51] sm:$0xff] %v408_v49  ;;  %v725_v57 = vld [vmem:[#allocation2 + $0x14] sm:$0xff]  ;;  %v765_v61 = vld [vmem:[#allocation2 + $0x1d] sm:$0xff]  ;;  %s4353_s14 = sshll.u32 %s392_s16, 6  ;;  %s6897_s30 = scalar_lea.sflag [#allocation7], %s392_s16 }
  0x5b   : > { %4719 = vmatprep.subr.bf16.mxu1 %v5242_v56  ;;  %v633_v48 = vld [vmem:[#allocation2 + $0x48] sm:$0xff]  ;;  %v705_v60 = vld [vmem:[#allocation2 + $0x13] sm:$0xff]  ;;  %v706_v13 = vld [vmem:[#allocation2 + $0x1b] sm:$0xff]  ;;  %s6870_s24 = scalar_lea.vmem [#allocation8], %s4353_s14  ;;  %s5649_s14 = smov [#allocation8]  }
  0x5c   : > { %4674 = vmatpush3.bf16.msra.mxu0 %v5237_v52  ;;  %v651_v31 = vld [vmem:[#allocation2 + $0x39] sm:$0xff]  ;;  %v691_v38 = vld [vmem:[#allocation2 + $0x42] sm:$0xff]  ;;  %v724_v56 = vld [vmem:[#allocation2 + $0xc] sm:$0xff]  ;;  %s4273_s29 = sshll.u32 %s6870_s24, 4  ;;  %s5579_s15 = sshll.u32 %s5649_s14, 4  ;;  %s6891_s29 = int_to_ptr.vmem [resolvable:$true] %s4273_s29  ;;  %s5580_s15 = int_to_ptr.vmem [resolvable:$false] %s5579_s15 }
  0x5d   : > { %4675 = vmatprep.subr.bf16.mxu0 %v5238_v54  ;;  %v631_v33 = vld [vmem:[#allocation2 + $0x38] sm:$0xff]  ;;  %v657_v36 = vpack.c.bf16 %v651_v31, %v650_v25  ;;  %v652_v42 = vld [vmem:[#allocation2 + $0x41] sm:$0xff]  ;;  %v734_v58 = vpack.c.bf16 %v725_v57, %v724_v56  ;;  %s5575_s21 = scalar_lea.vmem %s6891_s29, 1024  ;;  %s5581_s22 = scalar_lea.vmem %s5580_s15, 2048 }
  0x5e   : > { %4720 = vmatpush3.bf16.msra.mxu1 %v5244_v4  ;;  %v690_v34 = vld [vmem:[#allocation2 + $0x3a] sm:$0xff]  ;;  %v637_v37 = vpack.c.bf16 %v631_v33, %v630_v26  ;;  %v658_v44 = vpack.c.bf16 %v653_v43, %v652_v42  ;;  %v5263_v54 = vld [vmem:[#allocation5 + $0x138] sm:$0xff]   ;;  %v714_v4 = vpack.c.bf16 %v705_v60, %v5829_v32  ;;  %p5576_p6 = scmp.ne.s32.totalorder %s6891_s29, %s5575_s21  ;;  %p5582_p2 = scmp.lt.s32.totalorder %s6891_s29, %s5580_s15 }
  0x5f   : > { %1473 = vmatmul.mubr.bf16.gmra.mrb[4].mxu0 %v635_v63  ;;  %4721 = vmatprep.subr.bf16.mxu1 %v5246_v11  ;;  %v697_v40 = vpack.c.bf16 %v691_v38, %v690_v34  ;;  %v677_v41 = vpack.c.bf16 %v690_v34, %v689_v21  ;;  %v632_v47 = vld [vmem:[#allocation2 + $0x40] sm:$0xff]  ;;  %v5264_v55 = vld [vmem:[#allocation5 + $0x1f8] sm:$0xff]   ;;  %v768_v21 = vld [vmem:[#allocation2 + $0x35] sm:$0xff]  ;;  %p5583_p3 = scmp.lt.s32.totalorder %s5581_s22, %s5575_s21 }
  0x60   : > { %4676 = vmatpush3.bf16.msra.mxu0 %v5240_v2  ;;  %1480 = vmatprep.mubr.bf16.mxu0 %v656_v3  ;;  %v638_v52 = vpack.c.bf16 %v633_v48, %v632_v47  ;;  %v774_v3 = vpack.c.bf16 %v765_v61, %v5833_v35  ;;  %v767_v11 = vld [vmem:[#allocation2 + $0x2d] sm:$0xff]  ;;  %v776_v25 = vpack.c.bf16 %v5844_v18, %v768_v21  ;;  %v731_v26 = vld [vmem:[#allocation2 + $0x44] sm:$0xff]  ;;  %v710_v34 = vld [vmem:[#allocation2 + $0x3b] sm:$0xff]  ;;  %p5577_p10 = pnand %p5576_p6, %p7001_p9 }
  0x61   : > { %1546 = vmatmul.mubr.bf16.gmra.mrb[4].mxu1 %v675_v5  ;;  %4677 = vmatprep.subr.bf16.mxu0 %v5243_v6  ;;  %v692_v62 = vld [vmem:[#allocation2 + $0x4a] sm:$0xff]  ;;  %v693_v63 = vld [vmem:[#allocation2 + $0x52] sm:$0xff]  ;;  %v745_v5 = vld [vmem:[#allocation2 + $0x1c] sm:$0xff]  ;;  %p5584_p4 = por %p5583_p3, %p5582_p2 }
  0x62   : > { %4722 = vmatpush3.bf16.msra.mxu1 %v5247_v12  ;;  %1553 = vmatprep.mubr.bf16.mxu1 %v696_v23  ;;  %v698_v1 = vpack.c.bf16 %v693_v63, %v692_v62  ;;  %v678_v2 = vpack.c.bf16 %v692_v62, %v691_v38  ;;  %v727_v6 = vld [vmem:[#allocation2 + $0x24] sm:$0xff]  ;;  %v5267_v12 = vld [vmem:[#allocation5 + $0x208] sm:$0xff]   ;;  %v771_v33 = vld [vmem:[#allocation2 + $0x4d] sm:$0xff]  ;;  %p5578_p12 = pneg %p5577_p10 }
  0x63   : > { %4723 = vmatprep.subr.bf16.mxu1 %v5250_v17  ;;  %v735_v8 = vpack.c.bf16 %v727_v6, %v745_v5  ;;  %v747_v17 = vld [vmem:[#allocation2 + $0x2c] sm:$0xff]  ;;  %v733_v38 = vld [vmem:[#allocation2 + $0x54] sm:$0xff]  ;;  %v789_v60 = vld [vmem:[#allocation2 + $0x3e] sm:$0xff] }
  0x64   : > { %4678 = vmatpush3.bf16.msra.mxu0 %v5245_v9  ;;  %v766_v9 = vld [vmem:[#allocation2 + $0x25] sm:$0xff]  ;;  %v772_v43 = vld [vmem:[#allocation2 + $0x55] sm:$0xff]  ;;  %p5585_p7 = pnand %p5584_p4, %p5578_p12 }
  0x65   : > { %4679 = vmatprep.subr.bf16.mxu0 %v5248_v14  ;;  %v754_v14 = vpack.c.bf16 %v745_v5, %v725_v57  ;;  %v775_v35 = vpack.c.bf16 %v767_v11, %v766_v9  ;;  %v708_v23 = vld [vmem:[#allocation2 + $0x2b] sm:$0xff] }
  0x66   : > { %4724 = vmatpush3.bf16.msra.mxu1 %v5251_v19  ;;  %v5268_v19 = vld [vmem:[#allocation5 + $0x210] sm:$0xff]   ;;  %v5273_v47 = vld [vmem:[#allocation5 + $0x238] sm:$0xff]   ;;  %v5274_v5 = vld [vmem:[#allocation5 + $0x280] sm:$0xff]  }
  0x67   : > { %1481 = vmatmul.mubr.bf16.gmra.mrb[8].mxu0 %v636_v16  ;;  %4725 = vmatprep.subr.bf16.mxu1 %v5254_v28  ;;  %v729_v16 = vld [vmem:[#allocation2 + $0x34] sm:$0xff]  ;;  %v749_v28 = vld [vmem:[#allocation2 + $0x3c] sm:$0xff]  ;;  %v770_v31 = vld [vmem:[#allocation2 + $0x45] sm:$0xff] }
  0x68   : > { %4680 = vmatpush3.bf16.msra.mxu0 %v5249_v15  ;;  %1488 = vmatprep.mubr.bf16.mxu0 %v657_v36  ;;  %v707_v15 = vld [vmem:[#allocation2 + $0x23] sm:$0xff]  ;;  %v736_v20 = vpack.c.bf16 %v729_v16, %v747_v17  ;;  %v777_v18 = vpack.c.bf16 %v771_v33, %v770_v31  ;;  %v791_v63 = vld [vmem:[#allocation2 + $0x4e] sm:$0xff] }
  0x69   : > { %4681 = vmatprep.subr.bf16.mxu0 %v5252_v24  ;;  %1554 = vmatmul.mubr.bf16.gmra.mrb[8].mxu1 %v676_v22  ;;  %v715_v32 = vpack.c.bf16 %v707_v15, %v706_v13  ;;  %v755_v22 = vpack.c.bf16 %v747_v17, %v727_v6  ;;  %v5269_v24 = vld [vmem:[#allocation5 + $0x218] sm:$0xff]   ;;  %v5275_v6 = vld [vmem:[#allocation5 + $0x240] sm:$0xff]   ;;  %v5280_v13 = vld [vmem:[#allocation5 + $0x250] sm:$0xff]  }
  0x6a   : > { %4726 = vmatpush3.bf16.msra.mxu1 %v5255_v29  ;;  %1561 = vmatprep.mubr.bf16.mxu1 %v697_v40  ;;  %v5270_v29 = vld [vmem:[#allocation5 + $0x220] sm:$0xff]   ;;  %v711_v36 = vld [vmem:[#allocation2 + $0x43] sm:$0xff]  ;;  %v5284_v15 = vld [vmem:[#allocation5 + $0x2c8] sm:$0xff]  }
  0x6b   : > { %4727 = vmatprep.subr.bf16.mxu1 %v5257_v39  ;;  %v756_v39 = vpack.c.bf16 %v749_v28, %v729_v16  ;;  %v5272_v40 = vld [vmem:[#allocation5 + $0x230] sm:$0xff]   ;;  %v5279_v9 = vld [vmem:[#allocation5 + $0x300] sm:$0xff]   ;;  %v5285_v16 = vld [vmem:[#allocation5 + $0x258] sm:$0xff]  }
  0x6c   : > { %4682 = vmatpush3.bf16.msra.mxu0 %v5253_v27  ;;  %v716_v27 = vpack.c.bf16 %v5840_v10, %v708_v23  ;;  %v751_v10 = vld [vmem:[#allocation2 + $0x4c] sm:$0xff]  ;;  %v5287_v17 = vld [vmem:[#allocation5 + $0x2d0] sm:$0xff]  }
  0x6d   : > { %4683 = vmatprep.subr.bf16.mxu0 %v5256_v30  ;;  %v737_v30 = vpack.c.bf16 %v731_v26, %v749_v28  ;;  %v738_v42 = vpack.c.bf16 %v733_v38, %v751_v10  ;;  %v757_v48 = vpack.c.bf16 %v751_v10, %v731_v26  ;;  %v786_v57 = vld [vmem:[#allocation2 + $0x26] sm:$0xff]  ;;  %v5281_v11 = vld [vmem:[#allocation5 + $0x2c0] sm:$0xff]   ;;  %v5293_v26 = vld [vmem:[#allocation5 + $0x268] sm:$0xff]  }
  0x6e   : > { %4728 = vmatpush3.bf16.msra.mxu1 %v5259_v46  ;;  %v713_v46 = vld [vmem:[#allocation2 + $0x53] sm:$0xff]  ;;  %v790_v62 = vld [vmem:[#allocation2 + $0x46] sm:$0xff] }
  0x6f   : > { %1489 = vmatmul.mubr.bf16.gmra.mrb[12].mxu0 %v637_v37  ;;  %4729 = vmatprep.subr.bf16.mxu1 %v5260_v50  ;;  %v5271_v37 = vld [vmem:[#allocation5 + $0x228] sm:$0xff]   ;;  %v5289_v21 = vld [vmem:[#allocation5 + $0x260] sm:$0xff]   ;;  %v5300_v31 = vld [vmem:[#allocation5 + $0x330] sm:$0xff]  }
  0x70   : > { %1496 = vmatprep.mubr.bf16.mxu0 %v658_v44  ;;  %4684 = vmatpush3.bf16.msra.mxu0 %v5258_v45  ;;  %v773_v44 = vld [vmem:[#allocation2 + $0x5d] sm:$0xff]  ;;  %v712_v45 = vld [vmem:[#allocation2 + $0x4b] sm:$0xff] }
  0x71   : > { %1562 = vmatmul.mubr.bf16.gmra.mrb[12].mxu1 %v677_v41  ;;  %4685 = vmatprep.subr.bf16.mxu0 %v5261_v51  ;;  %v717_v41 = vpack.c.bf16 %v711_v36, %v710_v34  ;;  %v778_v49 = vpack.c.bf16 %v773_v44, %v772_v43  ;;  %v718_v50 = vpack.c.bf16 %v713_v46, %v712_v45  ;;  %v753_v51 = vld [vmem:[#allocation2 + $0x5c] sm:$0xff]  ;;  %v5294_v23 = vld [vmem:[#allocation5 + $0x320] sm:$0xff]   ;;  %v5301_v34 = vld [vmem:[#allocation5 + $0x2b8] sm:$0xff]  }
  0x72   : > { %4730 = vmatpush3.bf16.msra.mxu1 %v5262_v53  ;;  %1569 = vmatprep.mubr.bf16.mxu1 %v698_v1  ;;  %v785_v53 = vld [vmem:[#allocation2 + $0x1e] sm:$0xff]  ;;  %v797_v1 = vpack.c.bf16 %v791_v63, %v790_v62  ;;  %v5303_v36 = vld [vmem:[#allocation5 + $0x278] sm:$0xff]  }
  0x73   : > { %4731 = vmatprep.subr.bf16.mxu1 %v5264_v55  ;;  %v5522_v55 = vld [vmem:[#allocation2] sm:$0xff]  ;;  %v5297_v28 = vld [vmem:[#allocation5 + $0x328] sm:$0xff]  }
  0x74   : > { %4686 = vmatpush3.bf16.msra.mxu0 %v5263_v54  ;;  %v758_v54 = vpack.c.bf16 %v753_v51, %v733_v38  ;;  %v5302_v33 = vld [vmem:[#allocation5 + $0x2f0] sm:$0xff]   ;;  %v5305_v38 = vld [vmem:[#allocation5 + $0x2f8] sm:$0xff]  }
  0x75   : > { %5053 = vmatprep.subr.bf16.mxu0 %v5646_v0 }
  0x76   : > { %4732 = vmatpush3.bf16.msra.mxu1 %v5265_v59  ;;  %v788_v59 = vld [vmem:[#allocation2 + $0x36] sm:$0xff] }
  0x77   : > { %1497 = vmatmul.mubr.bf16.gmra.mrb[16].mxu0 %v638_v52  ;;  %v784_v52 = vld [vmem:[#allocation2 + $0x16] sm:$0xff]  ;;  %v796_v61 = vpack.c.bf16 %v789_v60, %v788_v59  ;;  %4776 = vmatprep.subr.bf16.mxu1 %v5274_v5 }
  0x78   : > { %1610 = vmatprep.mubr.bf16.mxu0 %v734_v58  ;;  %v794_v56 = vpack.c.bf16 %v785_v53, %v784_v52  ;;  %v787_v58 = vld [vmem:[#allocation2 + $0x2e] sm:$0xff] }
  0x79   : > { %1570 = vmatmul.mubr.bf16.gmra.mrb[16].mxu1 %v678_v2  ;;  %v792_v2 = vld [vmem:[#allocation2 + $0x56] sm:$0xff] }
  0x7a   : > { %1683 = vmatprep.mubr.bf16.mxu1 %v774_v3  ;;  %v793_v3 = vld [vmem:[#allocation2 + $0x5e] sm:$0xff] }
  0x7f   : > { %1611 = vmatmul.mubr.bf16.vlgmr.msra.gmra.mrb[20].mxu0 %v714_v4  ;;  %v798_v4 = vpack.c.bf16 %v793_v3, %v792_v2 }
  0x80   : > { %5054 = vmatpush3.bf16.msra.mxu0 %v5266_v7  ;;  %1618 = vmatprep.mubr.bf16.mxu0 %v735_v8  ;;  %v5276_v7 = vld [vmem:[#allocation5 + $0x288] sm:$0xff]  }
  0x81   : > { %5055 = vmatprep.subr.bf16.mxu0 %v5646_v0  ;;  %1684 = vmatmul.mubr.bf16.vlgmr.msra.gmra.mrb[20].mxu1 %v754_v14  ;;  %v5277_v8 = vld [vmem:[#allocation5 + $0x248] sm:$0xff]  }
  0x82   : > { %1691 = vmatprep.mubr.bf16.mxu1 %v775_v35  ;;  %4777 = vmatpush3.bf16.msra.mxu1 %v5275_v6  ;;  %v5282_v14 = vld [vmem:[#allocation5 + $0x308] sm:$0xff]   ;;  %v5283_v35 = vld [vmem:[#allocation5 + $0x298] sm:$0xff]  }
  0x83   : > { %4778 = vmatprep.subr.bf16.mxu1 %v5276_v7 }
  0x84   : > { %5056 = vmatpush3.bf16.msra.mxu0 %v5267_v12  ;;  %v5278_v12 = vld [vmem:[#allocation5 + $0x290] sm:$0xff]  }
  0x85   : > { %5057 = vmatprep.subr.bf16.mxu0 %v5646_v0 }
  0x86   : > { %4779 = vmatpush3.bf16.msra.mxu1 %v5277_v8 }
  0x87   : > { %1619 = vmatmul.mubr.bf16.gmra.mrb[24].mxu0 %v715_v32  ;;  %4780 = vmatprep.subr.bf16.mxu1 %v5278_v12  ;;  %v5286_v32 = vld [vmem:[#allocation5 + $0x310] sm:$0xff]  }
  0x88   : > { %5058 = vmatpush3.bf16.msra.mxu0 %v5268_v19  ;;  %1626 = vmatprep.mubr.bf16.mxu0 %v736_v20  ;;  %v5290_v19 = vld [vmem:[#allocation5 + $0x318] sm:$0xff]   ;;  %v5288_v20 = vld [vmem:[#allocation5 + $0x2a0] sm:$0xff]  }
  0x89   : > { %5059 = vmatprep.subr.bf16.mxu0 %v5646_v0  ;;  %1692 = vmatmul.mubr.bf16.gmra.mrb[24].mxu1 %v755_v22  ;;  %v5291_v22 = vld [vmem:[#allocation5 + $0x2d8] sm:$0xff]  }
  0x8a   : > { %1699 = vmatprep.mubr.bf16.mxu1 %v776_v25  ;;  %4781 = vmatpush3.bf16.msra.mxu1 %v5280_v13  ;;  %v5292_v25 = vld [vmem:[#allocation5 + $0x2a8] sm:$0xff]  }
  0x8b   : > { %4782 = vmatprep.subr.bf16.mxu1 %v5283_v35 }
  0x8c   : > { %5060 = vmatpush3.bf16.msra.mxu0 %v5269_v24  ;;  %v5295_v24 = vld [vmem:[#allocation5 + $0x2e0] sm:$0xff]  }
  0x8d   : > { %5061 = vmatprep.subr.bf16.mxu0 %v5646_v0 }
  0x8e   : > { %4783 = vmatpush3.bf16.msra.mxu1 %v5285_v16 }
  0x8f   : > { %1627 = vmatmul.mubr.bf16.gmra.mrb[28].mxu0 %v716_v27  ;;  %4784 = vmatprep.subr.bf16.mxu1 %v5288_v20  ;;  %v5296_v27 = vld [vmem:[#allocation5 + $0x2b0] sm:$0xff]  }
  0x90   : > { %5062 = vmatpush3.bf16.msra.mxu0 %v5270_v29  ;;  %1634 = vmatprep.mubr.bf16.mxu0 %v737_v30  ;;  %v5298_v29 = vld [vmem:[#allocation5 + $0x270] sm:$0xff]   ;;  %v5299_v30 = vld [vmem:[#allocation5 + $0x2e8] sm:$0xff]  }
  0x91   : > { %5063 = vmatprep.subr.bf16.mxu0 %v5646_v0  ;;  %1700 = vmatmul.mubr.bf16.gmra.mrb[28].mxu1 %v756_v39  ;;  %v5306_v39 = vld [vmem:[#allocation5 + $0x380] sm:$0xff]  }
  0x92   : > { %1707 = vmatprep.mubr.bf16.mxu1 %v777_v18  ;;  %4785 = vmatpush3.bf16.msra.mxu1 %v5289_v21  ;;  %v5311_v18 = vld [vmem:[#allocation5 + $0x400] sm:$0xff]  }
  0x93   : > { %4786 = vmatprep.subr.bf16.mxu1 %v5292_v25 }
  0x94   : > { %5064 = vmatpush3.bf16.msra.mxu0 %v5271_v37  ;;  %v5304_v37 = vld [vmem:[#allocation5 + $0x338] sm:$0xff]  }
  0x95   : > { %5065 = vmatprep.subr.bf16.mxu0 %v5646_v0 }
  0x96   : > { %4787 = vmatpush3.bf16.msra.mxu1 %v5293_v26 }
  0x97   : > { %1635 = vmatmul.mubr.bf16.gmra.mrb[32].mxu0 %v717_v41  ;;  %4788 = vmatprep.subr.bf16.mxu1 %v5296_v27 }
  0x98   : > { %1642 = vmatprep.mubr.bf16.mxu0 %v738_v42  ;;  %5066 = vmatpush3.bf16.msra.mxu0 %v5272_v40  ;;  %v5869_v40 = vld [vmem:[%s6940_s2] ss:$0 sm:$0xff] }
  0x99   : > { %5067 = vmatprep.subr.bf16.mxu0 %v5646_v0  ;;  %1708 = vmatmul.mubr.bf16.gmra.mrb[32].mxu1 %v757_v48  ;;  %v795_v0 = vpack.c.bf16 %v787_v58, %v786_v57 }
  0x9a   : > { %1715 = vmatprep.mubr.bf16.mxu1 %v778_v49  ;;  %4789 = vmatpush3.bf16.msra.mxu1 %v5298_v29 }
  0x9b   : > { %4790 = vmatprep.subr.bf16.mxu1 %v5301_v34 }
  0x9c   : > { %5068 = vmatpush3.bf16.msra.mxu0 %v5273_v47 }
  0x9d   : > { %4822 = vmatprep.subr.bf16.mxu0 %v5279_v9 }
  0x9e   : > { %4791 = vmatpush3.bf16.msra.mxu1 %v5303_v36 }
  0x9f   : > { %1643 = vmatmul.mubr.bf16.gmra.mrb[36].mxu0 %v718_v50  ;;  %4868 = vmatprep.subr.bf16.mxu1 %v5306_v39 }
  0xa0   : > { %5069 = vmatprep.mubr.msk.bf16.mxu0 %vm5647_vm0, %v5522_v55 }
  0xa1   : > { %1716 = vmatmul.mubr.bf16.gmra.mrb[36].mxu1 %v758_v54 }
  0xa7   : > { %5070 = vmatmul.mubr.bf16.vlgmr.msra.gmra.mrb[40].mxu0 %v794_v56 }
  0xa8   : > { %5073 = vmatprep.mubr.msk.bf16.mxu0 %vm5647_vm0, %v5522_v55  ;;  %4823 = vmatpush3.bf16.msra.mxu0 %v5281_v11 }
  0xa9   : > { %4824 = vmatprep.subr.bf16.mxu0 %v5282_v14 }
  0xac   : > { %4825 = vmatpush3.bf16.msra.mxu0 %v5284_v15 }
  0xad   : > { %4826 = vmatprep.subr.bf16.mxu0 %v5286_v32 }
  0xaf   : > { %5074 = vmatmul.mubr.bf16.gmra.mrb[44].mxu0 %v795_v0 }
  0xb0   : > { %5077 = vmatprep.mubr.msk.bf16.mxu0 %vm5647_vm0, %v5522_v55  ;;  %4827 = vmatpush3.bf16.msra.mxu0 %v5287_v17 }
  0xb1   : > { %4828 = vmatprep.subr.bf16.mxu0 %v5290_v19 }
  0xb4   : > { %4829 = vmatpush3.bf16.msra.mxu0 %v5291_v22 }
  0xb5   : > { %4830 = vmatprep.subr.bf16.mxu0 %v5294_v23 }
  0xb7   : > { %5078 = vmatmul.mubr.bf16.gmra.mrb[48].mxu0 %v796_v61 }
  0xb8   : > { %5081 = vmatprep.mubr.msk.bf16.mxu0 %vm5647_vm0, %v5522_v55  ;;  %4831 = vmatpush3.bf16.msra.mxu0 %v5295_v24 }
  0xb9   : > { %4832 = vmatprep.subr.bf16.mxu0 %v5297_v28 }
  0xbc   : > { %4833 = vmatpush3.bf16.msra.mxu0 %v5299_v30 }
  0xbd   : > { %4834 = vmatprep.subr.bf16.mxu0 %v5300_v31 }
  0xbf   : > { %5082 = vmatmul.mubr.bf16.gmra.mrb[52].mxu0 %v797_v1 }
  0xc0   : > { %5085 = vmatprep.mubr.msk.bf16.mxu0 %vm5647_vm0, %v5522_v55  ;;  %4835 = vmatpush3.bf16.msra.mxu0 %v5302_v33 }
  0xc1   : > { %4836 = vmatprep.subr.bf16.mxu0 %v5304_v37 }
  0xc4   : > { %4837 = vmatpush3.bf16.msra.mxu0 %v5305_v38 }
  0xc5   : > { %4914 = vmatprep.subr.bf16.mxu0 %v5311_v18 }
  0xc7   : > { %5086 = vmatmul.mubr.bf16.gmra.mrb[56].mxu0 %v798_v4 }
 0x12a   : > { %v4595_v10 = vpop.f32.mrb[0].mxu0 }
 0x12b   : > { %v4596_v41 = vpop.f32.mrb[1].mxu0 }
 0x12c   : > { %v4597_v42 = vadd.f32 %v4596_v41, %v4595_v10  ;;  %v4598_v43 = vpop.f32.mrb[2].mxu0  ;;  %v4641_v44 = vpop.f32.mrb[0].mxu1 }
 0x12d   : > { %v4599_v45 = vpop.f32.mrb[3].mxu0  ;;  %v4642_v46 = vpop.f32.mrb[1].mxu1 }
 0x12e   : > { %v1467_v47 = vadd.f32 %v4597_v42, %v5869_v40  ;;  %v4600_v48 = vadd.f32 %v4599_v45, %v4598_v43  ;;  %v4643_v49 = vadd.f32 %v4642_v46, %v4641_v44  ;;  %v4644_v50 = vpop.f32.mrb[2].mxu1 }
 0x12f   : > { %v4645_v51 = vpop.f32.mrb[3].mxu1 }
 0x130   : > { %v1470_v52 = vadd.f32 %v4600_v48, %v5869_v40  ;;  %v5873_v53 = vadd.f32 %v4643_v49, %v1467_v47  ;;  %v4646_v54 = vadd.f32 %v4645_v51, %v4644_v50 }
 0x132   : > { %v5875_v55 = vadd.f32 %v4646_v54, %v1470_v52  ;;  %v4601_v56 = vpop.f32.mrb[4].mxu0  ;;  %v443_v54 = vlaneseq }
 0x133   : > { %v4602_v57 = vpop.f32.mrb[5].mxu0 }
 0x134   : > { %v4603_v58 = vadd.f32 %v4602_v57, %v4601_v56  ;;  %v4604_v0 = vpop.f32.mrb[6].mxu0  ;;  %v4647_v59 = vpop.f32.mrb[4].mxu1 }
 0x135   : > { %v4605_v60 = vpop.f32.mrb[7].mxu0  ;;  %v4648_v61 = vpop.f32.mrb[5].mxu1 }
 0x136   : > { %v1475_v62 = vadd.f32 %v4603_v58, %v5869_v40  ;;  %v4606_v63 = vadd.f32 %v4605_v60, %v4604_v0  ;;  %v4649_v1 = vadd.f32 %v4648_v61, %v4647_v59  ;;  %v4650_v2 = vpop.f32.mrb[6].mxu1 }
 0x137   : > { %v4651_v3 = vpop.f32.mrb[7].mxu1 }
 0x138   : > { %v1478_v4 = vadd.f32 %v4606_v63, %v5869_v40  ;;  %v5879_v5 = vadd.f32 %v4649_v1, %v1475_v62  ;;  %v4652_v6 = vadd.f32 %v4651_v3, %v4650_v2  ;;  %v5901_v1 = vshrl.u32 %v443_v54, 7 }
 0x13a   : > { %v5881_v7 = vadd.f32 %v4652_v6, %v1478_v4  ;;  %v4607_v8 = vpop.f32.mrb[8].mxu0 }
 0x13b   : > { %v4608_v9 = vpop.f32.mrb[9].mxu0 }
 0x13c   : > { %v4609_v11 = vadd.f32 %v4608_v9, %v4607_v8  ;;  %v4610_v12 = vpop.f32.mrb[10].mxu0  ;;  %v4653_v13 = vpop.f32.mrb[8].mxu1 }
 0x13d   : > { %v4611_v14 = vpop.f32.mrb[11].mxu0  ;;  %v4654_v16 = vpop.f32.mrb[9].mxu1 }
 0x13e   : > { %v1483_v15 = vadd.f32 %v4609_v11, %v5869_v40  ;;  %v4612_v35 = vadd.f32 %v4611_v14, %v4610_v12  ;;  %v4655_v32 = vadd.f32 %v4654_v16, %v4653_v13  ;;  %v4656_v17 = vpop.f32.mrb[10].mxu1  ;;  %v445_v11 = vadd.s32 8, %v5901_v1 }
 0x13f   : > { %v4657_v20 = vpop.f32.mrb[11].mxu1 }
 0x140   : > { %v1486_v19 = vadd.f32 %v4612_v35, %v5869_v40  ;;  %v5885_v21 = vadd.f32 %v4655_v32, %v1483_v15  ;;  %v4658_v22 = vadd.f32 %v4657_v20, %v4656_v17 }
 0x141   : > { %v5907_v14 = vmul.u32.u64.low 3435973837, %v5901_v1  ;;  %v5908_v15 = vmul.u32.u64.high 3435973837, %v5901_v1, %v5907_v14 }
 0x142   : > { %v5887_v23 = vadd.f32 %v4658_v22, %v1486_v19  ;;  %v4613_v24 = vpop.f32.mrb[12].mxu0 }
 0x143   : > { %v4614_v25 = vpop.f32.mrb[13].mxu0 }
 0x144   : > { %v4615_v26 = vadd.f32 %v4614_v25, %v4613_v24  ;;  %v4616_v27 = vpop.f32.mrb[14].mxu0  ;;  %v4659_v28 = vpop.f32.mrb[12].mxu1 }
 0x145   : > { %v4617_v29 = vpop.f32.mrb[15].mxu0  ;;  %v4660_v30 = vpop.f32.mrb[13].mxu1 }
 0x146   : > { %v1491_v31 = vadd.f32 %v4615_v26, %v5869_v40  ;;  %v4618_v33 = vadd.f32 %v4617_v29, %v4616_v27  ;;  %v4661_v34 = vadd.f32 %v4660_v30, %v4659_v28  ;;  %v4662_v36 = vpop.f32.mrb[14].mxu1  ;;  %v5919_v27 = vadd.s32 16, %v5901_v1 }
 0x147   : > { %v4663_v37 = vpop.f32.mrb[15].mxu1 }
 0x148   : > { %v1494_v38 = vadd.f32 %v4618_v33, %v5869_v40  ;;  %v5891_v39 = vadd.f32 %v4661_v34, %v1491_v31  ;;  %v4664_v18 = vadd.f32 %v4663_v37, %v4662_v36  ;;  %v460_v36 = vshrl.u32 %v5908_v15, 3 }
 0x149   : > { %v5924_v37 = vadd.s32 24, %v5901_v1 }
 0x14a   : > { %v5893_v10 = vadd.f32 %v4664_v18, %v1494_v38  ;;  %v4619_v41 = vpop.f32.mrb[16].mxu0 }
 0x14b   : > { %v4620_v42 = vpop.f32.mrb[17].mxu0 }
 0x14c   : > { %v4621_v43 = vadd.f32 %v4620_v42, %v4619_v41  ;;  %v4622_v44 = vpop.f32.mrb[18].mxu0  ;;  %v4665_v48 = vpop.f32.mrb[16].mxu1 }
 0x14d   : > { %v4623_v45 = vpop.f32.mrb[19].mxu0  ;;  %v4666_v49 = vpop.f32.mrb[17].mxu1 }
 0x14e   : > { %v4624_v46 = vadd.f32 %v4623_v45, %v4622_v44  ;;  %v1499_v47 = vadd.f32 %v4621_v43, %v5869_v40  ;;  %v4667_v51 = vadd.f32 %v4666_v49, %v4665_v48  ;;  %v4668_v52 = vpop.f32.mrb[18].mxu1 }
 0x14f   : > { %v4669_v56 = vpop.f32.mrb[19].mxu1 }
 0x150   : > { %v1502_v50 = vadd.f32 %v4624_v46, %v5869_v40  ;;  %v5897_v58 = vadd.f32 %v4667_v51, %v1499_v47  ;;  %v4670_v0 = vadd.f32 %v4669_v56, %v4668_v52  ;;  %v461_v52 = vmul.u32 10, %v460_v36 }
 0x152   : > { %v4687_v57 = vpop.f32.mrb[20].mxu0  ;;  %v5899_v62 = vadd.f32 %v4670_v0, %v1502_v50  ;;  %v5937_v49 = vmul.u32.u64.low 3435973837, %v5924_v37  ;;  %v5938_v50 = vmul.u32.u64.high 3435973837, %v5924_v37, %v5937_v49 }
 0x153   : > { %v4688_v59 = vpop.f32.mrb[21].mxu0 }
 0x154   : > { %v4689_v60 = vadd.f32 %v4688_v59, %v4687_v57  ;;  %v4690_v61 = vpop.f32.mrb[22].mxu0  ;;  %v4733_v40 = vpop.f32.mrb[20].mxu1  ;;  %v5942_v57 = vadd.s32 32, %v5901_v1 }
 0x155   : > { %v4691_v63 = vpop.f32.mrb[23].mxu0  ;;  %v4734_v6 = vpop.f32.mrb[21].mxu1 }
 0x156   : > { %v1613_v2 = vadd.f32 %v4689_v60, %v5873_v53  ;;  %v4692_v3 = vadd.f32 %v4691_v63, %v4690_v61  ;;  %v4735_v8 = vadd.f32 %v4734_v6, %v4733_v40  ;;  %v4736_v9 = vpop.f32.mrb[22].mxu1  ;;  %v5945_v61 = vadd.s32 40, %v5901_v1 }
 0x157   : > { %v4737_v12 = vpop.f32.mrb[23].mxu1  ;;  %v462_v40 = vsub.s32 %v5901_v1, %v461_v52 }
 0x158   : > { %v1616_v4 = vadd.f32 %v4692_v3, %v5875_v55  ;;  %v4738_v35 = vadd.f32 %v4737_v12, %v4736_v9  ;;  %v5910_v32 = vadd.f32 %v4735_v8, %v1613_v2 }
 0x159   : > { %v5912_v20 = vmul.u32.u64.low 3435973837, %v445_v11  ;;  %v5913_v55 = vmul.u32.u64.high 3435973837, %v445_v11, %v5912_v20  ;;  %v5952_v9 = vmul.u32.u64.low 3435973837, %v5942_v57  ;;  %v5953_v12 = vmul.u32.u64.high 3435973837, %v5942_v57, %v5952_v9 }
 0x15a   : > { %v4693_v13 = vpop.f32.mrb[24].mxu0  ;;  %v5915_v22 = vadd.f32 %v4738_v35, %v1616_v4  ;;  %v5958_v15 = vmul.u32.u64.low 3435973837, %v5945_v61  ;;  %v5959_v35 = vmul.u32.u64.high 3435973837, %v5945_v61, %v5958_v15  ;;  %v5966_v20 = vadd.s32 48, %v5901_v1 }
 0x15b   : > { %v4694_v16 = vpop.f32.mrb[25].mxu0  ;;  %v471_v45 = vshrl.u32 %v5913_v55, 3  ;;  %vm564_vm1 = vcmp.ne.s32.totalorder %v462_v40, 0  ;;  %vm574_vm2 = vcmp.lt.s32.totalorder %v462_v40, 0 }
 0x15c   : > { %v4695_v53 = vadd.f32 %v4694_v16, %v4693_v13  ;;  %v4696_v17 = vpop.f32.mrb[26].mxu0  ;;  %v4739_v26 = vpop.f32.mrb[24].mxu1  ;;  %vm5970_vm4 = vmand %vm574_vm2, %vm564_vm1 }
 0x15d   : > { %v4697_v19 = vpop.f32.mrb[27].mxu0  ;;  %v4740_v29 = vpop.f32.mrb[25].mxu1  ;;  %v472_v60 = vmul.u32 10, %v471_v45 }
 0x15e   : > { %v1621_v24 = vadd.f32 %v4695_v53, %v5879_v5  ;;  %v4698_v25 = vadd.f32 %v4697_v19, %v4696_v17  ;;  %v4741_v30 = vadd.f32 %v4740_v29, %v4739_v26  ;;  %v4742_v31 = vpop.f32.mrb[26].mxu1  ;;  %v493_v19 = vshrl.u32 %v5938_v50, 3 }
 0x15f   : > { %v4743_v33 = vpop.f32.mrb[27].mxu1  ;;  %v5927_v5 = vmul.u32.u64.low 3435973837, %v5919_v27  ;;  %v5928_v41 = vmul.u32.u64.high 3435973837, %v5919_v27, %v5927_v5  ;;  %v5955_v14 = vsub.s32 %v445_v11, %v472_v60  ;;  %v594_v29 = vadd.s32 10, %v462_v40 }
 0x160   : > { %v1624_v28 = vadd.f32 %v4698_v25, %v5881_v7  ;;  %v4744_v38 = vadd.f32 %v4743_v33, %v4742_v31  ;;  %v5930_v42 = vadd.f32 %v4741_v30, %v1621_v24  ;;  %v494_v33 = vmul.u32 10, %v493_v19 }
 0x161   : > { %v482_v4 = vshrl.u32 %v5928_v41, 3  ;;  %vm565_vm3 = vcmp.ne.s32.totalorder %v5955_v14, 0  ;;  %vm575_vm5 = vcmp.lt.s32.totalorder %v5955_v14, 0  ;;  %v5985_v41 = vadd.s32 56, %v5901_v1 }
 0x162   : > { %v4699_v34 = vpop.f32.mrb[28].mxu0  ;;  %v5933_v46 = vadd.f32 %v4744_v38, %v1624_v28  ;;  %vm5998_vm6 = vmand %vm575_vm5, %vm565_vm3  ;;  %v6003_v52 = vsub.s32 %v5924_v37, %v494_v33 }
 0x163   : > { %v4700_v18 = vpop.f32.mrb[29].mxu0  ;;  %v483_v24 = vmul.u32 10, %v482_v4 }
 0x164   : > { %v4701_v43 = vadd.f32 %v4700_v18, %v4699_v34  ;;  %v4702_v7 = vpop.f32.mrb[30].mxu0  ;;  %v4745_v51 = vpop.f32.mrb[28].mxu1  ;;  %v5976_v34 = vmul.u32.u64.low 3435973837, %v5966_v20  ;;  %v5977_v36 = vmul.u32.u64.high 3435973837, %v5966_v20, %v5976_v34  ;;  %vm567_vm10 = vcmp.ne.s32.totalorder %v6003_v52, 0 }
 0x165   : > { %v4703_v44 = vpop.f32.mrb[31].mxu0  ;;  %v4746_v56 = vpop.f32.mrb[29].mxu1  ;;  %v5980_v18 = vsub.s32 %v5919_v27, %v483_v24  ;;  %vm577_vm11 = vcmp.lt.s32.totalorder %v6003_v52, 0 }
 0x166   : > { %v1629_v47 = vadd.f32 %v4701_v43, %v5885_v21  ;;  %v4704_v48 = vadd.f32 %v4703_v44, %v4702_v7  ;;  %v4747_v0 = vadd.f32 %v4746_v56, %v4745_v51  ;;  %v4748_v59 = vpop.f32.mrb[30].mxu1  ;;  %v504_v44 = vshrl.u32 %v5953_v12, 3  ;;  %vm6070_vm14 = vmand %vm577_vm11, %vm567_vm10 }
 0x167   : > { %v4749_v21 = vpop.f32.mrb[31].mxu1  ;;  %vm566_vm7 = vcmp.ne.s32.totalorder %v5980_v18, 0  ;;  %vm576_vm8 = vcmp.lt.s32.totalorder %v5980_v18, 0  ;;  %v596_v4 = vadd.s32 10, %v5980_v18  ;;  %v526_v9 = vshrl.u32 %v5977_v36, 3 }
 0x168   : > { %v1632_v54 = vadd.f32 %v4704_v48, %v5887_v23  ;;  %v4750_v2 = vadd.f32 %v4749_v21, %v4748_v59  ;;  %v5949_v6 = vadd.f32 %v4747_v0, %v1629_v47  ;;  %v604_v47 = vsel %vm5970_vm4, %v594_v29, %v462_v40  ;;  %vm6034_vm12 = vmand %vm576_vm8, %vm566_vm7 }
 0x169   : > { %v595_v48 = vadd.s32 10, %v5955_v14  ;;  %v505_v21 = vmul.u32 10, %v504_v44  ;;  %vm6016_vm9 = vcmp.lt.s32.totalorder %v604_v47, 8  ;;  %v1857_v44 = vld [vmem:[#allocation3 + $0x1] sm:$0xff] }
 0x16a   : > { %v4705_v63 = vpop.f32.mrb[32].mxu0  ;;  %v5961_v16 = vadd.f32 %v4750_v2, %v1632_v54  ;;  %v515_v54 = vshrl.u32 %v5959_v35, 3 }
 0x16b   : > { %v4706_v3 = vpop.f32.mrb[33].mxu0  ;;  %v605_v40 = vsel %vm5998_vm6, %v595_v48, %v5955_v14  ;;  %v6048_v19 = vsub.s32 %v5942_v57, %v505_v21  ;;  %v606_v57 = vsel %vm6034_vm12, %v596_v4, %v5980_v18 }
 0x16c   : > { %v4707_v23 = vadd.f32 %v4706_v3, %v4705_v63  ;;  %v4708_v8 = vpop.f32.mrb[34].mxu0  ;;  %v4751_v55 = vpop.f32.mrb[32].mxu1  ;;  %v6014_v63 = vadd.s32 64, %v5901_v1  ;;  %vm6043_vm13 = vcmp.lt.s32.totalorder %v605_v40, 8  ;;  %vm6090_vm2 = vcmp.lt.s32.totalorder %v606_v57, 8  ;;  %v5307_v40 = vld [vmem:[#allocation5 + $0x340] sm:$0xff]  }
 0x16d   : > { %v4709_v13 = vpop.f32.mrb[35].mxu0  ;;  %v4752_v25 = vpop.f32.mrb[33].mxu1  ;;  %vm568_vm15 = vcmp.ne.s32.totalorder %v6048_v19, 0  ;;  %vm578_vm1 = vcmp.lt.s32.totalorder %v6048_v19, 0  ;;  %v598_v18 = vadd.s32 10, %v6048_v19 }
 0x16e   : > { %v1637_v53 = vadd.f32 %v4707_v23, %v5891_v39  ;;  %v4710_v17 = vadd.f32 %v4709_v13, %v4708_v8  ;;  %v4753_v26 = vadd.f32 %v4752_v25, %v4751_v55  ;;  %v4754_v28 = vpop.f32.mrb[34].mxu1  ;;  %v516_v8 = vmul.u32 10, %v515_v54  ;;  %vm6099_vm4 = vmand %vm578_vm1, %vm568_vm15 }
 0x16f   : > { %v4755_v30 = vpop.f32.mrb[35].mxu1  ;;  %v6051_v55 = vmul.u32.u64.low 3435973837, %v6014_v63  ;;  %v6052_v24 = vmul.u32.u64.high 3435973837, %v6014_v63, %v6051_v55 }
 0x170   : > { %v1640_v11 = vadd.f32 %v4710_v17, %v5893_v10  ;;  %v4756_v10 = vadd.f32 %v4755_v30, %v4754_v28  ;;  %v5982_v5 = vadd.f32 %v4753_v26, %v1637_v53  ;;  %v6041_v53 = vadd.s32 72, %v5901_v1  ;;  %v5314_v55 = vld [vmem:[#allocation5 + $0x408] sm:$0xff]  }
 0x171   : > { %v597_v28 = vadd.s32 10, %v6003_v52 }
 0x172   : > { %v4711_v39 = vpop.f32.mrb[36].mxu0  ;;  %v5991_v49 = vadd.f32 %v4756_v10, %v1640_v11  ;;  %v6082_v34 = vmul.u32.u64.low 3435973837, %v6041_v53  ;;  %v6083_v36 = vmul.u32.u64.high 3435973837, %v6041_v53, %v6082_v34 }
 0x173   : > { %v4712_v38 = vpop.f32.mrb[37].mxu0  ;;  %v5316_v34 = vld [vmem:[#allocation5 + $0x3c8] sm:$0xff]  }
 0x174   : > { %v4713_v43 = vadd.f32 %v4712_v38, %v4711_v39  ;;  %v4714_v7 = vpop.f32.mrb[38].mxu0  ;;  %v4757_v56 = vpop.f32.mrb[36].mxu1  ;;  %v527_v39 = vmul.u32 10, %v526_v9  ;;  %v559_v9 = vshrl.u32 %v6083_v36, 3 }
 0x175   : > { %v4715_v45 = vpop.f32.mrb[39].mxu0  ;;  %v4758_v60 = vpop.f32.mrb[37].mxu1 }
 0x176   : > { %v1645_v27 = vadd.f32 %v4713_v43, %v5897_v58  ;;  %v4716_v50 = vadd.f32 %v4715_v45, %v4714_v7  ;;  %v6008_v0 = vmul.u32.u64.low 3435973837, %v5985_v41  ;;  %v6009_v58 = vmul.u32.u64.high 3435973837, %v5985_v41, %v6008_v0  ;;  %v4760_v2 = vpop.f32.mrb[38].mxu1 }
 0x177   : > { %v4759_v37 = vadd.f32 %v4758_v60, %v4757_v56  ;;  %v6105_v47 = vsub.s32 %v5966_v20, %v527_v39  ;;  %v1877_v20 = vld [vmem:[#allocation3 + $0x2] sm:$0xff]  ;;  %v6119_v60 = vld [vmem:[#allocation2] sm:$0xff]  ;;  %v560_v39 = vmul.u32 10, %v559_v9 }
 0x178   : > { %v1648_v59 = vadd.f32 %v4716_v50, %v5899_v62  ;;  %v4761_v62 = vpop.f32.mrb[39].mxu1  ;;  %v537_v33 = vshrl.u32 %v6009_v58, 3 }
 0x179   : > { %v4762_v12 = vadd.f32 %v4761_v62, %v4760_v2  ;;  %v6038_v35 = vadd.f32 %v4759_v37, %v1645_v27  ;;  %v608_v37 = vsel %vm6099_vm4, %v598_v18, %v6048_v19  ;;  %vm570_vm8 = vcmp.ne.s32.totalorder %v6105_v47, 0 }
 0x17a   : > { %v1758_v23 = vpop.f32.mrb[40].mxu0  ;;  %v538_v48 = vmul.u32 10, %v537_v33  ;;  %vm580_vm10 = vcmp.lt.s32.totalorder %v6105_v47, 0  ;;  %vm6148_vm11 = vcmp.lt.s32.totalorder %v608_v37, 8  ;;  %v5319_v37 = vld [vmem:[#allocation5 + $0x3d0] sm:$0xff]  }
 0x17b   : > { %v6028_v13 = vadd.f32 %v1758_v23, %v5910_v32  ;;  %v5071_v15 = vpop.f32.mrb[41].mxu0  ;;  %v6061_v29 = vadd.f32 %v4762_v12, %v1648_v59  ;;  %v5308_v23 = vld [vmem:[#allocation5 + $0x388] sm:$0xff]   ;;  %vm6160_vm12 = vmand %vm580_vm10, %vm570_vm8 }
 0x17c   : > { %v1761_v32 = vpop.f32.mrb[42].mxu0  ;;  %v5313_v15 = vld [vmem:[#allocation5 + $0x3c0] sm:$0xff]  }
 0x17d   : > { %v1817_v11 = vsel %vm6016_vm9, %v6028_v13, 0.0  ;;  %v6058_v25 = vadd.f32 %v1761_v32, %v5915_v22  ;;  %v5072_v26 = vpop.f32.mrb[43].mxu0  ;;  %v6075_v22 = vsub.s32 %v5945_v61, %v516_v8  ;;  %v607_v61 = vsel %vm6070_vm14, %v597_v28, %v6003_v52 }
 0x17e   : > { %1827 = vst [vmem:[#allocation3 + $0xb] sm:$0xff] %v1817_v11  ;;  %vm6107_vm6 = vcmp.lt.s32.totalorder %v607_v61, 8  ;;  %v6140_v8 = vsub.s32 %v5985_v41, %v538_v48  ;;  %v5309_v11 = vld [vmem:[#allocation5 + $0x348] sm:$0xff]   ;;  %v600_v26 = vadd.s32 10, %v6105_v47  ;;  %v5318_v61 = vld [vmem:[#allocation5 + $0x410] sm:$0xff]  }
 0x17f   : > { %v1818_v31 = vsel %vm6043_vm13, %v6058_v25, 0.0  ;;  %vm569_vm3 = vcmp.ne.s32.totalorder %v6075_v22, 0  ;;  %vm579_vm5 = vcmp.lt.s32.totalorder %v6075_v22, 0  ;;  %v599_v58 = vadd.s32 10, %v6075_v22  ;;  %v5344_v41 = vld [vmem:[#allocation5 + $0x470] sm:$0xff]  }
 0x180   : > { %1828 = vst [vmem:[#allocation3 + $0x13] sm:$0xff] %v1818_v31  ;;  %vm6129_vm7 = vmand %vm579_vm5, %vm569_vm3  ;;  %vm571_vm14 = vcmp.ne.s32.totalorder %v6140_v8, 0  ;;  %vm581_vm15 = vcmp.lt.s32.totalorder %v6140_v8, 0 }
 0x181   : > { %v609_v19 = vsel %vm6129_vm7, %v599_v58, %v6075_v22  ;;  %v5310_v22 = vld [vmem:[#allocation5 + $0x390] sm:$0xff]   ;;  %vm6184_vm3 = vmand %vm581_vm15, %vm571_vm14  ;;  %v5315_v58 = vld [vmem:[#allocation5 + $0x398] sm:$0xff]  }
 0x182   : > { %v1766_v38 = vpop.f32.mrb[44].mxu0  ;;  %vm6166_vm1 = vcmp.lt.s32.totalorder %v609_v19, 8  ;;  %v5326_v19 = vld [vmem:[#allocation5 + $0x420] sm:$0xff]  }
 0x183   : > { %v6097_v43 = vadd.f32 %v1766_v38, %v5930_v42  ;;  %v5075_v7 = vpop.f32.mrb[45].mxu0  ;;  %v548_v42 = vshrl.u32 %v6052_v24, 3 }
 0x184   : > { %v1769_v50 = vpop.f32.mrb[46].mxu0 }
 0x185   : > { %v1819_v51 = vsel %vm6090_vm2, %v6097_v43, 0.0  ;;  %v6116_v52 = vadd.f32 %v1769_v50, %v5933_v46  ;;  %v5076_v54 = vpop.f32.mrb[47].mxu0  ;;  %v1858_v56 = vld [vmem:[#allocation3 + $0x9] sm:$0xff]  ;;  %v549_v14 = vmul.u32 10, %v548_v42  ;;  %v601_v50 = vadd.s32 10, %v6140_v8 }
 0x186   : > { %v1838_v0 = vld [vmem:[#allocation3 + $0x8] sm:$0xff]  ;;  %1829 = vst [vmem:[#allocation3 + $0x1b] sm:$0xff] %v1819_v51  ;;  %v1867_v59 = vpack.c.bf16 %v1858_v56, %v1857_v44  ;;  %v5325_v54 = vld [vmem:[#allocation5 + $0x368] sm:$0xff]  }
 0x187   : > { %v1847_v21 = vpack.c.bf16 %v1838_v0, %v6119_v60  ;;  %v1897_v2 = vld [vmem:[#allocation3 + $0xa] sm:$0xff]  ;;  %v1820_v4 = vsel %vm6107_vm6, %v6116_v52, 0.0  ;;  %v6136_v62 = vld [vmem:[#allocation3 + $0x12] sm:$0xff]  ;;  %v6171_v36 = vsub.s32 %v6014_v63, %v549_v14  ;;  %v610_v0 = vsel %vm6160_vm12, %v600_v26, %v6105_v47 }
 0x188   : > { %1830 = vst [vmem:[#allocation3 + $0x23] sm:$0xff] %v1820_v4  ;;  %2679 = vmatprep.mubr.bf16.mxu1 %v1867_v59  ;;  %v1907_v12 = vpack.c.bf16 %v6136_v62, %v1897_v2  ;;  %v1887_v32 = vpack.c.bf16 %v1897_v2, %v1877_v20  ;;  %v1859_v33 = vld [vmem:[#allocation3 + $0x11] sm:$0xff]  ;;  %v6197_v59 = vsub.s32 %v6041_v53, %v560_v39  ;;  %v5322_v53 = vld [vmem:[#allocation5 + $0x418] sm:$0xff]   ;;  %vm6206_vm7 = vcmp.lt.s32.totalorder %v610_v0, 8 }
 0x189   : > { %2680 = vmatmul.mubr.bf16.vlgmr.msra.gmra.mrb[40].mxu1 %v1847_v21  ;;  %v1839_v45 = vld [vmem:[#allocation3 + $0x10] sm:$0xff]  ;;  %vm572_vm4 = vcmp.ne.s32.totalorder %v6171_v36, 0  ;;  %vm582_vm5 = vcmp.lt.s32.totalorder %v6171_v36, 0  ;;  %v611_v2 = vsel %vm6184_vm3, %v601_v50, %v6140_v8  ;;  %v5317_v4 = vld [vmem:[#allocation5 + $0x358] sm:$0xff]   ;;  %v602_v8 = vadd.s32 10, %v6171_v36  ;;  %v5328_v0 = vld [vmem:[#allocation5 + $0x3b0] sm:$0xff]  }
 0x18a   : > { %v1774_v24 = vpop.f32.mrb[48].mxu0  ;;  %2752 = vmatprep.mubr.bf16.mxu0 %v1907_v12  ;;  %4869 = vmatpush3.bf16.msra.mxu1 %v5307_v40  ;;  %vm6217_vm8 = vmand %vm582_vm5, %vm572_vm4  ;;  %vm573_vm10 = vcmp.ne.s32.totalorder %v6197_v59, 0  ;;  %vm583_vm12 = vcmp.lt.s32.totalorder %v6197_v59, 0  ;;  %v5320_v12 = vld [vmem:[#allocation5 + $0x3a0] sm:$0xff]   ;;  %vm6224_vm14 = vcmp.lt.s32.totalorder %v611_v2, 8 }
 0x18b   : > { %v6154_v28 = vadd.f32 %v1774_v24, %v5949_v6  ;;  %v5079_v57 = vpop.f32.mrb[49].mxu0  ;;  %2753 = vmatmul.mubr.bf16.vlgmr.msra.gmra.mrb[60].mxu0 %v1887_v32  ;;  %4870 = vmatprep.subr.bf16.mxu1 %v5308_v23  ;;  %v5323_v32 = vld [vmem:[#allocation5 + $0x3d8] sm:$0xff]   ;;  %vm6239_vm15 = vmand %vm583_vm12, %vm573_vm10 }
 0x18c   : > { %v1777_v31 = vpop.f32.mrb[50].mxu0  ;;  %4915 = vmatpush3.bf16.msra.mxu0 %v5313_v15  ;;  %vm5532_vm5 = vmpackc.low %vm6043_vm13, %vm6016_vm9 }
 0x18d   : > { %v1821_v38 = vsel %vm6148_vm11, %v6154_v28, 0.0  ;;  %v6177_v18 = vadd.f32 %v1777_v31, %v5961_v16  ;;  %v5080_v7 = vpop.f32.mrb[51].mxu0  ;;  %v1860_v44 = vld [vmem:[#allocation3 + $0x19] sm:$0xff]  ;;  %4916 = vmatprep.subr.bf16.mxu0 %v5314_v55  ;;  %vm5535_vm9 = vmpackc.low %vm6107_vm6, %vm6090_vm2 }
 0x18e   : > { %v1840_v48 = vld [vmem:[#allocation3 + $0x18] sm:$0xff]  ;;  %1831 = vst [vmem:[#allocation3 + $0x2b] sm:$0xff] %v1821_v38  ;;  %4871 = vmatpush3.bf16.msra.mxu1 %v5309_v11  ;;  %v1868_v42 = vpack.c.bf16 %v1860_v44, %v1859_v33  ;;  %v612_v38 = vsel %vm6217_vm8, %v602_v8, %v6171_v36  ;;  %v5324_v44 = vld [vmem:[#allocation5 + $0x3a8] sm:$0xff]   ;;  %vm5538_vm13 = vmpackc.low %vm6166_vm1, %vm6148_vm11  ;;  %vm3020_vm11 = vcmask 1043456  }
 0x18f   : > { %v1848_v63 = vpack.c.bf16 %v1840_v48, %v1839_v45  ;;  %v1899_v51 = vld [vmem:[#allocation3 + $0x1a] sm:$0xff]  ;;  %v1822_v56 = vsel %vm6166_vm1, %v6177_v18, 0.0  ;;  %v6194_v20 = vld [vmem:[#allocation3 + $0x22] sm:$0xff]  ;;  %4872 = vmatprep.subr.bf16.mxu1 %v5310_v22  ;;  %v603_v22 = vadd.s32 10, %v6197_v59  ;;  %vm6253_vm3 = vcmp.lt.s32.totalorder %v612_v38, 8  ;;  %vm5541_vm2 = vmpackc.low %vm6224_vm14, %vm6206_vm7 }
 0x190   : > { %v5312_v16 = vld [vmem:[#allocation5 + $0x350] sm:$0xff]   ;;  %1832 = vst [vmem:[#allocation3 + $0x33] sm:$0xff] %v1822_v56  ;;  %2687 = vmatprep.mubr.bf16.mxu1 %v1868_v42  ;;  %v1908_v21 = vpack.c.bf16 %v6194_v20, %v1899_v51  ;;  %4917 = vmatpush3.bf16.msra.mxu0 %v5316_v34  ;;  %v1888_v47 = vpack.c.bf16 %v1899_v51, %v6136_v62  ;;  %v1861_v14 = vld [vmem:[#allocation3 + $0x21] sm:$0xff]  ;;  %vm3026_vm1 = vcmask 1041408  }
 0x191   : > { %2688 = vmatmul.mubr.bf16.gmra.mrb[44].mxu1 %v1848_v63  ;;  %4918 = vmatprep.subr.bf16.mxu0 %v5318_v61  ;;  %v1841_v57 = vld [vmem:[#allocation3 + $0x20] sm:$0xff]  ;;  %v5327_v48 = vld [vmem:[#allocation5 + $0x3e0] sm:$0xff]   ;;  %v613_v42 = vsel %vm6239_vm15, %v603_v22, %v6197_v59  ;;  %v5329_v63 = vld [vmem:[#allocation5 + $0x428] sm:$0xff]  }
 0x192   : > { %v1782_v46 = vpop.f32.mrb[52].mxu0  ;;  %2760 = vmatprep.mubr.bf16.mxu0 %v1908_v21  ;;  %4873 = vmatpush3.bf16.msra.mxu1 %v5312_v16  ;;  %vm6260_vm4 = vcmp.lt.s32.totalorder %v613_v42, 8  ;;  %v5331_v21 = vld [vmem:[#allocation5 + $0x3e8] sm:$0xff]   ;;  %v5337_v22 = vld [vmem:[#allocation5 + $0x3f8] sm:$0xff]  }
 0x193   : > { %v6211_v23 = vadd.f32 %v1782_v46, %v5982_v5  ;;  %v5083_v9 = vpop.f32.mrb[53].mxu0  ;;  %2761 = vmatmul.mubr.bf16.gmra.mrb[64].mxu0 %v1888_v47  ;;  %4874 = vmatprep.subr.bf16.mxu1 %v5315_v58  ;;  %v1977_v42 = vld [vmem:[#allocation3 + $0x15] sm:$0xff]  ;;  %vm5544_vm6 = vmpackc.low %vm6260_vm4, %vm6253_vm3  ;;  %v1998_v5 = vld [vmem:[#allocation3 + $0x1e] sm:$0xff] }
 0x194   : > { %v1785_v15 = vpop.f32.mrb[54].mxu0  ;;  %4919 = vmatpush3.bf16.msra.mxu0 %v5319_v37  ;;  %v5332_v37 = vld [vmem:[#allocation5 + $0x430] sm:$0xff]  }
 0x195   : > { %v1823_v55 = vsel %vm6206_vm7, %v6211_v23, 0.0  ;;  %v6232_v24 = vadd.f32 %v1785_v15, %v5991_v49  ;;  %v5084_v11 = vpop.f32.mrb[55].mxu0  ;;  %v1862_v26 = vld [vmem:[#allocation3 + $0x29] sm:$0xff]  ;;  %4920 = vmatprep.subr.bf16.mxu0 %v5322_v53 }
 0x196   : > { %v1842_v30 = vld [vmem:[#allocation3 + $0x28] sm:$0xff]  ;;  %1833 = vst [vmem:[#allocation3 + $0x3b] sm:$0xff] %v1823_v55  ;;  %v1869_v39 = vpack.c.bf16 %v1862_v26, %v1861_v14  ;;  %4875 = vmatpush3.bf16.msra.mxu1 %v5317_v4  ;;  %v5336_v11 = vld [vmem:[#allocation5 + $0x438] sm:$0xff]  }
 0x197   : > { %v1849_v31 = vpack.c.bf16 %v1842_v30, %v1841_v57  ;;  %v1901_v33 = vld [vmem:[#allocation3 + $0x2a] sm:$0xff]  ;;  %v1824_v61 = vsel %vm6224_vm14, %v6232_v24, 0.0  ;;  %v1902_v7 = vld [vmem:[#allocation3 + $0x32] sm:$0xff]  ;;  %4876 = vmatprep.subr.bf16.mxu1 %v5320_v12  ;;  %v5335_v26 = vld [vmem:[#allocation5 + $0x378] sm:$0xff]  }
 0x198   : > { %v5321_v49 = vld [vmem:[#allocation5 + $0x360] sm:$0xff]   ;;  %1834 = vst [vmem:[#allocation3 + $0x43] sm:$0xff] %v1824_v61  ;;  %2695 = vmatprep.mubr.bf16.mxu1 %v1869_v39  ;;  %v1909_v45 = vpack.c.bf16 %v1902_v7, %v1901_v33  ;;  %4921 = vmatpush3.bf16.msra.mxu0 %v5323_v32  ;;  %v1889_v50 = vpack.c.bf16 %v1901_v33, %v6194_v20  ;;  %v1863_v59 = vld [vmem:[#allocation3 + $0x31] sm:$0xff]  ;;  %v5333_v32 = vld [vmem:[#allocation5 + $0x3b8] sm:$0xff]  }
 0x199   : > { %2696 = vmatmul.mubr.bf16.gmra.mrb[48].mxu1 %v1849_v31  ;;  %4922 = vmatprep.subr.bf16.mxu0 %v5326_v19  ;;  %v1843_v46 = vld [vmem:[#allocation3 + $0x30] sm:$0xff]  ;;  %v5330_v12 = vld [vmem:[#allocation5 + $0x370] sm:$0xff]  }
 0x19a   : > { %v1790_v36 = vpop.f32.mrb[56].mxu0  ;;  %2768 = vmatprep.mubr.bf16.mxu0 %v1909_v45  ;;  %4877 = vmatpush3.bf16.msra.mxu1 %v5321_v49  ;;  %v5334_v19 = vld [vmem:[#allocation5 + $0x3f0] sm:$0xff]   ;;  %v1941_v3 = vld [vmem:[#allocation3 + $0x2c] sm:$0xff] }
 0x19b   : > { %v6258_v16 = vadd.f32 %v1790_v36, %v6038_v35  ;;  %v5087_v56 = vpop.f32.mrb[57].mxu0  ;;  %2769 = vmatmul.mubr.bf16.gmra.mrb[68].mxu0 %v1889_v50  ;;  %4878 = vmatprep.subr.bf16.mxu1 %v5324_v44  ;;  %v1938_v30 = vld [vmem:[#allocation3 + $0x14] sm:$0xff]  ;;  %v1978_v44 = vld [vmem:[#allocation3 + $0x1d] sm:$0xff] }
 0x19c   : > { %v1793_v58 = vpop.f32.mrb[58].mxu0  ;;  %4923 = vmatpush3.bf16.msra.mxu0 %v5327_v48  ;;  %v1940_v36 = vld [vmem:[#allocation3 + $0x24] sm:$0xff]  ;;  %v2000_v51 = vld [vmem:[#allocation3 + $0x2e] sm:$0xff] }
 0x19d   : > { %v1825_v47 = vsel %vm6253_vm3, %v6258_v16, 0.0  ;;  %v6268_v35 = vadd.f32 %v1793_v58, %v6061_v29  ;;  %v5088_v2 = vpop.f32.mrb[59].mxu0  ;;  %v1864_v53 = vld [vmem:[#allocation3 + $0x39] sm:$0xff]  ;;  %4924 = vmatprep.subr.bf16.mxu0 %v5329_v63  ;;  %v1987_v63 = vpack.c.bf16 %v1978_v44, %v1977_v42  ;;  %v5338_v56 = vld [vmem:[#allocation5 + $0x440] sm:$0xff]  }
 0x19e   : > { %v1844_v4 = vld [vmem:[#allocation3 + $0x38] sm:$0xff]  ;;  %1835 = vst [vmem:[#allocation3 + $0x4b] sm:$0xff] %v1825_v47  ;;  %v1870_v9 = vpack.c.bf16 %v1864_v53, %v1863_v59  ;;  %4879 = vmatpush3.bf16.msra.mxu1 %v5325_v54  ;;  %v5533_v59 = vpack.c.bf16 %v6058_v25, %v6028_v13  ;;  %v5339_v2 = vld [vmem:[#allocation5 + $0x448] sm:$0xff]   ;;  %v5536_v13 = vpack.c.bf16 %v6116_v52, %v6097_v43 }
 0x19f   : > { %v1850_v62 = vpack.c.bf16 %v1844_v4, %v1843_v46  ;;  %v1903_v8 = vld [vmem:[#allocation3 + $0x3a] sm:$0xff]  ;;  %v1826_v15 = vsel %vm6260_vm4, %v6268_v35, 0.0  ;;  %v1904_v14 = vld [vmem:[#allocation3 + $0x42] sm:$0xff]  ;;  %4880 = vmatprep.subr.bf16.mxu1 %v5328_v0  ;;  %v1980_v0 = vld [vmem:[#allocation3 + $0x2d] sm:$0xff]  ;;  %v1968_v25 = vpack.c.bf16 %v1941_v3, %v1940_v36  ;;  %v5539_v43 = vpack.c.bf16 %v6177_v18, %v6154_v28 }
 0x1a0   : > { %1836 = vst [vmem:[#allocation3 + $0x53] sm:$0xff] %v1826_v15  ;;  %2703 = vmatprep.mubr.bf16.mxu1 %v1870_v9  ;;  %v1910_v29 = vpack.c.bf16 %v1904_v14, %v1903_v8  ;;  %4925 = vmatpush3.bf16.msra.mxu0 %v5331_v21  ;;  %v1890_v55 = vpack.c.bf16 %v1903_v8, %v1902_v7  ;;  %v1865_v57 = vld [vmem:[#allocation3 + $0x41] sm:$0xff]  ;;  %v1937_v7 = vld [vmem:[#allocation3 + $0xc] sm:$0xff]  ;;  %v1942_v53 = vld [vmem:[#allocation3 + $0x34] sm:$0xff] }
 0x1a1   : > { %2704 = vmatmul.mubr.bf16.gmra.mrb[52].mxu1 %v1850_v62  ;;  %4926 = vmatprep.subr.bf16.mxu0 %v5332_v37  ;;  %v1845_v31 = vld [vmem:[#allocation3 + $0x40] sm:$0xff]  ;;  %v1947_v48 = vpack.c.bf16 %v1938_v30, %v1937_v7  ;;  %v5340_v46 = vld [vmem:[#allocation5 + $0x450] sm:$0xff]   ;;  %v1949_v4 = vpack.c.bf16 %v1942_v53, %v1941_v3  ;;  %v5342_v15 = vld [vmem:[#allocation5 + $0x460] sm:$0xff]   ;;  %v5542_v18 = vpack.c.bf16 %v6232_v24, %v6211_v23 }
 0x1a2   : > { %2776 = vmatprep.mubr.bf16.mxu0 %v1910_v29  ;;  %4881 = vmatpush3.bf16.msra.mxu1 %v5330_v12  ;;  %v1939_v54 = vld [vmem:[#allocation3 + $0x1c] sm:$0xff]  ;;  %v1979_v37 = vld [vmem:[#allocation3 + $0x25] sm:$0xff]  ;;  %v5545_v40 = vpack.c.bf16 %v6268_v35, %v6258_v16 }
 0x1a3   : > { %2777 = vmatmul.mubr.bf16.gmra.mrb[72].mxu0 %v1890_v55  ;;  %4882 = vmatprep.subr.bf16.mxu1 %v5333_v32  ;;  %v1948_v58 = vpack.c.bf16 %v1940_v36, %v1939_v54  ;;  %v1967_v21 = vpack.c.bf16 %v1939_v54, %v1938_v30  ;;  %v1988_v47 = vpack.c.bf16 %v1980_v0, %v1979_v37  ;;  %v1982_v17 = vld [vmem:[#allocation3 + $0x3d] sm:$0xff]  ;;  %v1981_v9 = vld [vmem:[#allocation3 + $0x35] sm:$0xff] }
 0x1a4   : > { %4927 = vmatpush3.bf16.msra.mxu0 %v5334_v19  ;;  %v1989_v62 = vpack.c.bf16 %v1982_v17, %v1981_v9  ;;  %v5341_v8 = vld [vmem:[#allocation5 + $0x458] sm:$0xff]   ;;  %v5343_v19 = vld [vmem:[#allocation5 + $0x468] sm:$0xff]  }
 0x1a5   : > { %v1866_v39 = vld [vmem:[#allocation3 + $0x49] sm:$0xff]  ;;  %4928 = vmatprep.subr.bf16.mxu0 %v5336_v11  ;;  %v1943_v10 = vld [vmem:[#allocation3 + $0x3c] sm:$0xff] }
 0x1a6   : > { %v1846_v33 = vld [vmem:[#allocation3 + $0x48] sm:$0xff]  ;;  %v1871_v34 = vpack.c.bf16 %v1866_v39, %v1865_v57  ;;  %4883 = vmatpush3.bf16.msra.mxu1 %v5335_v26  ;;  %v1969_v52 = vpack.c.bf16 %v1943_v10, %v1942_v53  ;;  %v1986_v26 = vld [vmem:[#allocation3 + $0x5d] sm:$0xff] }
 0x1a7   : > { %v1851_v49 = vpack.c.bf16 %v1846_v33, %v1845_v31  ;;  %v1905_v61 = vld [vmem:[#allocation3 + $0x4a] sm:$0xff]  ;;  %v1906_v38 = vld [vmem:[#allocation3 + $0x52] sm:$0xff]  ;;  %5089 = vmatprep.subr.bf16.mxu1 %v6119_v60  ;;  %v1966_v39 = vld [vmem:[#allocation3 + $0x5c] sm:$0xff] }
 0x1a8   : > { %2711 = vmatprep.mubr.bf16.mxu1 %v1871_v34  ;;  %v1911_v45 = vpack.c.bf16 %v1906_v38, %v1905_v61  ;;  %4929 = vmatpush3.bf16.msra.mxu0 %v5337_v22  ;;  %v1891_v50 = vpack.c.bf16 %v1905_v61, %v1904_v14  ;;  %v1944_v12 = vld [vmem:[#allocation3 + $0x44] sm:$0xff]  ;;  %v1984_v27 = vld [vmem:[#allocation3 + $0x4d] sm:$0xff]  ;;  %v1985_v6 = vld [vmem:[#allocation3 + $0x55] sm:$0xff] }
 0x1a9   : > { %2712 = vmatmul.mubr.bf16.gmra.mrb[56].mxu1 %v1851_v49  ;;  %v1950_v14 = vpack.c.bf16 %v1944_v12, %v1943_v10  ;;  %v1983_v32 = vld [vmem:[#allocation3 + $0x45] sm:$0xff]  ;;  %v1946_v11 = vld [vmem:[#allocation3 + $0x54] sm:$0xff]  ;;  %v1991_v30 = vpack.c.bf16 %v1986_v26, %v1985_v6 }
 0x1aa   : > { %2784 = vmatprep.mubr.bf16.mxu0 %v1911_v45  ;;  %2825 = vmatprep.mubr.bf16.mxu1 %v1947_v48  ;;  %v1990_v29 = vpack.c.bf16 %v1984_v27, %v1983_v32  ;;  %v1945_v55 = vld [vmem:[#allocation3 + $0x4c] sm:$0xff]  ;;  %v5345_v22 = vld [vmem:[#allocation5 + $0x478] sm:$0xff]   ;;  %v1971_v23 = vpack.c.bf16 %v1966_v39, %v1946_v11  ;;  %v1997_v24 = vld [vmem:[#allocation3 + $0x16] sm:$0xff] }
 0x1ab   : > { %2785 = vmatmul.mubr.bf16.gmra.mrb[76].mxu0 %v1891_v50  ;;  %v1951_v28 = vpack.c.bf16 %v1946_v11, %v1945_v55  ;;  %v1970_v57 = vpack.c.bf16 %v1945_v55, %v1944_v12  ;;  %v2007_v31 = vpack.c.bf16 %v1998_v5, %v1997_v24  ;;  %v1999_v33 = vld [vmem:[#allocation3 + $0x26] sm:$0xff]  ;;  %v2002_v16 = vld [vmem:[#allocation3 + $0x3e] sm:$0xff]  ;;  %v2001_v35 = vld [vmem:[#allocation3 + $0x36] sm:$0xff] }
 0x1ac   : > { %2898 = vmatprep.mubr.bf16.mxu0 %v1987_v63  ;;  %v2008_v20 = vpack.c.bf16 %v2000_v51, %v1999_v33  ;;  %v2009_v34 = vpack.c.bf16 %v2002_v16, %v2001_v35  ;;  %v2004_v49 = vld [vmem:[#allocation3 + $0x4e] sm:$0xff]  ;;  %v2003_v61 = vld [vmem:[#allocation3 + $0x46] sm:$0xff]  ;;  %v2005_v7 = vld [vmem:[#allocation3 + $0x56] sm:$0xff] }
 0x1ad   : > { %v2010_v38 = vpack.c.bf16 %v2004_v49, %v2003_v61  ;;  %v2006_v44 = vld [vmem:[#allocation3 + $0x5e] sm:$0xff]  ;;  %v6324_v50 = vld [vmem:[%s6940_s2 + $0x1] ss:$0 sm:$0xff] }
 0x1ae   : > { %v2011_v45 = vpack.c.bf16 %v2006_v44, %v2005_v7 }
 0x1b1   : > { %5534 = vmatmul.mubr.msk.bf16.vlgmr.msra.gmra.mrb[60].mxu1 %vm5532_vm5, %v5533_v59 }
 0x1b2   : > { %2833 = vmatprep.mubr.bf16.mxu1 %v1948_v58  ;;  %5090 = vmatpush3.bf16.msra.mxu1 %v5338_v56 }
 0x1b3   : > { %2899 = vmatmul.mubr.bf16.vlgmr.msra.gmra.mrb[80].mxu0 %v1967_v21  ;;  %5091 = vmatprep.subr.bf16.mxu1 %v6119_v60 }
 0x1b4   : > { %2906 = vmatprep.mubr.bf16.mxu0 %v1988_v47 }
 0x1b6   : > { %5092 = vmatpush3.bf16.msra.mxu1 %v5339_v2 }
 0x1b7   : > { %5093 = vmatprep.subr.bf16.mxu1 %v6119_v60 }
 0x1b9   : > { %5537 = vmatmul.mubr.msk.bf16.gmra.mrb[64].mxu1 %vm5535_vm9, %v5536_v13 }
 0x1ba   : > { %2841 = vmatprep.mubr.bf16.mxu1 %v1949_v4  ;;  %5094 = vmatpush3.bf16.msra.mxu1 %v5340_v46 }
 0x1bb   : > { %2907 = vmatmul.mubr.bf16.gmra.mrb[84].mxu0 %v1968_v25  ;;  %5095 = vmatprep.subr.bf16.mxu1 %v6119_v60 }
 0x1bc   : > { %2914 = vmatprep.mubr.bf16.mxu0 %v1989_v62 }
 0x1be   : > { %5096 = vmatpush3.bf16.msra.mxu1 %v5341_v8 }
 0x1bf   : > { %5097 = vmatprep.subr.bf16.mxu1 %v6119_v60 }
 0x1c1   : > { %5540 = vmatmul.mubr.msk.bf16.gmra.mrb[68].mxu1 %vm5538_vm13, %v5539_v43 }
 0x1c2   : > { %2849 = vmatprep.mubr.bf16.mxu1 %v1950_v14  ;;  %5098 = vmatpush3.bf16.msra.mxu1 %v5342_v15 }
 0x1c3   : > { %2915 = vmatmul.mubr.bf16.gmra.mrb[88].mxu0 %v1969_v52  ;;  %5099 = vmatprep.subr.bf16.mxu1 %v6119_v60 }
 0x1c4   : > { %2922 = vmatprep.mubr.bf16.mxu0 %v1990_v29 }
 0x1c6   : > { %5100 = vmatpush3.bf16.msra.mxu1 %v5343_v19 }
 0x1c7   : > { %5101 = vmatprep.subr.bf16.mxu1 %v6119_v60 }
 0x1c9   : > { %5543 = vmatmul.mubr.msk.bf16.gmra.mrb[72].mxu1 %vm5541_vm2, %v5542_v18 }
 0x1ca   : > { %2857 = vmatprep.mubr.bf16.mxu1 %v1951_v28  ;;  %5102 = vmatpush3.bf16.msra.mxu1 %v5344_v41 }
 0x1cb   : > { %2923 = vmatmul.mubr.bf16.gmra.mrb[92].mxu0 %v1970_v57  ;;  %5103 = vmatprep.subr.bf16.mxu1 %v6119_v60 }
 0x1cc   : > { %2930 = vmatprep.mubr.bf16.mxu0 %v1991_v30 }
 0x1ce   : > { %5104 = vmatpush3.bf16.msra.mxu1 %v5345_v22 }
 0x1d1   : > { %5546 = vmatmul.mubr.msk.bf16.gmra.mrb[76].mxu1 %vm5544_vm6, %v5545_v40 }
 0x1d2   : > { %5105 = vmatprep.mubr.msk.bf16.mxu1 %vm5647_vm0, %v6119_v60 }
 0x1d3   : > { %2931 = vmatmul.mubr.bf16.gmra.mrb[96].mxu0 %v1971_v23 }
 0x1d9   : > { %5106 = vmatmul.mubr.bf16.vlgmr.msra.gmra.mrb[80].mxu1 %v2007_v31 }
 0x1da   : > { %5109 = vmatprep.mubr.msk.bf16.mxu1 %vm5647_vm0, %v6119_v60 }
 0x1e1   : > { %5110 = vmatmul.mubr.bf16.gmra.mrb[84].mxu1 %v2008_v20 }
 0x1e2   : > { %5113 = vmatprep.mubr.msk.bf16.mxu1 %vm5647_vm0, %v6119_v60 }
 0x1e9   : > { %5114 = vmatmul.mubr.bf16.gmra.mrb[88].mxu1 %v2009_v34 }
 0x1ea   : > { %5117 = vmatprep.mubr.msk.bf16.mxu1 %vm5647_vm0, %v6119_v60 }
 0x1f1   : > { %5118 = vmatmul.mubr.bf16.gmra.mrb[92].mxu1 %v2010_v38 }
 0x1f2   : > { %5121 = vmatprep.mubr.msk.bf16.mxu1 %vm5647_vm0, %v6119_v60  ;;  %vm3014_vm0 = vcmask 1045504  }
 0x1f9   : > { %5122 = vmatmul.mubr.bf16.gmra.mrb[96].mxu1 %v2011_v45 }
 0x25c   : > { %v4792_v48 = vpop.f32.mrb[40].mxu1 }
 0x25d   : > { %v4793_v42 = vpop.f32.mrb[41].mxu1 }
 0x25e   : > { %v4794_v63 = vadd.f32 %v4793_v42, %v4792_v48  ;;  %v4795_v36 = vpop.f32.mrb[42].mxu1  ;;  %v4838_v54 = vpop.f32.mrb[60].mxu0 }
 0x25f   : > { %v4796_v56 = vpop.f32.mrb[43].mxu1  ;;  %v4839_v0 = vpop.f32.mrb[61].mxu0 }
 0x260   : > { %v2682_v58 = vadd.f32 %v4794_v63, %v6324_v50  ;;  %v4797_v59 = vadd.f32 %v4796_v56, %v4795_v36  ;;  %v4840_v60 = vadd.f32 %v4839_v0, %v4838_v54  ;;  %v4841_v21 = vpop.f32.mrb[62].mxu0 }
 0x261   : > { %v4842_v37 = vpop.f32.mrb[63].mxu0 }
 0x262   : > { %v2685_v47 = vadd.f32 %v4797_v59, %v6324_v50  ;;  %v6328_v2 = vadd.f32 %v4840_v60, %v2682_v58  ;;  %v4843_v53 = vadd.f32 %v4842_v37, %v4841_v21 }
 0x264   : > { %v6330_v3 = vadd.f32 %v4843_v53, %v2685_v47  ;;  %v4798_v46 = vpop.f32.mrb[44].mxu1 }
 0x265   : > { %v4799_v17 = vpop.f32.mrb[45].mxu1 }
 0x266   : > { %v4800_v4 = vadd.f32 %v4799_v17, %v4798_v46  ;;  %v4801_v13 = vpop.f32.mrb[46].mxu1  ;;  %v4844_v25 = vpop.f32.mrb[64].mxu0 }
 0x267   : > { %v4802_v9 = vpop.f32.mrb[47].mxu1  ;;  %v4845_v62 = vpop.f32.mrb[65].mxu0 }
 0x268   : > { %v2690_v8 = vadd.f32 %v4800_v4, %v6324_v50  ;;  %v4803_v12 = vadd.f32 %v4802_v9, %v4801_v13  ;;  %v4846_v10 = vadd.f32 %v4845_v62, %v4844_v25  ;;  %v4847_v15 = vpop.f32.mrb[66].mxu0 }
 0x269   : > { %v4848_v27 = vpop.f32.mrb[67].mxu0 }
 0x26a   : > { %v2693_v14 = vadd.f32 %v4803_v12, %v6324_v50  ;;  %v6334_v43 = vadd.f32 %v4846_v10, %v2690_v8  ;;  %v4849_v52 = vadd.f32 %v4848_v27, %v4847_v15 }
 0x26c   : > { %v6336_v32 = vadd.f32 %v4849_v52, %v2693_v14  ;;  %v4804_v29 = vpop.f32.mrb[48].mxu1 }
 0x26d   : > { %v4805_v19 = vpop.f32.mrb[49].mxu1 }
 0x26e   : > { %v4806_v55 = vadd.f32 %v4805_v19, %v4804_v29  ;;  %v4807_v11 = vpop.f32.mrb[50].mxu1  ;;  %v4850_v41 = vpop.f32.mrb[68].mxu0 }
 0x26f   : > { %v4808_v6 = vpop.f32.mrb[51].mxu1  ;;  %v4851_v26 = vpop.f32.mrb[69].mxu0 }
 0x270   : > { %v2698_v28 = vadd.f32 %v4806_v55, %v6324_v50  ;;  %v4809_v18 = vadd.f32 %v4808_v6, %v4807_v11  ;;  %v4852_v57 = vadd.f32 %v4851_v26, %v4850_v41  ;;  %v4853_v30 = vpop.f32.mrb[70].mxu0 }
 0x271   : > { %v4854_v22 = vpop.f32.mrb[71].mxu0 }
 0x272   : > { %v2701_v39 = vadd.f32 %v4809_v18, %v6324_v50  ;;  %v6340_v40 = vadd.f32 %v4852_v57, %v2698_v28  ;;  %v4855_v23 = vadd.f32 %v4854_v22, %v4853_v30 }
 0x274   : > { %v6342_v5 = vadd.f32 %v4855_v23, %v2701_v39  ;;  %v4810_v24 = vpop.f32.mrb[52].mxu1 }
 0x275   : > { %v4811_v31 = vpop.f32.mrb[53].mxu1 }
 0x276   : > { %v4812_v51 = vadd.f32 %v4811_v31, %v4810_v24  ;;  %v4813_v33 = vpop.f32.mrb[54].mxu1  ;;  %v4856_v20 = vpop.f32.mrb[72].mxu0 }
 0x277   : > { %v4814_v16 = vpop.f32.mrb[55].mxu1  ;;  %v4857_v35 = vpop.f32.mrb[73].mxu0 }
 0x278   : > { %v2706_v34 = vadd.f32 %v4812_v51, %v6324_v50  ;;  %v4815_v49 = vadd.f32 %v4814_v16, %v4813_v33  ;;  %v4858_v61 = vadd.f32 %v4857_v35, %v4856_v20  ;;  %v4859_v38 = vpop.f32.mrb[74].mxu0 }
 0x279   : > { %v4860_v7 = vpop.f32.mrb[75].mxu0 }
 0x27a   : > { %v2709_v44 = vadd.f32 %v4815_v49, %v6324_v50  ;;  %v6346_v45 = vadd.f32 %v4858_v61, %v2706_v34  ;;  %v4861_v48 = vadd.f32 %v4860_v7, %v4859_v38 }
 0x27c   : > { %v6348_v42 = vadd.f32 %v4861_v48, %v2709_v44  ;;  %v4816_v63 = vpop.f32.mrb[56].mxu1 }
 0x27d   : > { %v4817_v36 = vpop.f32.mrb[57].mxu1 }
 0x27e   : > { %v4818_v54 = vadd.f32 %v4817_v36, %v4816_v63  ;;  %v4819_v56 = vpop.f32.mrb[58].mxu1  ;;  %v4862_v0 = vpop.f32.mrb[76].mxu0 }
 0x27f   : > { %v4820_v58 = vpop.f32.mrb[59].mxu1  ;;  %v4863_v59 = vpop.f32.mrb[77].mxu0 }
 0x280   : > { %v2714_v60 = vadd.f32 %v4818_v54, %v6324_v50  ;;  %v4821_v21 = vadd.f32 %v4820_v58, %v4819_v56  ;;  %v4864_v37 = vadd.f32 %v4863_v59, %v4862_v0  ;;  %v4865_v47 = vpop.f32.mrb[78].mxu0 }
 0x281   : > { %v4866_v53 = vpop.f32.mrb[79].mxu0 }
 0x282   : > { %v2717_v46 = vadd.f32 %v4821_v21, %v6324_v50  ;;  %v6352_v17 = vadd.f32 %v4864_v37, %v2714_v60  ;;  %v4867_v4 = vadd.f32 %v4866_v53, %v4865_v47 }
 0x284   : > { %v6354_v13 = vadd.f32 %v4867_v4, %v2717_v46  ;;  %v4884_v25 = vpop.f32.mrb[60].mxu1 }
 0x285   : > { %v4885_v9 = vpop.f32.mrb[61].mxu1 }
 0x286   : > { %v4886_v62 = vadd.f32 %v4885_v9, %v4884_v25  ;;  %v4887_v8 = vpop.f32.mrb[62].mxu1  ;;  %v4930_v12 = vpop.f32.mrb[80].mxu0 }
 0x287   : > { %v4888_v10 = vpop.f32.mrb[63].mxu1  ;;  %v4931_v15 = vpop.f32.mrb[81].mxu0 }
 0x288   : > { %v2828_v27 = vadd.f32 %v4886_v62, %v6328_v2  ;;  %v4889_v14 = vadd.f32 %v4888_v10, %v4887_v8  ;;  %v4932_v52 = vadd.f32 %v4931_v15, %v4930_v12  ;;  %v4933_v29 = vpop.f32.mrb[82].mxu0 }
 0x289   : > { %v4934_v19 = vpop.f32.mrb[83].mxu0 }
 0x28a   : > { %v2831_v50 = vadd.f32 %v4889_v14, %v6330_v3  ;;  %v4935_v55 = vadd.f32 %v4934_v19, %v4933_v29  ;;  %v6358_v11 = vadd.f32 %v4932_v52, %v2828_v27 }
 0x28c   : > { %v4890_v41 = vpop.f32.mrb[64].mxu1  ;;  %v6360_v6 = vadd.f32 %v4935_v55, %v2831_v50 }
 0x28d   : > { %v4891_v26 = vpop.f32.mrb[65].mxu1 }
 0x28e   : > { %v4892_v28 = vadd.f32 %v4891_v26, %v4890_v41  ;;  %v4893_v18 = vpop.f32.mrb[66].mxu1  ;;  %v4936_v57 = vpop.f32.mrb[84].mxu0 }
 0x28f   : > { %v4894_v30 = vpop.f32.mrb[67].mxu1  ;;  %v4937_v22 = vpop.f32.mrb[85].mxu0 }
 0x290   : > { %v2836_v2 = vadd.f32 %v4892_v28, %v6334_v43  ;;  %v4895_v39 = vadd.f32 %v4894_v30, %v4893_v18  ;;  %v4938_v23 = vadd.f32 %v4937_v22, %v4936_v57  ;;  %v4939_v24 = vpop.f32.mrb[86].mxu0 }
 0x291   : > { %v4940_v31 = vpop.f32.mrb[87].mxu0 }
 0x292   : > { %v2839_v3 = vadd.f32 %v4895_v39, %v6336_v32  ;;  %v4941_v51 = vadd.f32 %v4940_v31, %v4939_v24  ;;  %v2909_v33 = vadd.f32 %v4938_v23, %v2836_v2  ;;  %v5524_v31 = vld [vmem:[#allocation2 + $0xb] sm:$0xff] }
 0x294   : > { %v4896_v20 = vpop.f32.mrb[68].mxu1  ;;  %v6364_v16 = vadd.f32 %v4941_v51, %v2839_v3 }
 0x295   : > { %v4897_v35 = vpop.f32.mrb[69].mxu1 }
 0x296   : > { %v4898_v34 = vadd.f32 %v4897_v35, %v4896_v20  ;;  %v4899_v49 = vpop.f32.mrb[70].mxu1  ;;  %v4942_v61 = vpop.f32.mrb[88].mxu0 }
 0x297   : > { %v4900_v38 = vpop.f32.mrb[71].mxu1  ;;  %v4943_v7 = vpop.f32.mrb[89].mxu0 }
 0x298   : > { %v2844_v44 = vadd.f32 %v4898_v34, %v6340_v40  ;;  %v4901_v43 = vadd.f32 %v4900_v38, %v4899_v49  ;;  %v4944_v48 = vadd.f32 %v4943_v7, %v4942_v61  ;;  %v4945_v63 = vpop.f32.mrb[90].mxu0  ;;  %v5525_v7 = vld [vmem:[#allocation2 + $0x15] sm:$0xff] }
 0x299   : > { %v4946_v36 = vpop.f32.mrb[91].mxu0 }
 0x29a   : > { %v2847_v54 = vadd.f32 %v4901_v43, %v6342_v5  ;;  %v4947_v32 = vadd.f32 %v4946_v36, %v4945_v63  ;;  %v6368_v56 = vadd.f32 %v4944_v48, %v2844_v44 }
 0x29c   : > { %v4902_v0 = vpop.f32.mrb[72].mxu1  ;;  %v6370_v58 = vadd.f32 %v4947_v32, %v2847_v54 }
 0x29d   : > { %v4903_v59 = vpop.f32.mrb[73].mxu1 }
 0x29e   : > { %v4904_v60 = vadd.f32 %v4903_v59, %v4902_v0  ;;  %v4905_v21 = vpop.f32.mrb[74].mxu1  ;;  %v4948_v37 = vpop.f32.mrb[92].mxu0 }
 0x29f   : > { %v4906_v47 = vpop.f32.mrb[75].mxu1  ;;  %v4949_v53 = vpop.f32.mrb[93].mxu0 }
 0x2a0   : > { %v2852_v40 = vadd.f32 %v4904_v60, %v6346_v45  ;;  %v4907_v46 = vadd.f32 %v4906_v47, %v4905_v21  ;;  %v4950_v4 = vadd.f32 %v4949_v53, %v4948_v37  ;;  %v4951_v25 = vpop.f32.mrb[94].mxu0  ;;  %v5527_v21 = vld [vmem:[#allocation2 + $0x33] sm:$0xff]  ;;  %v5528_v53 = vld [vmem:[#allocation2 + $0x29] sm:$0xff] }
 0x2a1   : > { %v4952_v9 = vpop.f32.mrb[95].mxu0 }
 0x2a2   : > { %v2855_v5 = vadd.f32 %v4907_v46, %v6348_v42  ;;  %v4953_v62 = vadd.f32 %v4952_v9, %v4951_v25  ;;  %v6374_v8 = vadd.f32 %v4950_v4, %v2852_v40 }
 0x2a4   : > { %v4908_v12 = vpop.f32.mrb[76].mxu1  ;;  %v6376_v10 = vadd.f32 %v4953_v62, %v2855_v5 }
 0x2a5   : > { %v4909_v15 = vpop.f32.mrb[77].mxu1 }
 0x2a6   : > { %v4910_v27 = vadd.f32 %v4909_v15, %v4908_v12  ;;  %v4911_v14 = vpop.f32.mrb[78].mxu1  ;;  %v4954_v52 = vpop.f32.mrb[96].mxu0 }
 0x2a7   : > { %v4912_v29 = vpop.f32.mrb[79].mxu1  ;;  %v4955_v19 = vpop.f32.mrb[97].mxu0 }
 0x2a8   : > { %v2860_v45 = vadd.f32 %v4910_v27, %v6352_v17  ;;  %v4913_v50 = vadd.f32 %v4912_v29, %v4911_v14  ;;  %v4956_v55 = vadd.f32 %v4955_v19, %v4954_v52  ;;  %v4957_v41 = vpop.f32.mrb[98].mxu0  ;;  %v5529_v27 = vld [vmem:[#allocation2 + $0x3d] sm:$0xff] }
 0x2a9   : > { %v4958_v26 = vpop.f32.mrb[99].mxu0 }
 0x2aa   : > { %v2863_v42 = vadd.f32 %v4913_v50, %v6354_v13  ;;  %v4959_v28 = vadd.f32 %v4958_v26, %v4957_v41  ;;  %v2933_v18 = vadd.f32 %v4956_v55, %v2860_v45 }
 0x2ac   : > { %v2973_v57 = vpop.f32.mrb[80].mxu1  ;;  %v6380_v30 = vadd.f32 %v4959_v28, %v2863_v42  ;;  %v5530_v42 = vld [vmem:[#allocation2 + $0x47] sm:$0xff] }
 0x2ad   : > { %v2974_v22 = vadd.f32 %v2973_v57, %v6358_v11  ;;  %v5107_v2 = vpop.f32.mrb[81].mxu1 }
 0x2ae   : > { %v2976_v39 = vpop.f32.mrb[82].mxu1 }
 0x2af   : > { %v2977_v23 = vadd.f32 %v2976_v39, %v6360_v6  ;;  %v5108_v24 = vpop.f32.mrb[83].mxu1  ;;  %v6384_v17 = vadd.f32 %v5524_v31, %v2974_v22  ;;  %v5531_v22 = vld [vmem:[#allocation2 + $0x51] sm:$0xff] }
 0x2b1   : > { %3057 = vadd.xlane.f32.xlu0 %v6384_v17  ;;  %v3015_v35 = vrot.slane %v2977_v23, 2 }
 0x2b4   : > { %v2981_v3 = vpop.f32.mrb[84].mxu1 }
 0x2b5   : > { %v2982_v51 = vadd.f32 %v2981_v3, %v2909_v33  ;;  %v5111_v13 = vpop.f32.mrb[85].mxu1  ;;  %v5526_v33 = vld [vmem:[#allocation2 + $0x1f] sm:$0xff] }
 0x2b6   : > { %v2984_v20 = vpop.f32.mrb[86].mxu1 }
 0x2b7   : > { %v3016_v34 = vrot.slane %v2982_v51, 2  ;;  %v2985_v49 = vadd.f32 %v2984_v20, %v6364_v16  ;;  %v5112_v11 = vpop.f32.mrb[87].mxu1  ;;  %v3021_v61 = vrot.slane %v2982_v51, 4 }
 0x2b9   : > { %v3022_v38 = vrot.slane %v2985_v49, 4  ;;  %v3017_v6 = vsel %vm3014_vm0, %v3015_v35, %v3016_v34  ;;  %v3027_v32 = vrot.slane %v2985_v49, 6 }
 0x2ba   : > { %v6389_v44 = vadd.f32 %v5525_v7, %v3017_v6 }
 0x2bb   : > { %v3023_v43 = vsel %vm3020_vm11, %v3021_v61, %v3022_v38 }
 0x2bc   : > { %v2989_v48 = vpop.f32.mrb[88].mxu1  ;;  %3059 = vadd.xlane.f32.xlu0 %v6389_v44  ;;  %v3049_v63 = vadd.f32 %v5526_v33, %v3023_v43  ;;  %v5351_v33 = vld [vmem:[%s6943_s5 + $0x24] ss:$16 sps:$4 sm:$0xff]  }
 0x2bd   : > { %v2990_v36 = vadd.f32 %v2989_v48, %v6368_v56  ;;  %v5115_v54 = vpop.f32.mrb[89].mxu1 }
 0x2be   : > { %v2992_v16 = vpop.f32.mrb[90].mxu1  ;;  %3061 = vadd.xlane.f32.xlu1 %v3049_v63 }
 0x2bf   : > { %v3028_v0 = vrot.slane %v2990_v36, 6  ;;  %v2993_v59 = vadd.f32 %v2992_v16, %v6370_v58  ;;  %v5116_v60 = vpop.f32.mrb[91].mxu1  ;;  %v5349_v36 = vld [vmem:[%s6943_s5 + $0x20] ss:$16 sps:$4 sm:$0xff]  }
 0x2c1   : > { %v3051_v37 = vadd.f32 %v5527_v21, %v2993_v59  ;;  %v3029_v47 = vsel %vm3026_vm1, %v3027_v32, %v3028_v0  ;;  %v5354_v32 = vld [vmem:[%s6943_s5 + $0x44] ss:$16 sps:$4 sm:$0xff]   ;;  %v5352_v0 = vld [vmem:[%s6943_s5 + $0x40] ss:$16 sps:$4 sm:$0xff]  }
 0x2c2   : > { %v3050_v40 = vadd.f32 %v5528_v53, %v3029_v47  ;;  %v5355_v53 = vld [vmem:[%s6943_s5 + $0x60] ss:$16 sps:$4 sm:$0xff]  }
 0x2c3   : > { %3065 = vadd.xlane.f32.xlu0 %v3051_v37 }
 0x2c4   : > { %v2997_v46 = vpop.f32.mrb[92].mxu1  ;;  %3063 = vadd.xlane.f32.xlu1 %v3050_v40 }
 0x2c5   : > { %v2998_v56 = vadd.f32 %v2997_v46, %v6374_v8  ;;  %v5119_v4 = vpop.f32.mrb[93].mxu1 }
 0x2c6   : > { %v3000_v25 = vpop.f32.mrb[94].mxu1 }
 0x2c7   : > { %v3001_v9 = vadd.f32 %v3000_v25, %v6376_v10  ;;  %v5120_v5 = vpop.f32.mrb[95].mxu1  ;;  %v3033_v62 = vrot.slane %v2998_v56, 2  ;;  %v5360_v25 = vld [vmem:[%s6943_s5 + $0x84] ss:$16 sps:$4 sm:$0xff]  }
 0x2c9   : > { %v3034_v12 = vrot.slane %v3001_v9, 2  ;;  %v3038_v45 = vrot.slane %v3001_v9, 4  ;;  %v5358_v9 = vld [vmem:[%s6943_s5 + $0x80] ss:$16 sps:$4 sm:$0xff]  }
 0x2cb   : > { %v3035_v58 = vsel %vm3014_vm0, %v3033_v62, %v3034_v12  ;;  %v5363_v62 = vld [vmem:[%s6943_s5 + $0xa4] ss:$16 sps:$4 sm:$0xff]   ;;  %v5361_v12 = vld [vmem:[%s6943_s5 + $0xa0] ss:$16 sps:$4 sm:$0xff]  }
 0x2cc   : > { %v3005_v15 = vpop.f32.mrb[96].mxu1  ;;  %v3052_v14 = vadd.f32 %v5529_v27, %v3035_v58  ;;  %v5366_v58 = vld [vmem:[%s6943_s5 + $0xc4] ss:$16 sps:$4 sm:$0xff]  }
 0x2cd   : > { %v3006_v52 = vadd.f32 %v3005_v15, %v2933_v18  ;;  %v5123_v29 = vpop.f32.mrb[97].mxu1  ;;  %v5346_v18 = vld [vmem:[%s6943_s5] ss:$16 sps:$4 sm:$0xff]   ;;  %v5369_v27 = vld [vmem:[%s6943_s5 + $0xe4] ss:$16 sps:$4 sm:$0xff]  }
 0x2ce   : > { %v3008_v19 = vpop.f32.mrb[98].mxu1  ;;  %3067 = vadd.xlane.f32.xlu1 %v3052_v14  ;;  %v5364_v15 = vld [vmem:[%s6943_s5 + $0xc0] ss:$16 sps:$4 sm:$0xff]   ;;  %v5372_v29 = vld [vmem:[%s6943_s5 + $0xc] ss:$16 sps:$4 sm:$0xff]  }
 0x2cf   : > { %v3039_v50 = vrot.slane %v3006_v52, 4  ;;  %v3009_v8 = vadd.f32 %v3008_v19, %v6380_v30  ;;  %v5124_v55 = vpop.f32.mrb[99].mxu1  ;;  %v3043_v41 = vrot.slane %v3006_v52, 6  ;;  %v5348_v30 = vld [vmem:[%s6943_s5 + $0x4] ss:$16 sps:$4 sm:$0xff]   ;;  %v5648_v52 = vmov 0  }
 0x2d0   : > { %3286 = vmatprep.subr.bf16.mxu0 %v5348_v30  ;;  %3318 = vmatprep.mubr.bf16.mxu0 %v5648_v52  ;;  %v5394_v19 = vld [vmem:[%s6945_s7 + $0x40] sm:$0xff]   ;;  %v5398_v55 = vld [vmem:[%s6945_s7 + $0x50] sm:$0xff]  }
 0x2d1   : > { %v3044_v26 = vrot.slane %v3009_v8, 6  ;;  %v3040_v10 = vsel %vm3020_vm11, %v3038_v45, %v3039_v50  ;;  %3287 = vmatpush1.bf16.msra.mxu0 %v5346_v18  ;;  %v5395_v45 = vld [vmem:[%s6945_s7] sm:$0xff]   ;;  %v5396_v50 = vld [vmem:[%s6945_s7 + $0x48] sm:$0xff]   ;;  %4973 = vmatprep.subr.bf16.mxu1 %v5394_v19 }
 0x2d2   : > { %v3053_v28 = vadd.f32 %v5530_v42, %v3040_v10  ;;  %3288 = vmatprep.subr.bf16.mxu0 %v5351_v33  ;;  %4974 = vmatpush3.bf16.msra.mxu1 %v5395_v45  ;;  %v5397_v8 = vld [vmem:[%s6945_s7 + $0x8] sm:$0xff]  }
 0x2d3   : > { %v3045_v57 = vsel %vm3026_vm1, %v3043_v41, %v3044_v26  ;;  %4975 = vmatprep.subr.bf16.mxu1 %v5396_v50  ;;  %v5399_v41 = vld [vmem:[%s6945_s7 + $0x10] sm:$0xff]   ;;  %v5379_v45 = vld [vmem:[%s6943_s5 + $0x68] ss:$16 sps:$4 sm:$0xff]  }
 0x2d4   : > { %3069 = vadd.xlane.f32.xlu0 %v3053_v28  ;;  %v3054_v2 = vadd.f32 %v5531_v22, %v3045_v57 }
 0x2d5   : > { %3289 = vmatpush1.bf16.msra.mxu0 %v5349_v36 }
 0x2d6   : > { %3071 = vadd.xlane.f32.xlu1 %v3054_v2  ;;  %3290 = vmatprep.subr.bf16.mxu0 %v5354_v32  ;;  %v5370_v32 = vld [vmem:[%s6943_s5 + $0x8] ss:$16 sps:$4 sm:$0xff]  }
 0x2d7   : > { %4976 = vmatpush3.bf16.msra.mxu1 %v5397_v8 }
 0x2d8   : > { %4977 = vmatprep.subr.bf16.mxu1 %v5398_v55  ;;  %v5384_v55 = vld [vmem:[%s6943_s5 + $0x8c] ss:$16 sps:$4 sm:$0xff]  }
 0x2d9   : > { %3291 = vmatpush1.bf16.msra.mxu0 %v5352_v0 }
 0x2db   : > { %4978 = vmatpush3.bf16.msra.mxu1 %v5399_v41  ;;  %v5382_v41 = vld [vmem:[%s6943_s5 + $0x88] ss:$16 sps:$4 sm:$0xff]  }
 0x33e   : > { %v3058_v39 = vpop.xlane.xlu0 %3057 }
 0x33f   : > { %v3074_v23 = vmul.f32 0.0078125, %v3058_v39 }
 0x341   : > { %v6409_v24 = vsub.f32 %v6384_v17, %v3074_v23 }
 0x343   : > { %v3090_v31 = vmul.f32 %v6409_v24, %v6409_v24 }
 0x345   : > { %3098 = vadd.xlane.f32.xlu0 %v3090_v31 }
 0x349   : > { %v3060_v3 = vpop.xlane.xlu0 %3059 }
 0x34a   : > { %v3075_v51 = vmul.f32 0.0078125, %v3060_v3 }
 0x34b   : > { %v3062_v13 = vpop.xlane.xlu1 %3061 }
 0x34c   : > { %v6414_v20 = vsub.f32 %v6389_v44, %v3075_v51  ;;  %v3076_v35 = vmul.f32 0.0078125, %v3062_v13 }
 0x34e   : > { %v6416_v34 = vsub.f32 %v3049_v63, %v3076_v35  ;;  %v3091_v49 = vmul.f32 %v6414_v20, %v6414_v20 }
 0x350   : > { %3100 = vadd.xlane.f32.xlu1 %v3091_v49  ;;  %v3066_v11 = vpop.xlane.xlu0 %3065  ;;  %v3092_v17 = vmul.f32 %v6416_v34, %v6416_v34  ;;  %v6510_v49 = vld [vmem:[%s6941_s3] ss:$0 sm:$0xff] }
 0x351   : > { %v3078_v61 = vmul.f32 0.0078125, %v3066_v11  ;;  %v3064_v38 = vpop.xlane.xlu1 %3063 }
 0x352   : > { %v3077_v6 = vmul.f32 0.0078125, %v3064_v38  ;;  %3102 = vadd.xlane.f32.xlu0 %v3092_v17 }
 0x353   : > { %v6422_v7 = vsub.f32 %v3051_v37, %v3078_v61  ;;  %v5357_v37 = vld [vmem:[%s6943_s5 + $0x64] ss:$16 sps:$4 sm:$0xff]  }
 0x354   : > { %v6424_v43 = vsub.f32 %v3050_v40, %v3077_v6  ;;  %3292 = vmatprep.subr.bf16.mxu0 %v5357_v37 }
 0x355   : > { %v3094_v44 = vmul.f32 %v6422_v7, %v6422_v7  ;;  %3293 = vmatpush1.bf16.msra.mxu0 %v5355_v53  ;;  %v5373_v53 = vld [vmem:[%s6943_s5 + $0x28] ss:$16 sps:$4 sm:$0xff]  }
 0x356   : > { %v3093_v48 = vmul.f32 %v6424_v43, %v6424_v43  ;;  %3294 = vmatprep.subr.bf16.mxu0 %v5360_v25  ;;  %v5378_v25 = vld [vmem:[%s6943_s5 + $0x4c] ss:$16 sps:$4 sm:$0xff]  }
 0x357   : > { %3106 = vadd.xlane.f32.xlu0 %v3094_v44  ;;  %v6517_v44 = vld [vmem:[%s6942_s4] ss:$0 sm:$0xff] }
 0x358   : > { %3104 = vadd.xlane.f32.xlu1 %v3093_v48 }
 0x359   : > { %3295 = vmatpush1.bf16.msra.mxu0 %v5358_v9 }
 0x35a   : > { %3296 = vmatprep.subr.bf16.mxu0 %v5363_v62 }
 0x35b   : > { %v3068_v63 = vpop.xlane.xlu1 %3067 }
 0x35c   : > { %v3079_v54 = vmul.f32 0.0078125, %v3068_v63 }
 0x35d   : > { %3297 = vmatpush1.bf16.msra.mxu0 %v5361_v12 }
 0x35e   : > { %v6436_v16 = vsub.f32 %v3052_v14, %v3079_v54  ;;  %3298 = vmatprep.subr.bf16.mxu0 %v5366_v58  ;;  %v5367_v14 = vld [vmem:[%s6943_s5 + $0xe0] ss:$16 sps:$4 sm:$0xff]  }
 0x360   : > { %v3095_v59 = vmul.f32 %v6436_v16, %v6436_v16 }
 0x361   : > { %v3070_v60 = vpop.xlane.xlu0 %3069  ;;  %3299 = vmatpush1.bf16.msra.mxu0 %v5364_v15  ;;  %v5376_v15 = vld [vmem:[%s6943_s5 + $0x48] ss:$16 sps:$4 sm:$0xff]  }
 0x362   : > { %v3080_v21 = vmul.f32 0.0078125, %v3070_v60  ;;  %3108 = vadd.xlane.f32.xlu1 %v3095_v59  ;;  %3300 = vmatprep.subr.bf16.mxu0 %v5369_v27  ;;  %v5375_v59 = vld [vmem:[%s6943_s5 + $0x2c] ss:$16 sps:$4 sm:$0xff]  }
 0x363   : > { %v3072_v47 = vpop.xlane.xlu1 %3071 }
 0x364   : > { %v6452_v40 = vsub.f32 %v3053_v28, %v3080_v21  ;;  %v3081_v46 = vmul.f32 0.0078125, %v3072_v47 }
 0x365   : > { %3301 = vmatpush1.bf16.msra.mxu0 %v5367_v14  ;;  %v5381_v14 = vld [vmem:[%s6943_s5 + $0x6c] ss:$16 sps:$4 sm:$0xff]  }
 0x366   : > { %v6454_v56 = vsub.f32 %v3054_v2, %v3081_v46  ;;  %v3096_v4 = vmul.f32 %v6452_v40, %v6452_v40  ;;  %3756 = vmatprep.subr.bf16.mxu0 %v5372_v29 }
 0x368   : > { %3110 = vadd.xlane.f32.xlu0 %v3096_v4  ;;  %v3097_v5 = vmul.f32 %v6454_v56, %v6454_v56 }
 0x36a   : > { %3112 = vadd.xlane.f32.xlu1 %v3097_v5 }
 0x3d2   : > { %v3099_v26 = vpop.xlane.xlu0 %3098 }
 0x3d3   : > { %v3114_v10 = vmul.f32 0.0078125, %v3099_v26 }
 0x3d5   : > { %v3122_v42 = vadd.f32 1e-06, %v3114_v10 }
 0x3d7   : > { %5426 = vrsqrt.f32 %v3122_v42 }
 0x3dd   : > { %v3101_v28 = vpop.xlane.xlu1 %3100 }
 0x3de   : > { %v3115_v57 = vmul.f32 0.0078125, %v3101_v28 }
 0x3df   : > { %v3103_v22 = vpop.xlane.xlu0 %3102 }
 0x3e0   : > { %v3123_v2 = vadd.f32 1e-06, %v3115_v57  ;;  %v3116_v18 = vmul.f32 0.0078125, %v3103_v22 }
 0x3e1   : > { %v5427_v31 = vpop.eup %5426 }
 0x3e2   : > { %5428 = vrsqrt.f32 %v3123_v2  ;;  %v3124_v30 = vadd.f32 1e-06, %v3116_v18  ;;  %v3138_v35 = vmul.f32 %v5427_v31, %v6409_v24  ;;  %v5385_v2 = vld [vmem:[%s6943_s5 + $0xa8] ss:$16 sps:$4 sm:$0xff]  }
 0x3e4   : > { %5430 = vrsqrt.f32 %v3124_v30  ;;  %v3107_v39 = vpop.xlane.xlu0 %3106  ;;  %v3152_v61 = vmul.f32 %v6510_v49, %v3138_v35  ;;  %v5400_v35 = vld [vmem:[%s6945_s7 + $0x58] sm:$0xff]  }
 0x3e5   : > { %v3105_v23 = vpop.xlane.xlu1 %3104  ;;  %v3118_v3 = vmul.f32 0.0078125, %v3107_v39  ;;  %v5390_v39 = vld [vmem:[%s6943_s5 + $0xcc] ss:$16 sps:$4 sm:$0xff]   ;;  %4979 = vmatprep.subr.bf16.mxu1 %v5400_v35 }
 0x3e6   : > { %v3117_v51 = vmul.f32 0.0078125, %v3105_v23  ;;  %v6521_v63 = vadd.f32 %v6517_v44, %v3152_v61  ;;  %v5388_v23 = vld [vmem:[%s6943_s5 + $0xc8] ss:$16 sps:$4 sm:$0xff]  }
 0x3e7   : > { %v3126_v11 = vadd.f32 1e-06, %v3118_v3  ;;  %v5393_v3 = vld [vmem:[%s6943_s5 + $0xec] ss:$16 sps:$4 sm:$0xff]  }
 0x3e8   : > { %v3125_v13 = vadd.f32 1e-06, %v3117_v51  ;;  %v5405_v61 = vld [vmem:[%s6945_s7 + $0x28] sm:$0xff]  }
 0x3ea   : > { %5432 = vrsqrt.f32 %v3125_v13  ;;  %v5391_v13 = vld [vmem:[%s6943_s5 + $0xe8] ss:$16 sps:$4 sm:$0xff]  }
 0x3eb   : > { %5434 = vrsqrt.f32 %v3126_v11  ;;  %v5402_v11 = vld [vmem:[%s6945_s7 + $0x60] sm:$0xff]  }
 0x3ec   : > { %v5429_v17 = vpop.eup %5428 }
 0x3ed   : > { %v3139_v38 = vmul.f32 %v5429_v17, %v6414_v20  ;;  %v5403_v17 = vld [vmem:[%s6945_s7 + $0x20] sm:$0xff]  }
 0x3ee   : > { %v5431_v6 = vpop.eup %5430 }
 0x3ef   : > { %v3153_v24 = vmul.f32 %v6510_v49, %v3139_v38  ;;  %v3109_v48 = vpop.xlane.xlu1 %3108  ;;  %v3140_v54 = vmul.f32 %v5431_v6, %v6416_v34  ;;  %v5406_v38 = vld [vmem:[%s6945_s7 + $0x70] sm:$0xff]  }
 0x3f0   : > { %v3119_v33 = vmul.f32 0.0078125, %v3109_v48  ;;  %v5407_v6 = vld [vmem:[%s6945_s7 + $0x30] sm:$0xff]   ;;  %v5410_v48 = vld [vmem:[%s6945_s7 + $0xc0] sm:$0xff]  }
 0x3f1   : > { %v6524_v36 = vadd.f32 %v6517_v44, %v3153_v24  ;;  %v3154_v37 = vmul.f32 %v6510_v49, %v3140_v54  ;;  %v5409_v24 = vld [vmem:[%s6945_s7 + $0x38] sm:$0xff]   ;;  %v3194_v54 = vld [vmem:[%s6944_s6] sm:$0x3] }
 0x3f2   : > { %v3127_v20 = vadd.f32 1e-06, %v3119_v33  ;;  %v3198_v33 = vsub.s32 0, %v5901_v1 }
 0x3f3   : > { %v6532_v0 = vpack.c.bf16 %v6524_v36, %v6521_v63  ;;  %v6549_v62 = vadd.f32 %v6517_v44, %v3154_v37 }
 0x3f4   : > { %v5433_v60 = vpop.eup %5432  ;;  %5436 = vrsqrt.f32 %v3127_v20  ;;  %v3202_v20 = vsub.s32 1, %v5901_v1 }
 0x3f5   : > { %3319 = vmatmul.mubr.bf16.vlgmr.msra.gmra.mrb[100].mxu0 %v6532_v0  ;;  %v3111_v21 = vpop.xlane.xlu0 %3110  ;;  %v3141_v34 = vmul.f32 %v5433_v60, %v6424_v43  ;;  %v5435_v9 = vpop.eup %5434 }
 0x3f6   : > { %v3120_v47 = vmul.f32 0.0078125, %v3111_v21  ;;  %3757 = vmatpush1.bf16.msra.mxu0 %v5370_v32  ;;  %3328 = vmatprep.mubr.bf16.mxu0 %v5648_v52  ;;  %v3142_v29 = vmul.f32 %v5435_v9, %v6422_v7  ;;  %v6660_v32 = vrot.slane %v3194_v54, %v3198_v33 }
 0x3f7   : > { %v3113_v46 = vpop.xlane.xlu1 %3112  ;;  %3758 = vmatprep.subr.bf16.mxu0 %v5375_v59  ;;  %v3155_v4 = vmul.f32 %v6510_v49, %v3141_v34 }
 0x3f8   : > { %v3128_v43 = vadd.f32 1e-06, %v3120_v47  ;;  %v3121_v5 = vmul.f32 0.0078125, %v3113_v46  ;;  %v3156_v8 = vmul.f32 %v6510_v49, %v3142_v29 }
 0x3f9   : > { %v6552_v12 = vadd.f32 %v6517_v44, %v3155_v4 }
 0x3fa   : > { %5438 = vrsqrt.f32 %v3128_v43  ;;  %v3129_v58 = vadd.f32 1e-06, %v3121_v5  ;;  %3759 = vmatpush1.bf16.msra.mxu0 %v5373_v53  ;;  %v6577_v26 = vadd.f32 %v6517_v44, %v3156_v8 }
 0x3fb   : > { %v3175_v27 = vpack.c.bf16 %v6552_v12, %v6549_v62  ;;  %3760 = vmatprep.subr.bf16.mxu0 %v5378_v25 }
 0x3fc   : > { %5440 = vrsqrt.f32 %v3129_v58 }
 0x3fd   : > { %3329 = vmatmul.mubr.bf16.gmra.mrb[104].mxu0 %v3175_v27 }
 0x3fe   : > { %v5437_v19 = vpop.eup %5436  ;;  %3761 = vmatpush1.bf16.msra.mxu0 %v5376_v15  ;;  %3338 = vmatprep.mubr.bf16.mxu0 %v5648_v52 }
 0x3ff   : > { %3762 = vmatprep.subr.bf16.mxu0 %v5381_v14  ;;  %v3143_v50 = vmul.f32 %v5437_v19, %v6436_v16  ;;  %v5387_v16 = vld [vmem:[%s6943_s5 + $0xac] ss:$16 sps:$4 sm:$0xff]  }
 0x401   : > { %v3157_v7 = vmul.f32 %v6510_v49, %v3143_v50 }
 0x402   : > { %3763 = vmatpush1.bf16.msra.mxu0 %v5379_v45 }
 0x403   : > { %v6580_v10 = vadd.f32 %v6517_v44, %v3157_v7  ;;  %3764 = vmatprep.subr.bf16.mxu0 %v5384_v55 }
 0x404   : > { %v5439_v42 = vpop.eup %5438 }
 0x405   : > { %v3176_v28 = vpack.c.bf16 %v6580_v10, %v6577_v26  ;;  %v3144_v57 = vmul.f32 %v5439_v42, %v6452_v40 }
 0x406   : > { %v5441_v22 = vpop.eup %5440  ;;  %3765 = vmatpush1.bf16.msra.mxu0 %v5382_v41 }
 0x407   : > { %3339 = vmatmul.mubr.bf16.gmra.mrb[108].mxu0 %v3176_v28  ;;  %3766 = vmatprep.subr.bf16.mxu0 %v5387_v16  ;;  %v3145_v18 = vmul.f32 %v5441_v22, %v6454_v56  ;;  %v3158_v30 = vmul.f32 %v6510_v49, %v3144_v57 }
 0x408   : > { %3348 = vmatprep.mubr.bf16.mxu0 %v5648_v52 }
 0x409   : > { %v3159_v40 = vmul.f32 %v6510_v49, %v3145_v18  ;;  %v6602_v31 = vadd.f32 %v6517_v44, %v3158_v30  ;;  %v5401_v49 = vld [vmem:[%s6945_s7 + $0x18] sm:$0xff]  }
 0x40a   : > { %3767 = vmatpush1.bf16.msra.mxu0 %v5385_v2  ;;  %4980 = vmatpush3.bf16.msra.mxu1 %v5401_v49 }
 0x40b   : > { %v6605_v56 = vadd.f32 %v6517_v44, %v3159_v40  ;;  %3768 = vmatprep.subr.bf16.mxu0 %v5390_v39  ;;  %4981 = vmatprep.subr.bf16.mxu1 %v5402_v11  ;;  %v5408_v44 = vld [vmem:[%s6945_s7 + $0x78] sm:$0xff]  }
 0x40d   : > { %v3177_v51 = vpack.c.bf16 %v6605_v56, %v6602_v31 }
 0x40e   : > { %3769 = vmatpush1.bf16.msra.mxu0 %v5388_v23  ;;  %4982 = vmatpush3.bf16.msra.mxu1 %v5403_v17 }
 0x40f   : > { %3349 = vmatmul.mubr.bf16.gmra.mrb[112].mxu0 %v3177_v51  ;;  %3770 = vmatprep.subr.bf16.mxu0 %v5393_v3 }
 0x410   : > { %3788 = vmatprep.mubr.bf16.mxu0 %v5648_v52 }
 0x412   : > { %3771 = vmatpush1.bf16.msra.mxu0 %v5391_v13 }
 0x417   : > { %3789 = vmatmul.mubr.bf16.vlgmr.msra.gmra.mrb[116].mxu0 %v6532_v0  ;;  %v6664_v0 = vrot.slane %v3194_v54, %v3202_v20 }
 0x418   : > { %3798 = vmatprep.mubr.bf16.mxu0 %v5648_v52 }
 0x41f   : > { %3799 = vmatmul.mubr.bf16.gmra.mrb[120].mxu0 %v3175_v27 }
 0x420   : > { %3808 = vmatprep.mubr.bf16.mxu0 %v5648_v52 }
 0x427   : > { %3809 = vmatmul.mubr.bf16.gmra.mrb[124].mxu0 %v3176_v28 }
 0x428   : > { %3818 = vmatprep.mubr.bf16.mxu0 %v5648_v52  ;;  %v5404_v52 = vld [vmem:[%s6945_s7 + $0x68] sm:$0xff]  }
 0x429   : > { %4983 = vmatprep.subr.bf16.mxu1 %v5404_v52 }
 0x42a   : > { %4984 = vmatpush3.bf16.msra.mxu1 %v5405_v61 }
 0x42b   : > { %4985 = vmatprep.subr.bf16.mxu1 %v5406_v38 }
 0x42e   : > { %4986 = vmatpush3.bf16.msra.mxu1 %v5407_v6 }
 0x42f   : > { %3819 = vmatmul.mubr.bf16.gmra.mrb[128].mxu0 %v3177_v51  ;;  %4987 = vmatprep.subr.bf16.mxu1 %v5408_v44 }
 0x432   : > { %4988 = vmatpush3.bf16.msra.mxu1 %v5409_v24 }
 0x433   : > { %5013 = vmatprep.subr.bf16.mxu1 %v5410_v48 }
 0x4c8   : > { %v3320_v59 = vpop.f32.mrb[100].mxu0 }
 0x4c9   : > { %v3321_v60 = vadd.f32 %v3320_v59, %v6660_v32  ;;  %v3322_v21 = vpop.f32.mrb[101].mxu0 }
 0x4ca   : > { %v3323_v34 = vadd.f32 %v3322_v21, %v6664_v0  ;;  %v3324_v37 = vpop.f32.mrb[102].mxu0 }
 0x4cb   : > { %v3375_v47 = vmul.f32 0.70710677, %v3321_v60  ;;  %v3325_v53 = vadd.f32 %v3324_v37, %v6660_v32  ;;  %v3326_v46 = vpop.f32.mrb[103].mxu0  ;;  %v3359_v2 = vmul.f32 0.5, %v3321_v60 }
 0x4cc   : > { %v3376_v4 = vmul.f32 0.70710677, %v3323_v34  ;;  %v3327_v25 = vadd.f32 %v3326_v46, %v6664_v0  ;;  %v3360_v40 = vmul.f32 0.5, %v3323_v34  ;;  %v5411_v34 = vld [vmem:[%s6945_s7 + $0x80] sm:$0xff]   ;;  %v5412_v46 = vld [vmem:[%s6945_s7 + $0xc8] sm:$0xff]  }
 0x4cd   : > { %5442 = verf.f32 %v3375_v47  ;;  %v3377_v9 = vmul.f32 0.70710677, %v3325_v53  ;;  %v3361_v18 = vmul.f32 0.5, %v3325_v53 }
 0x4ce   : > { %5444 = verf.f32 %v3376_v4  ;;  %v3378_v43 = vmul.f32 0.70710677, %v3327_v25  ;;  %v3362_v23 = vmul.f32 0.5, %v3327_v25 }
 0x4cf   : > { %5446 = verf.f32 %v3377_v9 }
 0x4d0   : > { %5448 = verf.f32 %v3378_v43  ;;  %v3330_v5 = vpop.f32.mrb[104].mxu0 }
 0x4d1   : > { %v3331_v58 = vadd.f32 %v3330_v5, %v6660_v32  ;;  %v3332_v15 = vpop.f32.mrb[105].mxu0 }
 0x4d2   : > { %v3333_v27 = vadd.f32 %v3332_v15, %v6664_v0  ;;  %v3334_v14 = vpop.f32.mrb[106].mxu0 }
 0x4d3   : > { %v3379_v29 = vmul.f32 0.70710677, %v3331_v58  ;;  %v3335_v19 = vadd.f32 %v3334_v14, %v6660_v32  ;;  %v3336_v45 = vpop.f32.mrb[107].mxu0  ;;  %v3363_v43 = vmul.f32 0.5, %v3331_v58 }
 0x4d4   : > { %v3380_v50 = vmul.f32 0.70710677, %v3333_v27  ;;  %v3337_v8 = vadd.f32 %v3336_v45, %v6664_v0 }
 0x4d5   : > { %5450 = verf.f32 %v3379_v29  ;;  %v3381_v55 = vmul.f32 0.70710677, %v3335_v19  ;;  %v3365_v5 = vmul.f32 0.5, %v3335_v19  ;;  %v3364_v29 = vmul.f32 0.5, %v3333_v27  ;;  %v3664_v27 = vld [vmem:[%s6944_s6 + $0x2] sm:$0x3] }
 0x4d6   : > { %5452 = verf.f32 %v3380_v50  ;;  %v3382_v7 = vmul.f32 0.70710677, %v3337_v8  ;;  %v3366_v45 = vmul.f32 0.5, %v3337_v8  ;;  %v5414_v8 = vld [vmem:[%s6945_s7 + $0xd0] sm:$0xff]  }
 0x4d7   : > { %v5443_v41 = vpop.eup %5442  ;;  %5454 = verf.f32 %v3381_v55 }
 0x4d8   : > { %v5445_v16 = vpop.eup %5444  ;;  %v3407_v42 = vadd.f32 1.0, %v5443_v41  ;;  %5456 = verf.f32 %v3382_v7  ;;  %v5413_v41 = vld [vmem:[%s6945_s7 + $0x88] sm:$0xff]  }
 0x4d9   : > { %v5447_v28 = vpop.eup %5446  ;;  %v3408_v57 = vadd.f32 1.0, %v5445_v16 }
 0x4da   : > { %v5449_v22 = vpop.eup %5448  ;;  %v3409_v30 = vadd.f32 1.0, %v5447_v28  ;;  %v3340_v39 = vpop.f32.mrb[108].mxu0  ;;  %v3423_v35 = vmul.f32 %v3407_v42, %v3359_v2 }
 0x4db   : > { %v3410_v3 = vadd.f32 1.0, %v5449_v22  ;;  %v6675_v51 = vadd.f32 %v3340_v39, %v6660_v32  ;;  %v3342_v13 = vpop.f32.mrb[109].mxu0  ;;  %v3424_v52 = vmul.f32 %v3408_v57, %v3360_v40 }
 0x4dc   : > { %v3425_v49 = vmul.f32 %v3409_v30, %v3361_v18  ;;  %v6678_v11 = vadd.f32 %v3342_v13, %v6664_v0  ;;  %v3344_v17 = vpop.f32.mrb[110].mxu0  ;;  %v6722_v13 = vrot.slane %v3664_v27, %v3198_v33 }
 0x4dd   : > { %v3426_v61 = vmul.f32 %v3410_v3, %v3362_v23  ;;  %v3383_v38 = vmul.f32 0.70710677, %v6675_v51  ;;  %v6682_v6 = vadd.f32 %v3344_v17, %v6660_v32  ;;  %v3346_v44 = vpop.f32.mrb[111].mxu0 }
 0x4de   : > { %v3439_v24 = vpack.c.bf16 %v3425_v49, %v3423_v35  ;;  %v3384_v48 = vmul.f32 0.70710677, %v6678_v11  ;;  %v6686_v54 = vadd.f32 %v3346_v44, %v6664_v0  ;;  %v5416_v49 = vld [vmem:[%s6945_s7 + $0xd8] sm:$0xff]  }
 0x4df   : > { %v5451_v59 = vpop.eup %5450  ;;  %5458 = verf.f32 %v3383_v38  ;;  %v3385_v60 = vmul.f32 0.70710677, %v6682_v6  ;;  %v3440_v21 = vpack.c.bf16 %v3426_v61, %v3424_v52 }
 0x4e0   : > { %v5453_v37 = vpop.eup %5452  ;;  %v3411_v47 = vadd.f32 1.0, %v5451_v59  ;;  %5460 = verf.f32 %v3384_v48  ;;  %v3386_v53 = vmul.f32 0.70710677, %v6686_v54  ;;  %v3367_v59 = vmul.f32 0.5, %v6675_v51 }
 0x4e1   : > { %v5455_v4 = vpop.eup %5454  ;;  %v3412_v25 = vadd.f32 1.0, %v5453_v37  ;;  %5462 = verf.f32 %v3385_v60  ;;  %3607 = vmatprep.mubr.bf16.mxu1 %v3440_v21  ;;  %v3369_v60 = vmul.f32 0.5, %v6682_v6 }
 0x4e2   : > { %v5457_v9 = vpop.eup %5456  ;;  %v3413_v15 = vadd.f32 1.0, %v5455_v4  ;;  %5464 = verf.f32 %v3386_v53  ;;  %v3350_v14 = vpop.f32.mrb[112].mxu0  ;;  %3608 = vmatmul.mubr.bf16.vlgmr.msra.gmra.mrb[100].mxu1 %v3439_v24  ;;  %v3427_v16 = vmul.f32 %v3411_v47, %v3363_v43  ;;  %v5418_v47 = vld [vmem:[%s6945_s7 + $0xe0] sm:$0xff]   ;;  %v3368_v53 = vmul.f32 0.5, %v6678_v11 }
 0x4e3   : > { %v3414_v50 = vadd.f32 1.0, %v5457_v9  ;;  %v6697_v55 = vadd.f32 %v3350_v14, %v6660_v32  ;;  %v3352_v7 = vpop.f32.mrb[113].mxu0  ;;  %5014 = vmatpush3.bf16.msra.mxu1 %v5411_v34  ;;  %v3428_v28 = vmul.f32 %v3412_v25, %v3364_v29  ;;  %v5419_v11 = vld [vmem:[%s6945_s7 + $0xa0] sm:$0xff]  }
 0x4e4   : > { %v3429_v42 = vmul.f32 %v3413_v15, %v3365_v5  ;;  %v6703_v58 = vadd.f32 %v3352_v7, %v6664_v0  ;;  %v3354_v19 = vpop.f32.mrb[114].mxu0  ;;  %5015 = vmatprep.subr.bf16.mxu1 %v5412_v46  ;;  %v3370_v46 = vmul.f32 0.5, %v6686_v54 }
 0x4e5   : > { %v3430_v57 = vmul.f32 %v3414_v50, %v3366_v45  ;;  %v3387_v22 = vmul.f32 0.70710677, %v6697_v55  ;;  %v6713_v2 = vadd.f32 %v3354_v19, %v6660_v32  ;;  %v3356_v18 = vpop.f32.mrb[115].mxu0  ;;  %v5415_v32 = vld [vmem:[%s6945_s7 + $0x90] sm:$0xff]   ;;  %v5420_v50 = vld [vmem:[%s6945_s7 + $0xe8] sm:$0xff]  }
 0x4e6   : > { %v3388_v30 = vmul.f32 0.70710677, %v6703_v58  ;;  %v6717_v39 = vadd.f32 %v3356_v18, %v6664_v0  ;;  %v3441_v40 = vpack.c.bf16 %v3429_v42, %v3427_v16  ;;  %v6730_v0 = vrot.slane %v3664_v27, %v3202_v20  ;;  %v5417_v20 = vld [vmem:[%s6945_s7 + $0x98] sm:$0xff]   ;;  %v5421_v18 = vld [vmem:[%s6945_s7 + $0xa8] sm:$0xff]  }
 0x4e7   : > { %5466 = verf.f32 %v3387_v22  ;;  %v3389_v23 = vmul.f32 0.70710677, %v6713_v2  ;;  %v3442_v3 = vpack.c.bf16 %v3430_v57, %v3428_v28  ;;  %5016 = vmatpush3.bf16.msra.mxu1 %v5413_v41 }
 0x4e8   : > { %5468 = verf.f32 %v3388_v30  ;;  %v3390_v35 = vmul.f32 0.70710677, %v6717_v39  ;;  %5017 = vmatprep.subr.bf16.mxu1 %v5414_v8 }
 0x4e9   : > { %v5459_v17 = vpop.eup %5458  ;;  %5470 = verf.f32 %v3389_v23  ;;  %3615 = vmatprep.mubr.bf16.mxu1 %v3442_v3  ;;  %v3373_v23 = vmul.f32 0.5, %v6713_v2 }
 0x4ea   : > { %v5461_v33 = vpop.eup %5460  ;;  %v3415_v52 = vadd.f32 1.0, %v5459_v17  ;;  %5472 = verf.f32 %v3390_v35  ;;  %3616 = vmatmul.mubr.bf16.gmra.mrb[104].mxu1 %v3441_v40  ;;  %v3790_v61 = vpop.f32.mrb[116].mxu0  ;;  %v3371_v40 = vmul.f32 0.5, %v6697_v55  ;;  %v3372_v17 = vmul.f32 0.5, %v6703_v58  ;;  %v5423_v58 = vld [vmem:[%s6945_s7 + $0xb0] sm:$0xff]  }
 0x4eb   : > { %v5463_v38 = vpop.eup %5462  ;;  %v3416_v44 = vadd.f32 1.0, %v5461_v33  ;;  %v6736_v24 = vadd.f32 %v3790_v61, %v6722_v13  ;;  %v3792_v1 = vpop.f32.mrb[117].mxu0  ;;  %5018 = vmatpush3.bf16.msra.mxu1 %v5415_v32  ;;  %v3374_v33 = vmul.f32 0.5, %v6717_v39 }
 0x4ec   : > { %v5465_v48 = vpop.eup %5464  ;;  %v3417_v21 = vadd.f32 1.0, %v5463_v38  ;;  %v6744_v34 = vadd.f32 %v3792_v1, %v6730_v0  ;;  %v3794_v37 = vpop.f32.mrb[118].mxu0  ;;  %5019 = vmatprep.subr.bf16.mxu1 %v5416_v49  ;;  %v3431_v9 = vmul.f32 %v3415_v52, %v3367_v59  ;;  %v5422_v49 = vld [vmem:[%s6945_s7 + $0xf0] sm:$0xff]  }
 0x4ed   : > { %v3418_v4 = vadd.f32 1.0, %v5465_v48  ;;  %v3845_v25 = vmul.f32 0.70710677, %v6736_v24  ;;  %v3796_v51 = vpop.f32.mrb[119].mxu0  ;;  %v6754_v5 = vadd.f32 %v3794_v37, %v6722_v13  ;;  %v3432_v15 = vmul.f32 %v3416_v44, %v3368_v53 }
 0x4ee   : > { %v3433_v6 = vmul.f32 %v3417_v21, %v3369_v60  ;;  %v3846_v43 = vmul.f32 0.70710677, %v6744_v34  ;;  %v6757_v29 = vadd.f32 %v3796_v51, %v6730_v0  ;;  %v5424_v21 = vld [vmem:[%s6945_s7 + $0xf8] sm:$0xff]  }
 0x4ef   : > { %v3434_v14 = vmul.f32 %v3418_v4, %v3370_v46  ;;  %5474 = verf.f32 %v3845_v25  ;;  %5020 = vmatpush3.bf16.msra.mxu1 %v5417_v20  ;;  %v3847_v54 = vmul.f32 0.70710677, %v6754_v5 }
 0x4f0   : > { %5476 = verf.f32 %v3846_v43  ;;  %v3443_v45 = vpack.c.bf16 %v3433_v6, %v3431_v9  ;;  %5021 = vmatprep.subr.bf16.mxu1 %v5418_v47  ;;  %v3848_v41 = vmul.f32 0.70710677, %v6757_v29  ;;  %v5425_v6 = vld [vmem:[%s6945_s7 + $0xb8] sm:$0xff]  }
 0x4f1   : > { %v5467_v7 = vpop.eup %5466  ;;  %v3444_v16 = vpack.c.bf16 %v3434_v14, %v3432_v15  ;;  %5478 = verf.f32 %v3847_v54  ;;  %v3829_v15 = vmul.f32 0.5, %v6736_v24 }
 0x4f2   : > { %v5469_v42 = vpop.eup %5468  ;;  %v3419_v19 = vadd.f32 1.0, %v5467_v7  ;;  %v3800_v27 = vpop.f32.mrb[120].mxu0  ;;  %5480 = verf.f32 %v3848_v41  ;;  %v3831_v7 = vmul.f32 0.5, %v6754_v5 }
 0x4f3   : > { %v5471_v8 = vpop.eup %5470  ;;  %v3420_v28 = vadd.f32 1.0, %v5469_v42  ;;  %v6768_v57 = vadd.f32 %v3800_v27, %v6722_v13  ;;  %3623 = vmatprep.mubr.bf16.mxu1 %v3444_v16  ;;  %v3802_v22 = vpop.f32.mrb[121].mxu0  ;;  %5022 = vmatpush3.bf16.msra.mxu1 %v5419_v11 }
 0x4f4   : > { %v5473_v30 = vpop.eup %5472  ;;  %v3421_v3 = vadd.f32 1.0, %v5471_v8  ;;  %v6776_v32 = vadd.f32 %v3802_v22, %v6730_v0  ;;  %3624 = vmatmul.mubr.bf16.gmra.mrb[108].mxu1 %v3443_v45  ;;  %v3804_v35 = vpop.f32.mrb[122].mxu0  ;;  %5023 = vmatprep.subr.bf16.mxu1 %v5420_v50  ;;  %v3435_v2 = vmul.f32 %v3419_v19, %v3371_v40  ;;  %v3830_v50 = vmul.f32 0.5, %v6744_v34 }
 0x4f5   : > { %v3422_v52 = vadd.f32 1.0, %v5473_v30  ;;  %v3849_v55 = vmul.f32 0.70710677, %v6768_v57  ;;  %v3806_v61 = vpop.f32.mrb[123].mxu0  ;;  %v6786_v1 = vadd.f32 %v3804_v35, %v6722_v13  ;;  %v3436_v20 = vmul.f32 %v3420_v28, %v3372_v17 }
 0x4f6   : > { %v3437_v38 = vmul.f32 %v3421_v3, %v3373_v23  ;;  %v3850_v44 = vmul.f32 0.70710677, %v6776_v32  ;;  %v6789_v59 = vadd.f32 %v3806_v61, %v6730_v0  ;;  %v3832_v19 = vmul.f32 0.5, %v6757_v29 }
 0x4f7   : > { %v3438_v48 = vmul.f32 %v3422_v52, %v3374_v33  ;;  %5482 = verf.f32 %v3849_v55  ;;  %5024 = vmatpush3.bf16.msra.mxu1 %v5421_v18  ;;  %v3851_v39 = vmul.f32 0.70710677, %v6786_v1  ;;  %v3833_v61 = vmul.f32 0.5, %v6768_v57 }
 0x4f8   : > { %5484 = verf.f32 %v3850_v44  ;;  %v3445_v60 = vpack.c.bf16 %v3437_v38, %v3435_v2  ;;  %5025 = vmatprep.subr.bf16.mxu1 %v5422_v49  ;;  %v3852_v47 = vmul.f32 0.70710677, %v6789_v59 }
 0x4f9   : > { %v5475_v37 = vpop.eup %5474  ;;  %v3446_v53 = vpack.c.bf16 %v3438_v48, %v3436_v20  ;;  %5486 = verf.f32 %v3851_v39  ;;  %v3834_v48 = vmul.f32 0.5, %v6776_v32 }
 0x4fa   : > { %v5477_v46 = vpop.eup %5476  ;;  %v3810_v4 = vpop.f32.mrb[124].mxu0  ;;  %v3877_v25 = vadd.f32 1.0, %v5475_v37  ;;  %5488 = verf.f32 %v3852_v47  ;;  %v3836_v37 = vmul.f32 0.5, %v6789_v59 }
 0x4fb   : > { %v6800_v51 = vadd.f32 %v3810_v4, %v6722_v13  ;;  %3631 = vmatprep.mubr.bf16.mxu1 %v3446_v53  ;;  %v3812_v9 = vpop.f32.mrb[125].mxu0  ;;  %5026 = vmatpush3.bf16.msra.mxu1 %v5423_v58  ;;  %v5479_v43 = vpop.eup %5478  ;;  %v3878_v14 = vadd.f32 1.0, %v5477_v46  ;;  %v3835_v58 = vmul.f32 0.5, %v6786_v1 }
 0x4fc   : > { %v6807_v11 = vadd.f32 %v3812_v9, %v6730_v0  ;;  %3632 = vmatmul.mubr.bf16.gmra.mrb[112].mxu1 %v3445_v60  ;;  %v3814_v54 = vpop.f32.mrb[126].mxu0  ;;  %5027 = vmatprep.subr.bf16.mxu1 %v5424_v21  ;;  %v5481_v45 = vpop.eup %5480  ;;  %v3879_v41 = vadd.f32 1.0, %v5479_v43  ;;  %v3893_v28 = vmul.f32 %v3877_v25, %v3829_v15 }
 0x4fd   : > { %v3853_v16 = vmul.f32 0.70710677, %v6800_v51  ;;  %v3816_v42 = vpop.f32.mrb[127].mxu0  ;;  %v3880_v27 = vadd.f32 1.0, %v5481_v45  ;;  %v3815_v8 = vadd.f32 %v3814_v54, %v6722_v13  ;;  %v3894_v34 = vmul.f32 %v3878_v14, %v3830_v50 }
 0x4fe   : > { %v3854_v24 = vmul.f32 0.70710677, %v6807_v11  ;;  %v3895_v22 = vmul.f32 %v3879_v41, %v3831_v7  ;;  %v3817_v18 = vadd.f32 %v3816_v42, %v6730_v0  ;;  %v3837_v7 = vmul.f32 0.5, %v6800_v51 }
 0x4ff   : > { %5490 = verf.f32 %v3853_v16  ;;  %5028 = vmatpush3.bf16.msra.mxu1 %v5425_v6  ;;  %v3896_v30 = vmul.f32 %v3880_v27, %v3832_v19  ;;  %v3855_v5 = vmul.f32 0.70710677, %v3815_v8  ;;  %v3839_v41 = vmul.f32 0.5, %v3815_v8 }
 0x500   : > { %5492 = verf.f32 %v3854_v24  ;;  %v3909_v23 = vpack.c.bf16 %v3895_v22, %v3893_v28  ;;  %v3856_v3 = vmul.f32 0.70710677, %v3817_v18  ;;  %v3838_v16 = vmul.f32 0.5, %v6807_v11 }
 0x501   : > { %v5483_v40 = vpop.eup %5482  ;;  %5494 = verf.f32 %v3855_v5  ;;  %v3910_v49 = vpack.c.bf16 %v3896_v30, %v3894_v34  ;;  %v3840_v42 = vmul.f32 0.5, %v3817_v18 }
 0x502   : > { %v5485_v35 = vpop.eup %5484  ;;  %v3820_v29 = vpop.f32.mrb[128].mxu0  ;;  %v3881_v17 = vadd.f32 1.0, %v5483_v40  ;;  %5496 = verf.f32 %v3856_v3 }
 0x503   : > { %v3821_v33 = vadd.f32 %v3820_v29, %v6722_v13  ;;  %v3822_v52 = vpop.f32.mrb[129].mxu0  ;;  %v5487_v55 = vpop.eup %5486  ;;  %v3882_v2 = vadd.f32 1.0, %v5485_v35  ;;  %4077 = vmatprep.mubr.bf16.mxu1 %v3910_v49 }
 0x504   : > { %v3823_v38 = vadd.f32 %v3822_v52, %v6730_v0  ;;  %v3824_v44 = vpop.f32.mrb[130].mxu0  ;;  %v5489_v20 = vpop.eup %5488  ;;  %v3883_v39 = vadd.f32 1.0, %v5487_v55  ;;  %4078 = vmatmul.mubr.bf16.vlgmr.msra.gmra.mrb[116].mxu1 %v3909_v23  ;;  %v3897_v46 = vmul.f32 %v3881_v17, %v3833_v61 }
 0x505   : > { %v3857_v60 = vmul.f32 0.70710677, %v3821_v33  ;;  %v3826_v21 = vpop.f32.mrb[131].mxu0  ;;  %v3884_v47 = vadd.f32 1.0, %v5489_v20  ;;  %v3825_v57 = vadd.f32 %v3824_v44, %v6722_v13  ;;  %v3898_v9 = vmul.f32 %v3882_v2, %v3834_v48 }
 0x506   : > { %v3858_v53 = vmul.f32 0.70710677, %v3823_v38  ;;  %v3899_v4 = vmul.f32 %v3883_v39, %v3835_v58  ;;  %v3827_v25 = vadd.f32 %v3826_v21, %v6730_v0  ;;  %v3841_v8 = vmul.f32 0.5, %v3821_v33 }
 0x507   : > { %5498 = verf.f32 %v3857_v60  ;;  %v3900_v6 = vmul.f32 %v3884_v47, %v3836_v37  ;;  %v3859_v32 = vmul.f32 0.70710677, %v3825_v57  ;;  %v3843_v29 = vmul.f32 0.5, %v3825_v57 }
 0x508   : > { %5500 = verf.f32 %v3858_v53  ;;  %v3860_v43 = vmul.f32 0.70710677, %v3827_v25  ;;  %v3911_v15 = vpack.c.bf16 %v3899_v4, %v3897_v46  ;;  %v3842_v11 = vmul.f32 0.5, %v3823_v38 }
 0x509   : > { %v5491_v1 = vpop.eup %5490  ;;  %5502 = verf.f32 %v3859_v32  ;;  %v3912_v54 = vpack.c.bf16 %v3900_v6, %v3898_v9  ;;  %v3844_v18 = vmul.f32 0.5, %v3827_v25 }
 0x50a   : > { %v5493_v14 = vpop.eup %5492  ;;  %v3885_v59 = vadd.f32 1.0, %v5491_v1  ;;  %5504 = verf.f32 %v3860_v43 }
 0x50b   : > { %v5495_v45 = vpop.eup %5494  ;;  %v3886_v50 = vadd.f32 1.0, %v5493_v14  ;;  %4085 = vmatprep.mubr.bf16.mxu1 %v3912_v54 }
 0x50c   : > { %v5497_v13 = vpop.eup %5496  ;;  %v3887_v0 = vadd.f32 1.0, %v5495_v45  ;;  %4086 = vmatmul.mubr.bf16.gmra.mrb[120].mxu1 %v3911_v15  ;;  %v3901_v27 = vmul.f32 %v3885_v59, %v3837_v7 }
 0x50d   : > { %v3888_v19 = vadd.f32 1.0, %v5497_v13  ;;  %v3902_v28 = vmul.f32 %v3886_v50, %v3838_v16 }
 0x50e   : > { %v3903_v24 = vmul.f32 %v3887_v0, %v3839_v41 }
 0x50f   : > { %v3904_v22 = vmul.f32 %v3888_v19, %v3840_v42  ;;  %v4569_v42 = vld [vmem:[%s6946_s8] ss:$0 sm:$0xff] }
 0x510   : > { %v3913_v30 = vpack.c.bf16 %v3903_v24, %v3901_v27 }
 0x511   : > { %v5499_v34 = vpop.eup %5498  ;;  %v3914_v40 = vpack.c.bf16 %v3904_v22, %v3902_v28 }
 0x512   : > { %v5501_v5 = vpop.eup %5500  ;;  %v3889_v23 = vadd.f32 1.0, %v5499_v34 }
 0x513   : > { %v5503_v3 = vpop.eup %5502  ;;  %v3890_v35 = vadd.f32 1.0, %v5501_v5  ;;  %4093 = vmatprep.mubr.bf16.mxu1 %v3914_v40 }
 0x514   : > { %v5505_v51 = vpop.eup %5504  ;;  %v3891_v49 = vadd.f32 1.0, %v5503_v3  ;;  %4094 = vmatmul.mubr.bf16.gmra.mrb[124].mxu1 %v3913_v30  ;;  %v3905_v52 = vmul.f32 %v3889_v23, %v3841_v8 }
 0x515   : > { %v3892_v17 = vadd.f32 1.0, %v5505_v51  ;;  %v3906_v61 = vmul.f32 %v3890_v35, %v3842_v11 }
 0x516   : > { %v3907_v55 = vmul.f32 %v3891_v49, %v3843_v29 }
 0x517   : > { %v3908_v2 = vmul.f32 %v3892_v17, %v3844_v18 }
 0x518   : > { %v3915_v44 = vpack.c.bf16 %v3907_v55, %v3905_v52 }
 0x519   : > { %v3916_v20 = vpack.c.bf16 %v3908_v2, %v3906_v61 }
 0x51b   : > { %4101 = vmatprep.mubr.bf16.mxu1 %v3916_v20 }
 0x51c   : > { %4102 = vmatmul.mubr.bf16.gmra.mrb[128].mxu1 %v3915_v44 }
 0x5b5   : > { %v4989_v48 = vpop.f32.mrb[100].mxu1 }
 0x5b6   : > { %v4990_v58 = vpop.f32.mrb[101].mxu1 }
 0x5b7   : > { %v4991_v39 = vadd.f32 %v4990_v58, %v4989_v48  ;;  %v4992_v60 = vpop.f32.mrb[102].mxu1 }
 0x5b8   : > { %v4993_v21 = vpop.f32.mrb[103].mxu1 }
 0x5b9   : > { %v4994_v33 = vadd.f32 %v4993_v21, %v4992_v60  ;;  %v3640_v7 = vadd.f32 %v4991_v39, %v6521_v63 }
 0x5bb   : > { %v3641_v19 = vadd.f32 %v4994_v33, %v6524_v36 }
 0x5bd   : > { %v4995_v37 = vpop.f32.mrb[104].mxu1 }
 0x5be   : > { %v4996_v47 = vpop.f32.mrb[105].mxu1 }
 0x5bf   : > { %v4997_v53 = vadd.f32 %v4996_v47, %v4995_v37  ;;  %v4998_v38 = vpop.f32.mrb[106].mxu1 }
 0x5c0   : > { %v4999_v57 = vpop.f32.mrb[107].mxu1 }
 0x5c1   : > { %v5000_v46 = vadd.f32 %v4999_v57, %v4998_v38  ;;  %v3642_v40 = vadd.f32 %v4997_v53, %v6549_v62 }
 0x5c3   : > { %v3643_v35 = vadd.f32 %v5000_v46, %v6552_v12 }
 0x5c7   : > { %v5001_v4 = vpop.f32.mrb[108].mxu1 }
 0x5c8   : > { %v5002_v25 = vpop.f32.mrb[109].mxu1 }
 0x5c9   : > { %v5003_v9 = vadd.f32 %v5002_v25, %v5001_v4  ;;  %v5004_v6 = vpop.f32.mrb[110].mxu1 }
 0x5ca   : > { %v5005_v32 = vpop.f32.mrb[111].mxu1 }
 0x5cb   : > { %v5006_v1 = vadd.f32 %v5005_v32, %v5004_v6  ;;  %v3644_v17 = vadd.f32 %v5003_v9, %v6577_v26 }
 0x5cd   : > { %v3645_v61 = vadd.f32 %v5006_v1, %v6580_v10 }
 0x5cf   : > { %v5007_v43 = vpop.f32.mrb[112].mxu1 }
 0x5d0   : > { %v5008_v15 = vpop.f32.mrb[113].mxu1 }
 0x5d1   : > { %v5009_v14 = vadd.f32 %v5008_v15, %v5007_v43  ;;  %v5010_v54 = vpop.f32.mrb[114].mxu1 }
 0x5d2   : > { %v5011_v59 = vpop.f32.mrb[115].mxu1 }
 0x5d3   : > { %v5012_v45 = vadd.f32 %v5011_v59, %v5010_v54  ;;  %v3646_v60 = vadd.f32 %v5009_v14, %v6602_v31 }
 0x5d5   : > { %v3647_v37 = vadd.f32 %v5012_v45, %v6605_v56 }
 0x5d7   : > { %v5029_v50 = vpop.f32.mrb[116].mxu1 }
 0x5d8   : > { %v5030_v13 = vpop.f32.mrb[117].mxu1 }
 0x5d9   : > { %v5031_v41 = vadd.f32 %v5030_v13, %v5029_v50  ;;  %v5032_v0 = vpop.f32.mrb[118].mxu1 }
 0x5da   : > { %v5033_v16 = vpop.f32.mrb[119].mxu1 }
 0x5db   : > { %v4110_v27 = vadd.f32 %v5031_v41, %v3640_v7  ;;  %v5034_v24 = vadd.f32 %v5033_v16, %v5032_v0 }
 0x5dd   : > { %v4111_v28 = vadd.f32 %v5034_v24, %v3641_v19  ;;  %v4125_v22 = vadd.f32 %v4569_v42, %v4110_v27 }
 0x5df   : > { %v5035_v34 = vpop.f32.mrb[120].mxu1  ;;  %4135 = vadd.xlane.f32.xlu0 %v4125_v22  ;;  %v4126_v30 = vadd.f32 %v4569_v42, %v4111_v28 }
 0x5e0   : > { %v5036_v5 = vpop.f32.mrb[121].mxu1 }
 0x5e1   : > { %v5037_v63 = vadd.f32 %v5036_v5, %v5035_v34  ;;  %v5038_v23 = vpop.f32.mrb[122].mxu1  ;;  %4137 = vadd.xlane.f32.xlu1 %v4126_v30 }
 0x5e2   : > { %v5039_v3 = vpop.f32.mrb[123].mxu1 }
 0x5e3   : > { %v4112_v51 = vadd.f32 %v5037_v63, %v3642_v40  ;;  %v5040_v8 = vadd.f32 %v5039_v3, %v5038_v23 }
 0x5e5   : > { %v4113_v29 = vadd.f32 %v5040_v8, %v3643_v35  ;;  %v4127_v36 = vadd.f32 %v4569_v42, %v4112_v51 }
 0x5e7   : > { %v5041_v49 = vpop.f32.mrb[124].mxu1  ;;  %4139 = vadd.xlane.f32.xlu0 %v4127_v36  ;;  %v4128_v11 = vadd.f32 %v4569_v42, %v4113_v29 }
 0x5e8   : > { %v5042_v18 = vpop.f32.mrb[125].mxu1 }
 0x5e9   : > { %v5043_v52 = vadd.f32 %v5042_v18, %v5041_v49  ;;  %v5044_v55 = vpop.f32.mrb[126].mxu1  ;;  %4141 = vadd.xlane.f32.xlu1 %v4128_v11 }
 0x5ea   : > { %v5045_v62 = vpop.f32.mrb[127].mxu1 }
 0x5eb   : > { %v4114_v2 = vadd.f32 %v5043_v52, %v3644_v17  ;;  %v5046_v44 = vadd.f32 %v5045_v62, %v5044_v55  ;;  %v4570_v62 = vld [vmem:[%s6947_s9] ss:$0 sm:$0xff] }
 0x5ed   : > { %v4115_v20 = vadd.f32 %v5046_v44, %v3645_v61  ;;  %v4129_v12 = vadd.f32 %v4569_v42, %v4114_v2 }
 0x5ef   : > { %v5047_v48 = vpop.f32.mrb[128].mxu1  ;;  %4143 = vadd.xlane.f32.xlu0 %v4129_v12  ;;  %v4130_v58 = vadd.f32 %v4569_v42, %v4115_v20  ;;  %v4571_v20 = vld [vmem:[%s6948_s10] ss:$0 sm:$0xff] }
 0x5f0   : > { %v5048_v39 = vpop.f32.mrb[129].mxu1 }
 0x5f1   : > { %v5049_v21 = vadd.f32 %v5048_v39, %v5047_v48  ;;  %v5050_v33 = vpop.f32.mrb[130].mxu1  ;;  %4145 = vadd.xlane.f32.xlu1 %v4130_v58 }
 0x5f2   : > { %v5051_v26 = vpop.f32.mrb[131].mxu1 }
 0x5f3   : > { %v4116_v47 = vadd.f32 %v5049_v21, %v3646_v60  ;;  %v5052_v53 = vadd.f32 %v5051_v26, %v5050_v33 }
 0x5f5   : > { %v4117_v38 = vadd.f32 %v5052_v53, %v3647_v37  ;;  %v4131_v10 = vadd.f32 %v4569_v42, %v4116_v47 }
 0x5f7   : > { %4147 = vadd.xlane.f32.xlu0 %v4131_v10  ;;  %v4132_v57 = vadd.f32 %v4569_v42, %v4117_v38 }
 0x5f9   : > { %4149 = vadd.xlane.f32.xlu1 %v4132_v57 }
 0x66c   : > { %v4136_v46 = vpop.xlane.xlu0 %4135 }
 0x66d   : > { %v4151_v4 = vmul.f32 0.0078125, %v4136_v46 }
 0x66e   : > { %v4138_v25 = vpop.xlane.xlu1 %4137 }
 0x66f   : > { %v4159_v9 = vsub.f32 %v4125_v22, %v4151_v4  ;;  %v4152_v6 = vmul.f32 0.0078125, %v4138_v25 }
 0x671   : > { %v4160_v32 = vsub.f32 %v4126_v30, %v4152_v6  ;;  %v4167_v31 = vmul.f32 %v4159_v9, %v4159_v9 }
 0x673   : > { %4175 = vadd.xlane.f32.xlu0 %v4167_v31  ;;  %v4168_v1 = vmul.f32 %v4160_v32, %v4160_v32 }
 0x674   : > { %v4140_v43 = vpop.xlane.xlu0 %4139 }
 0x675   : > { %v4153_v15 = vmul.f32 0.0078125, %v4140_v43  ;;  %4177 = vadd.xlane.f32.xlu1 %v4168_v1 }
 0x676   : > { %v4142_v56 = vpop.xlane.xlu1 %4141 }
 0x677   : > { %v6837_v14 = vsub.f32 %v4127_v36, %v4153_v15  ;;  %v4154_v54 = vmul.f32 0.0078125, %v4142_v56 }
 0x679   : > { %v6839_v59 = vsub.f32 %v4128_v11, %v4154_v54  ;;  %v4169_v45 = vmul.f32 %v6837_v14, %v6837_v14 }
 0x67b   : > { %4179 = vadd.xlane.f32.xlu0 %v4169_v45  ;;  %v4170_v50 = vmul.f32 %v6839_v59, %v6839_v59 }
 0x67c   : > { %v4144_v13 = vpop.xlane.xlu0 %4143 }
 0x67d   : > { %v4155_v7 = vmul.f32 0.0078125, %v4144_v13  ;;  %4181 = vadd.xlane.f32.xlu1 %v4170_v50 }
 0x67e   : > { %v4146_v41 = vpop.xlane.xlu1 %4145 }
 0x67f   : > { %v6845_v0 = vsub.f32 %v4129_v12, %v4155_v7  ;;  %v4156_v16 = vmul.f32 0.0078125, %v4146_v41 }
 0x681   : > { %v6847_v42 = vsub.f32 %v4130_v58, %v4156_v16  ;;  %v4171_v19 = vmul.f32 %v6845_v0, %v6845_v0 }
 0x683   : > { %4183 = vadd.xlane.f32.xlu0 %v4171_v19  ;;  %v4172_v27 = vmul.f32 %v6847_v42, %v6847_v42 }
 0x684   : > { %v4148_v24 = vpop.xlane.xlu0 %4147 }
 0x685   : > { %v4157_v28 = vmul.f32 0.0078125, %v4148_v24  ;;  %4185 = vadd.xlane.f32.xlu1 %v4172_v27 }
 0x686   : > { %v4150_v22 = vpop.xlane.xlu1 %4149 }
 0x687   : > { %v6853_v34 = vsub.f32 %v4131_v10, %v4157_v28  ;;  %v4158_v30 = vmul.f32 0.0078125, %v4150_v22 }
 0x689   : > { %v6855_v5 = vsub.f32 %v4132_v57, %v4158_v30  ;;  %v4173_v40 = vmul.f32 %v6853_v34, %v6853_v34 }
 0x68b   : > { %4187 = vadd.xlane.f32.xlu0 %v4173_v40  ;;  %v4174_v63 = vmul.f32 %v6855_v5, %v6855_v5 }
 0x68d   : > { %4189 = vadd.xlane.f32.xlu1 %v4174_v63 }
 0x700   : > { %v4176_v23 = vpop.xlane.xlu0 %4175 }
 0x701   : > { %v4191_v3 = vmul.f32 0.0078125, %v4176_v23 }
 0x702   : > { %v4178_v35 = vpop.xlane.xlu1 %4177 }
 0x703   : > { %v4199_v51 = vadd.f32 1e-06, %v4191_v3  ;;  %v4192_v8 = vmul.f32 0.0078125, %v4178_v35 }
 0x705   : > { %5506 = vrsqrt.f32 %v4199_v51  ;;  %v4200_v29 = vadd.f32 1e-06, %v4192_v8 }
 0x707   : > { %5508 = vrsqrt.f32 %v4200_v29 }
 0x708   : > { %v4180_v36 = vpop.xlane.xlu0 %4179 }
 0x709   : > { %v4193_v49 = vmul.f32 0.0078125, %v4180_v36 }
 0x70a   : > { %v4182_v11 = vpop.xlane.xlu1 %4181 }
 0x70b   : > { %v4201_v18 = vadd.f32 1e-06, %v4193_v49  ;;  %v4194_v17 = vmul.f32 0.0078125, %v4182_v11 }
 0x70d   : > { %5510 = vrsqrt.f32 %v4201_v18  ;;  %v4202_v52 = vadd.f32 1e-06, %v4194_v17 }
 0x70f   : > { %v5507_v55 = vpop.eup %5506  ;;  %5512 = vrsqrt.f32 %v4202_v52 }
 0x710   : > { %v4215_v61 = vmul.f32 %v5507_v55, %v4159_v9  ;;  %v4184_v2 = vpop.xlane.xlu0 %4183 }
 0x711   : > { %v5509_v44 = vpop.eup %5508  ;;  %v4195_v12 = vmul.f32 0.0078125, %v4184_v2 }
 0x712   : > { %v4229_v48 = vmul.f32 %v4570_v62, %v4215_v61  ;;  %v4216_v58 = vmul.f32 %v5509_v44, %v4160_v32  ;;  %v4186_v39 = vpop.xlane.xlu1 %4185 }
 0x713   : > { %v4203_v60 = vadd.f32 1e-06, %v4195_v12  ;;  %v4196_v21 = vmul.f32 0.0078125, %v4186_v39 }
 0x714   : > { %v4243_v33 = vadd.f32 %v4571_v20, %v4229_v48  ;;  %v4230_v26 = vmul.f32 %v4570_v62, %v4216_v58 }
 0x715   : > { %5514 = vrsqrt.f32 %v4203_v60  ;;  %v4204_v37 = vadd.f32 1e-06, %v4196_v21 }
 0x716   : > { %4251 = vst [vmem:[%s6870_s24] sm:$0xff] %v4243_v33  ;;  %v4244_v47 = vadd.f32 %v4571_v20, %v4230_v26 }
 0x717   : > { %v5511_v53 = vpop.eup %5510  ;;  %5516 = vrsqrt.f32 %v4204_v37 }
 0x718   : > { %4252 = vst [vmem:[%s6870_s24 + $0x8] sm:$0xff] %v4244_v47  ;;  %v4217_v38 = vmul.f32 %v5511_v53, %v6837_v14  ;;  %v4188_v10 = vpop.xlane.xlu0 %4187 }
 0x719   : > { %v5513_v57 = vpop.eup %5512  ;;  %v4197_v46 = vmul.f32 0.0078125, %v4188_v10 }
 0x71a   : > { %v4231_v4 = vmul.f32 %v4570_v62, %v4217_v38  ;;  %v4218_v25 = vmul.f32 %v5513_v57, %v6839_v59  ;;  %v4190_v9 = vpop.xlane.xlu1 %4189 }
 0x71b   : > { %v4205_v6 = vadd.f32 1e-06, %v4197_v46  ;;  %v4198_v32 = vmul.f32 0.0078125, %v4190_v9 }
 0x71c   : > { %v4245_v31 = vadd.f32 %v4571_v20, %v4231_v4  ;;  %v4232_v1 = vmul.f32 %v4570_v62, %v4218_v25 }
 0x71d   : > { %5518 = vrsqrt.f32 %v4205_v6  ;;  %v4206_v43 = vadd.f32 1e-06, %v4198_v32 }
 0x71e   : > { %4253 = vst [vmem:[%s6870_s24 + $0x10] sm:$0xff] %v4245_v31  ;;  %v4246_v15 = vadd.f32 %v4571_v20, %v4232_v1 }
 0x71f   : > { %v5515_v56 = vpop.eup %5514  ;;  %5520 = vrsqrt.f32 %v4206_v43 }
 0x720   : > { %4254 = vst [vmem:[%s6870_s24 + $0x18] sm:$0xff] %v4246_v15  ;;  %v4219_v14 = vmul.f32 %v5515_v56, %v6845_v0 }
 0x721   : > { %v5517_v54 = vpop.eup %5516 }
 0x722   : > { %v4233_v59 = vmul.f32 %v4570_v62, %v4219_v14  ;;  %v4220_v45 = vmul.f32 %v5517_v54, %v6847_v42 }
 0x724   : > { %v4247_v50 = vadd.f32 %v4571_v20, %v4233_v59  ;;  %v4234_v13 = vmul.f32 %v4570_v62, %v4220_v45 }
 0x726   : > { %4255 = vst [vmem:[%s6870_s24 + $0x20] sm:$0xff] %v4247_v50  ;;  %v4248_v7 = vadd.f32 %v4571_v20, %v4234_v13 }
 0x727   : > { %v5519_v41 = vpop.eup %5518 }
 0x728   : > { %4256 = vst [vmem:[%s6870_s24 + $0x28] sm:$0xff] %v4248_v7  ;;  %v4221_v16 = vmul.f32 %v5519_v41, %v6853_v34 }
 0x729   : > { %v5521_v19 = vpop.eup %5520 }
 0x72a   : > { %v4235_v27 = vmul.f32 %v4570_v62, %v4221_v16  ;;  %v4222_v0 = vmul.f32 %v5521_v19, %v6855_v5 }
 0x72c   : > { %v4249_v24 = vadd.f32 %v4571_v20, %v4235_v27  ;;  %v4236_v42 = vmul.f32 %v4570_v62, %v4222_v0 }
 0x72e   : > { %4257 = vst [vmem:[%s6870_s24 + $0x30] sm:$0xff] %v4249_v24  ;;  %v4250_v28 = vadd.f32 %v4571_v20, %v4236_v42 }
 0x730   : > { %4258 = vst [vmem:[%s6870_s24 + $0x38] sm:$0xff] %v4250_v28 }
 0x731   : > { %5588 = shalt.err (!%p5585_p7)
}
 0x732   : > { %s5589_s16 = scalar_lea.hbm %s6889_s25, 1024  ;;  %s5593_s12 = scalar_lea.hbm %s6949_s11, 2048 }
 0x733   : > { %p5590_p8 = scmp.ne.s32.totalorder %s6889_s25, %s5589_s16  ;;  %p5594_p1 = scmp.lt.u32.totalorder %s6889_s25, %s6949_s11 }
 0x734   : > { %p5595_p0 = scmp.lt.u32.totalorder %s5593_s12, %s5589_s16  ;;  %p5597_p6 = scmp.lt.u32.totalorder %s5589_s16, %s6889_s25 }
 0x735   : > { %p5591_p11 = pnand %p5590_p8, %p7001_p9 }
 0x736   : > { %p5596_p5 = por %p5595_p0, %p5594_p1 }
 0x737   : > { %p5592_p13 = pneg %p5591_p11 }
 0x738   : > { %p5598_p10 = por %p5597_p6, %p5596_p5 }
 0x73a   : > { %p5599_p12 = pnand %p5598_p10, %p5592_p13 }
 0x73c   : > { %5602 = shalt.err (!%p5599_p12)
}
 0x73d   : > { %s5650_s21 = smov 128   ;;  %s5651_s15 = smov 8  }
 0x73e   : > { %5149 = dma.vmem_to_hbm [thread:$0]  (%p7001_p9), %s6891_s29, 1024, %s6889_s25, %s6897_s30, %s5650_s21, %s5650_s21, %s5651_s15  }
 0x73f PF: > { %p5161_p2 = scmp.ge.s32.totalorder %s5641_s20, 2  ;;  %s4288_s22 = sand.u32 1, %s5629_s17  }
 0x740   : > { %p7002_p3 = scmp.ne.s32.totalorder %s6955_s28, 0  ;;  %s4289_s16 = scalar_lea.sflag [#allocation7], %s4288_s22 }
 0x742   : > { %p5156_p4 = pnand %p5161_p2, %p7002_p3 }
 0x744   : > { %5624 = dma.done.wait (!%p5156_p4), %s4289_s16, 1024  }
 0x745   : > { %5626 = vsyncadd (!%p5156_p4), %s4289_s16, 4294966272  ;;  %s7003_s24 = sld [smem:[#allocation11_spill]]  ;;  %p22_p7 = scmp.ge.s32.totalorder %s5737_s23, 4  }
 0x746   : > { %s7004_s17 = smov %s5633_s18  ;;  %s7005_s18 = smov %s5637_s19 }
 0x747   : > { %s7007_s20 = smov %s5737_s23  ;;  %24 = sbr.rel (!%p22_p7) target bundleno = 4 (0x4), region = 106 }
 0x74b   : > { %s7006_s19 = smov %s7003_s24 }
 0x74e   :  { %4294 = vsyncpa [#allocation6], 1 }
 0x74f   :  { %4296 = vsyncpa [#allocation6 + $0x1], 1 }
 0x750   :  { %4297 = vsyncpa [#allocation7], 1 }
 0x751   :  { %4299 = vsyncpa [#allocation7 + $0x1], 1 }

</bundles_post_ra>
